<compile_context>
chip_gen: v6e
topology: v6e:2x2x1
jax: 0.10.0
libtpu: 0.0.40
codegen_flags: <defaults>
</compile_context>

<pallas_src>
import functools

import jax
import jax.numpy as jnp
from jax.experimental import pallas as pl
from jax.experimental.pallas import tpu as pltpu


def _round_up(v, m):
    return (v + m - 1) // m * m


def _fused_two_view_kernel(x_ref, w_ref, b_ref, o_ref, feat_ref, *,
                           c_in, f_out, kh, kw, w_img, w_feat, l1, oh1, ow1,
                           out_len, act0, act1, act2):
    """enc_0 + enc_1 + cat(dim=-1) + enc_2 for ONE image.

    x_ref:    (1, C, H*W)        image, spatial flattened onto lanes
    w_ref:    (3, F, KH*KW*C)    per-encoder weight tiles, r = (i*KW + j)*C + c
    b_ref:    (3, F, 1)          per-encoder biases
    o_ref:    (1, F, out_len)    enc_2 stride-1 output, flat with row stride
                                 w_feat, lane extent rounded up to 128
    feat_ref: (F, feat_len)      VMEM scratch holding cat([raw, wiener], -1),
                                 flattened with row stride w_feat = 2*OW1
    """
    f32 = jnp.float32

    # ---- enc_0 / enc_1: stride-1 valid conv over the flattened image ------
    w0 = w_ref[0].astype(f32)                                    # (F, KH*KW*C)
    w1 = w_ref[1].astype(f32)
    raw = jnp.broadcast_to(b_ref[0].astype(f32), (f_out, l1))    # bias folded
    wie = jnp.broadcast_to(b_ref[1].astype(f32), (f_out, l1))
    r = 0
    for i in range(kh):
        for j in range(kw):
            off = i * w_img + j                                  # static shift
            win = x_ref[0, :, pl.ds(off, l1)].astype(f32)        # ONE (C, L1) slice per tap
            for c in range(c_in):                                # shared by both encoders
                row = win[c:c + 1, :]                            # (1, L1)
                raw = raw + w0[:, r:r + 1] * row                 # (F, L1) VPU MAC
                wie = wie + w1[:, r:r + 1] * row
                r += 1
    if act0 is not None:
        raw = act0(raw)
    if act1 is not None:
        wie = act1(wie)

    # ---- torch.cat([raw, wiener], dim=-1): write rows side by side --------
    feat_ref[...] = jnp.zeros(feat_ref.shape, feat_ref.dtype)    # zero halo tail
    for oh in range(oh1):
        src = oh * w_img                                         # row start, stride W
        dst = oh * w_feat                                        # row start, stride 2*OW1
        feat_ref[:, dst:dst + ow1] = raw[:, src:src + ow1].astype(feat_ref.dtype)
        feat_ref[:, dst + ow1:dst + 2 * ow1] = wie[:, src:src + ow1].astype(feat_ref.dtype)

    # ---- enc_2 over the concatenated feature image (row stride w_feat) ----
    w2 = w_ref[2].astype(f32)
    acc = jnp.broadcast_to(b_ref[2].astype(f32), (f_out, out_len))
    r = 0
    for i in range(kh):
        for j in range(kw):
            off = i * w_feat + j
            win = feat_ref[:, pl.ds(off, out_len)].astype(f32)   # (F, out_len)
            for c in range(f_out):
                acc = acc + w2[:, r:r + 1] * win[c:c + 1, :]
                r += 1
    if act2 is not None:
        acc = act2(acc)

    o_ref[0, :, :] = acc.astype(o_ref.dtype)          # single unmasked store


def fused_two_view_conv(x, enc0_params, enc1_params, enc2_params,
                        activations=(None, None, None)):
    """Fused enc_0 / enc_1 / cat(dim=-1) / enc_2 forward.  NCHW in, NCHW out."""
    w0, b0 = enc0_params
    w1, b1 = enc1_params
    w2, b2 = enc2_params
    n, c, h, w_img = x.shape
    f_out, c_in, kh, kw = w0.shape
    assert c_in == c and f_out == c, "BiasedConv stand-in: in == out channels"
    assert w1.shape == w0.shape and w2.shape == w0.shape, \
        "stand-in encoders must share the BiasedConv shape"

    # Geometry (stride 1, padding 0 — BiasedConv defaults).
    oh1, ow1 = h - kh + 1, w_img - kw + 1             # enc_0 / enc_1 output
    w_feat = 2 * ow1                                  # width after cat(dim=-1)
    oh2, ow2 = oh1 - kh + 1, w_feat - kw + 1          # enc_2 output
    hw = h * w_img
    l1 = (oh1 - 1) * w_img + ow1                      # stride-1 flat extent (fits in hw)
    out_len = _round_up(oh2 * w_feat, 128)            # unmasked lane-dense store
    feat_len = _round_up(max(oh1 * w_feat,
                             out_len + (kh - 1) * w_feat + (kw - 1)), 128)
    rc = kh * kw * c

    def flat_w(wt):   # OIHW -> (F, KH*KW*C), r = (i*KW + j)*C + c
        return jnp.transpose(wt, (0, 2, 3, 1)).reshape(f_out, rc)

    w_all = jnp.stack([flat_w(w0), flat_w(w1), flat_w(w2)])      # (3, F, RC)
    b_all = jnp.stack([b0, b1, b2]).reshape(3, f_out, 1)         # (3, F, 1)
    x_flat = x.reshape(n, c, hw)                                 # free reshape

    kernel = functools.partial(
        _fused_two_view_kernel, c_in=c, f_out=f_out, kh=kh, kw=kw,
        w_img=w_img, w_feat=w_feat, l1=l1, oh1=oh1, ow1=ow1, out_len=out_len,
        act0=activations[0], act1=activations[1], act2=activations[2])

    pred_flat = pl.pallas_call(
        kernel,
        out_shape=jax.ShapeDtypeStruct((n, f_out, out_len), x.dtype),
        grid_spec=pltpu.PrefetchScalarGridSpec(
            num_scalar_prefetch=0,
            grid=(n,),
            in_specs=[
                pl.BlockSpec((1, c, hw), lambda i: (i, 0, 0)),
                pl.BlockSpec((3, f_out, rc), lambda i: (0, 0, 0)),
                pl.BlockSpec((3, f_out, 1), lambda i: (0, 0, 0)),
            ],
            out_specs=pl.BlockSpec((1, f_out, out_len), lambda i: (i, 0, 0)),
            scratch_shapes=[pltpu.VMEM((f_out, feat_len), jnp.float32)],
        ),
        compiler_params=pltpu.CompilerParams(
            dimension_semantics=("parallel",),
            # Safe on every generation (v7x physical VMEM is only 64 MiB).
            vmem_limit_bytes=32 * 1024 * 1024,
        ),
    )(x_flat, w_all, b_all)

    # Drop the conv's invalid tail columns (row stride inside the kernel was
    # w_feat); this tiny slice + reshape is the only XLA post-processing left.
    pred = pred_flat[:, :, :oh2 * w_feat].reshape(n, f_out, oh2, w_feat)
    return pred[:, :, :, :ow2]


def neureka_net_2views_forward(x, enc0_params, enc1_params, enc2_params,
                               activations=(None, None, None)):
    """Mirrors NeurekaNet_2Views.forward with BiasedConv stand-in encoders."""
    pred = fused_two_view_conv(x, enc0_params, enc1_params, enc2_params,
                               activations)
    n_views = 1   # TODO(synk): real encoders may return several views per input
    return {d: jnp.squeeze(pred) for d in range(n_views)}


def _conv_ref(x, w, b, activation=None):
    out = jax.lax.conv_general_dilated(
        x, w, window_strides=(1, 1), padding=[(0, 0), (0, 0)],
        dimension_numbers=("NCHW", "OIHW", "NCHW"))
    out = out + b.reshape(1, -1, 1, 1)
    if activation is not None:
        out = activation(out)
    return out


if __name__ == "__main__":
    key = jax.random.PRNGKey(0)
    k_x, k0, k1, k2, kb0, kb1, kb2 = jax.random.split(key, 7)

    filters, ksz = 4, (3, 3)
    batch, height, width = 2, 16, 16

    x = jax.random.normal(k_x, (batch, filters, height, width), jnp.float32)

    def mk_params(kw_, kb_):
        wt = 0.1 * jax.random.normal(kw_, (filters, filters, ksz[0], ksz[1]),
                                     jnp.float32)            # OIHW like PyTorch
        bs = 0.1 * jax.random.normal(kb_, (filters,), jnp.float32)
        return wt, bs

    p0, p1, p2 = mk_params(k0, kb0), mk_params(k1, kb1), mk_params(k2, kb2)

    fwd = jax.jit(lambda xx: neureka_net_2views_forward(xx, p0, p1, p2))
    preds = fwd(x)
    jax.block_until_ready(preds[0])

    # Pure-JAX reference of the same forward wiring.
    raw_ref = [_conv_ref(x, *p0)]
    wie_ref = [_conv_ref(x, *p1)]
    for d in range(len(raw_ref)):
        feat = jnp.concatenate([raw_ref[d], wie_ref[d]], axis=-1)
        pred_ref = jnp.squeeze(_conv_ref(feat, *p2))
        assert preds[d].shape == pred_ref.shape, (preds[d].shape, pred_ref.shape)
        err = float(jnp.max(jnp.abs(preds[d] - pred_ref)))
        assert jnp.allclose(preds[d], pred_ref, atol=1e-4, rtol=1e-4), err

    print("KERNEL_OK")
</pallas_src>

<mosaic_0001>
module attributes {stable_mosaic.version = 11 : i64} {
  func.func @_fused_two_view_kernel(%arg0: i32, %arg1: memref<1x4x256xf32, #tpu.memory_space<vmem>>, %arg2: memref<3x4x36xf32, #tpu.memory_space<vmem>>, %arg3: memref<3x4x1xf32, #tpu.memory_space<vmem>>, %arg4: memref<1x4x384xf32, #tpu.memory_space<vmem>>, %arg5: memref<4x512xf32, #tpu.memory_space<vmem>>) attributes {dimension_semantics = [#tpu.dimension_semantics<parallel>], iteration_bounds = array<i64: 2>, scalar_prefetch = 0 : i64, scratch_operands = 1 : i64, tpu.core_type = #tpu.core_type<tc>, window_params = [{transform_indices = @transform_0, window_bounds = array<i64: 1, 4, 256>}, {pipeline_mode = #tpu.pipeline_mode<synchronous>, transform_indices = @transform_1, window_bounds = array<i64: 3, 4, 36>}, {pipeline_mode = #tpu.pipeline_mode<synchronous>, transform_indices = @transform_2, window_bounds = array<i64: 3, 4, 1>}, {transform_indices = @transform_3, window_bounds = array<i64: 1, 4, 384>}]} {
    %c0 = arith.constant 0 : index
    %c0_0 = arith.constant 0 : index
    %c0_1 = arith.constant 0 : index
    %0 = vector.load %arg2[%c0, %c0_0, %c0_1] : memref<3x4x36xf32, #tpu.memory_space<vmem>>, vector<1x4x36xf32>
    %1 = vector.shape_cast %0 : vector<1x4x36xf32> to vector<4x36xf32>
    %c1 = arith.constant 1 : index
    %c0_2 = arith.constant 0 : index
    %c0_3 = arith.constant 0 : index
    %2 = vector.load %arg2[%c1, %c0_2, %c0_3] : memref<3x4x36xf32, #tpu.memory_space<vmem>>, vector<1x4x36xf32>
    %3 = vector.shape_cast %2 : vector<1x4x36xf32> to vector<4x36xf32>
    %c0_4 = arith.constant 0 : index
    %c0_5 = arith.constant 0 : index
    %c0_6 = arith.constant 0 : index
    %4 = vector.load %arg3[%c0_4, %c0_5, %c0_6] : memref<3x4x1xf32, #tpu.memory_space<vmem>>, vector<1x4x1xf32>
    %5 = vector.shape_cast %4 : vector<1x4x1xf32> to vector<4x1xf32>
    %6 = vector.shape_cast %5 : vector<4x1xf32> to vector<4x1xf32>
    %7 = vector.broadcast %6 : vector<4x1xf32> to vector<4x222xf32>
    %c1_7 = arith.constant 1 : index
    %c0_8 = arith.constant 0 : index
    %c0_9 = arith.constant 0 : index
    %8 = vector.load %arg3[%c1_7, %c0_8, %c0_9] : memref<3x4x1xf32, #tpu.memory_space<vmem>>, vector<1x4x1xf32>
    %9 = vector.shape_cast %8 : vector<1x4x1xf32> to vector<4x1xf32>
    %10 = vector.shape_cast %9 : vector<4x1xf32> to vector<4x1xf32>
    %11 = vector.broadcast %10 : vector<4x1xf32> to vector<4x222xf32>
    %c0_10 = arith.constant 0 : index
    %c0_11 = arith.constant 0 : index
    %c0_12 = arith.constant 0 : index
    %12 = vector.load %arg1[%c0_10, %c0_11, %c0_12] : memref<1x4x256xf32, #tpu.memory_space<vmem>>, vector<1x4x222xf32>
    %13 = vector.shape_cast %12 : vector<1x4x222xf32> to vector<4x222xf32>
    %14 = vector.extract_strided_slice %13 {offsets = [0, 0], sizes = [1, 222], strides = [1, 1]} : vector<4x222xf32> to vector<1x222xf32>
    %15 = vector.extract_strided_slice %1 {offsets = [0, 0], sizes = [4, 1], strides = [1, 1]} : vector<4x36xf32> to vector<4x1xf32>
    %16 = vector.broadcast %15 : vector<4x1xf32> to vector<4x222xf32>
    %17 = vector.broadcast %14 : vector<1x222xf32> to vector<4x222xf32>
    %18 = arith.mulf %16, %17 : vector<4x222xf32>
    %19 = arith.addf %7, %18 : vector<4x222xf32>
    %20 = vector.extract_strided_slice %3 {offsets = [0, 0], sizes = [4, 1], strides = [1, 1]} : vector<4x36xf32> to vector<4x1xf32>
    %21 = vector.broadcast %20 : vector<4x1xf32> to vector<4x222xf32>
    %22 = vector.broadcast %14 : vector<1x222xf32> to vector<4x222xf32>
    %23 = arith.mulf %21, %22 : vector<4x222xf32>
    %24 = arith.addf %11, %23 : vector<4x222xf32>
    %25 = vector.extract_strided_slice %13 {offsets = [1, 0], sizes = [1, 222], strides = [1, 1]} : vector<4x222xf32> to vector<1x222xf32>
    %26 = vector.extract_strided_slice %1 {offsets = [0, 1], sizes = [4, 1], strides = [1, 1]} : vector<4x36xf32> to vector<4x1xf32>
    %27 = vector.broadcast %26 : vector<4x1xf32> to vector<4x222xf32>
    %28 = vector.broadcast %25 : vector<1x222xf32> to vector<4x222xf32>
    %29 = arith.mulf %27, %28 : vector<4x222xf32>
    %30 = arith.addf %19, %29 : vector<4x222xf32>
    %31 = vector.extract_strided_slice %3 {offsets = [0, 1], sizes = [4, 1], strides = [1, 1]} : vector<4x36xf32> to vector<4x1xf32>
    %32 = vector.broadcast %31 : vector<4x1xf32> to vector<4x222xf32>
    %33 = vector.broadcast %25 : vector<1x222xf32> to vector<4x222xf32>
    %34 = arith.mulf %32, %33 : vector<4x222xf32>
    %35 = arith.addf %24, %34 : vector<4x222xf32>
    %36 = vector.extract_strided_slice %13 {offsets = [2, 0], sizes = [1, 222], strides = [1, 1]} : vector<4x222xf32> to vector<1x222xf32>
    %37 = vector.extract_strided_slice %1 {offsets = [0, 2], sizes = [4, 1], strides = [1, 1]} : vector<4x36xf32> to vector<4x1xf32>
    %38 = vector.broadcast %37 : vector<4x1xf32> to vector<4x222xf32>
    %39 = vector.broadcast %36 : vector<1x222xf32> to vector<4x222xf32>
    %40 = arith.mulf %38, %39 : vector<4x222xf32>
    %41 = arith.addf %30, %40 : vector<4x222xf32>
    %42 = vector.extract_strided_slice %3 {offsets = [0, 2], sizes = [4, 1], strides = [1, 1]} : vector<4x36xf32> to vector<4x1xf32>
    %43 = vector.broadcast %42 : vector<4x1xf32> to vector<4x222xf32>
    %44 = vector.broadcast %36 : vector<1x222xf32> to vector<4x222xf32>
    %45 = arith.mulf %43, %44 : vector<4x222xf32>
    %46 = arith.addf %35, %45 : vector<4x222xf32>
    %47 = vector.extract_strided_slice %13 {offsets = [3, 0], sizes = [1, 222], strides = [1, 1]} : vector<4x222xf32> to vector<1x222xf32>
    %48 = vector.extract_strided_slice %1 {offsets = [0, 3], sizes = [4, 1], strides = [1, 1]} : vector<4x36xf32> to vector<4x1xf32>
    %49 = vector.broadcast %48 : vector<4x1xf32> to vector<4x222xf32>
    %50 = vector.broadcast %47 : vector<1x222xf32> to vector<4x222xf32>
    %51 = arith.mulf %49, %50 : vector<4x222xf32>
    %52 = arith.addf %41, %51 : vector<4x222xf32>
    %53 = vector.extract_strided_slice %3 {offsets = [0, 3], sizes = [4, 1], strides = [1, 1]} : vector<4x36xf32> to vector<4x1xf32>
    %54 = vector.broadcast %53 : vector<4x1xf32> to vector<4x222xf32>
    %55 = vector.broadcast %47 : vector<1x222xf32> to vector<4x222xf32>
    %56 = arith.mulf %54, %55 : vector<4x222xf32>
    %57 = arith.addf %46, %56 : vector<4x222xf32>
    %c0_13 = arith.constant 0 : index
    %c0_14 = arith.constant 0 : index
    %c1_15 = arith.constant 1 : index
    %58 = vector.load %arg1[%c0_13, %c0_14, %c1_15] : memref<1x4x256xf32, #tpu.memory_space<vmem>>, vector<1x4x222xf32>
    %59 = vector.shape_cast %58 : vector<1x4x222xf32> to vector<4x222xf32>
    %60 = vector.extract_strided_slice %59 {offsets = [0, 0], sizes = [1, 222], strides = [1, 1]} : vector<4x222xf32> to vector<1x222xf32>
    %61 = vector.extract_strided_slice %1 {offsets = [0, 4], sizes = [4, 1], strides = [1, 1]} : vector<4x36xf32> to vector<4x1xf32>
    %62 = vector.broadcast %61 : vector<4x1xf32> to vector<4x222xf32>
    %63 = vector.broadcast %60 : vector<1x222xf32> to vector<4x222xf32>
    %64 = arith.mulf %62, %63 : vector<4x222xf32>
    %65 = arith.addf %52, %64 : vector<4x222xf32>
    %66 = vector.extract_strided_slice %3 {offsets = [0, 4], sizes = [4, 1], strides = [1, 1]} : vector<4x36xf32> to vector<4x1xf32>
    %67 = vector.broadcast %66 : vector<4x1xf32> to vector<4x222xf32>
    %68 = vector.broadcast %60 : vector<1x222xf32> to vector<4x222xf32>
    %69 = arith.mulf %67, %68 : vector<4x222xf32>
    %70 = arith.addf %57, %69 : vector<4x222xf32>
    %71 = vector.extract_strided_slice %59 {offsets = [1, 0], sizes = [1, 222], strides = [1, 1]} : vector<4x222xf32> to vector<1x222xf32>
    %72 = vector.extract_strided_slice %1 {offsets = [0, 5], sizes = [4, 1], strides = [1, 1]} : vector<4x36xf32> to vector<4x1xf32>
    %73 = vector.broadcast %72 : vector<4x1xf32> to vector<4x222xf32>
    %74 = vector.broadcast %71 : vector<1x222xf32> to vector<4x222xf32>
    %75 = arith.mulf %73, %74 : vector<4x222xf32>
    %76 = arith.addf %65, %75 : vector<4x222xf32>
    %77 = vector.extract_strided_slice %3 {offsets = [0, 5], sizes = [4, 1], strides = [1, 1]} : vector<4x36xf32> to vector<4x1xf32>
    %78 = vector.broadcast %77 : vector<4x1xf32> to vector<4x222xf32>
    %79 = vector.broadcast %71 : vector<1x222xf32> to vector<4x222xf32>
    %80 = arith.mulf %78, %79 : vector<4x222xf32>
    %81 = arith.addf %70, %80 : vector<4x222xf32>
    %82 = vector.extract_strided_slice %59 {offsets = [2, 0], sizes = [1, 222], strides = [1, 1]} : vector<4x222xf32> to vector<1x222xf32>
    %83 = vector.extract_strided_slice %1 {offsets = [0, 6], sizes = [4, 1], strides = [1, 1]} : vector<4x36xf32> to vector<4x1xf32>
    %84 = vector.broadcast %83 : vector<4x1xf32> to vector<4x222xf32>
    %85 = vector.broadcast %82 : vector<1x222xf32> to vector<4x222xf32>
    %86 = arith.mulf %84, %85 : vector<4x222xf32>
    %87 = arith.addf %76, %86 : vector<4x222xf32>
    %88 = vector.extract_strided_slice %3 {offsets = [0, 6], sizes = [4, 1], strides = [1, 1]} : vector<4x36xf32> to vector<4x1xf32>
    %89 = vector.broadcast %88 : vector<4x1xf32> to vector<4x222xf32>
    %90 = vector.broadcast %82 : vector<1x222xf32> to vector<4x222xf32>
    %91 = arith.mulf %89, %90 : vector<4x222xf32>
    %92 = arith.addf %81, %91 : vector<4x222xf32>
    %93 = vector.extract_strided_slice %59 {offsets = [3, 0], sizes = [1, 222], strides = [1, 1]} : vector<4x222xf32> to vector<1x222xf32>
    %94 = vector.extract_strided_slice %1 {offsets = [0, 7], sizes = [4, 1], strides = [1, 1]} : vector<4x36xf32> to vector<4x1xf32>
    %95 = vector.broadcast %94 : vector<4x1xf32> to vector<4x222xf32>
    %96 = vector.broadcast %93 : vector<1x222xf32> to vector<4x222xf32>
    %97 = arith.mulf %95, %96 : vector<4x222xf32>
    %98 = arith.addf %87, %97 : vector<4x222xf32>
    %99 = vector.extract_strided_slice %3 {offsets = [0, 7], sizes = [4, 1], strides = [1, 1]} : vector<4x36xf32> to vector<4x1xf32>
    %100 = vector.broadcast %99 : vector<4x1xf32> to vector<4x222xf32>
    %101 = vector.broadcast %93 : vector<1x222xf32> to vector<4x222xf32>
    %102 = arith.mulf %100, %101 : vector<4x222xf32>
    %103 = arith.addf %92, %102 : vector<4x222xf32>
    %c0_16 = arith.constant 0 : index
    %c0_17 = arith.constant 0 : index
    %c2 = arith.constant 2 : index
    %104 = vector.load %arg1[%c0_16, %c0_17, %c2] : memref<1x4x256xf32, #tpu.memory_space<vmem>>, vector<1x4x222xf32>
    %105 = vector.shape_cast %104 : vector<1x4x222xf32> to vector<4x222xf32>
    %106 = vector.extract_strided_slice %105 {offsets = [0, 0], sizes = [1, 222], strides = [1, 1]} : vector<4x222xf32> to vector<1x222xf32>
    %107 = vector.extract_strided_slice %1 {offsets = [0, 8], sizes = [4, 1], strides = [1, 1]} : vector<4x36xf32> to vector<4x1xf32>
    %108 = vector.broadcast %107 : vector<4x1xf32> to vector<4x222xf32>
    %109 = vector.broadcast %106 : vector<1x222xf32> to vector<4x222xf32>
    %110 = arith.mulf %108, %109 : vector<4x222xf32>
    %111 = arith.addf %98, %110 : vector<4x222xf32>
    %112 = vector.extract_strided_slice %3 {offsets = [0, 8], sizes = [4, 1], strides = [1, 1]} : vector<4x36xf32> to vector<4x1xf32>
    %113 = vector.broadcast %112 : vector<4x1xf32> to vector<4x222xf32>
    %114 = vector.broadcast %106 : vector<1x222xf32> to vector<4x222xf32>
    %115 = arith.mulf %113, %114 : vector<4x222xf32>
    %116 = arith.addf %103, %115 : vector<4x222xf32>
    %117 = vector.extract_strided_slice %105 {offsets = [1, 0], sizes = [1, 222], strides = [1, 1]} : vector<4x222xf32> to vector<1x222xf32>
    %118 = vector.extract_strided_slice %1 {offsets = [0, 9], sizes = [4, 1], strides = [1, 1]} : vector<4x36xf32> to vector<4x1xf32>
    %119 = vector.broadcast %118 : vector<4x1xf32> to vector<4x222xf32>
    %120 = vector.broadcast %117 : vector<1x222xf32> to vector<4x222xf32>
    %121 = arith.mulf %119, %120 : vector<4x222xf32>
    %122 = arith.addf %111, %121 : vector<4x222xf32>
    %123 = vector.extract_strided_slice %3 {offsets = [0, 9], sizes = [4, 1], strides = [1, 1]} : vector<4x36xf32> to vector<4x1xf32>
    %124 = vector.broadcast %123 : vector<4x1xf32> to vector<4x222xf32>
    %125 = vector.broadcast %117 : vector<1x222xf32> to vector<4x222xf32>
    %126 = arith.mulf %124, %125 : vector<4x222xf32>
    %127 = arith.addf %116, %126 : vector<4x222xf32>
    %128 = vector.extract_strided_slice %105 {offsets = [2, 0], sizes = [1, 222], strides = [1, 1]} : vector<4x222xf32> to vector<1x222xf32>
    %129 = vector.extract_strided_slice %1 {offsets = [0, 10], sizes = [4, 1], strides = [1, 1]} : vector<4x36xf32> to vector<4x1xf32>
    %130 = vector.broadcast %129 : vector<4x1xf32> to vector<4x222xf32>
    %131 = vector.broadcast %128 : vector<1x222xf32> to vector<4x222xf32>
    %132 = arith.mulf %130, %131 : vector<4x222xf32>
    %133 = arith.addf %122, %132 : vector<4x222xf32>
    %134 = vector.extract_strided_slice %3 {offsets = [0, 10], sizes = [4, 1], strides = [1, 1]} : vector<4x36xf32> to vector<4x1xf32>
    %135 = vector.broadcast %134 : vector<4x1xf32> to vector<4x222xf32>
    %136 = vector.broadcast %128 : vector<1x222xf32> to vector<4x222xf32>
    %137 = arith.mulf %135, %136 : vector<4x222xf32>
    %138 = arith.addf %127, %137 : vector<4x222xf32>
    %139 = vector.extract_strided_slice %105 {offsets = [3, 0], sizes = [1, 222], strides = [1, 1]} : vector<4x222xf32> to vector<1x222xf32>
    %140 = vector.extract_strided_slice %1 {offsets = [0, 11], sizes = [4, 1], strides = [1, 1]} : vector<4x36xf32> to vector<4x1xf32>
    %141 = vector.broadcast %140 : vector<4x1xf32> to vector<4x222xf32>
    %142 = vector.broadcast %139 : vector<1x222xf32> to vector<4x222xf32>
    %143 = arith.mulf %141, %142 : vector<4x222xf32>
    %144 = arith.addf %133, %143 : vector<4x222xf32>
    %145 = vector.extract_strided_slice %3 {offsets = [0, 11], sizes = [4, 1], strides = [1, 1]} : vector<4x36xf32> to vector<4x1xf32>
    %146 = vector.broadcast %145 : vector<4x1xf32> to vector<4x222xf32>
    %147 = vector.broadcast %139 : vector<1x222xf32> to vector<4x222xf32>
    %148 = arith.mulf %146, %147 : vector<4x222xf32>
    %149 = arith.addf %138, %148 : vector<4x222xf32>
    %c0_18 = arith.constant 0 : index
    %c0_19 = arith.constant 0 : index
    %c16 = arith.constant 16 : index
    %150 = vector.load %arg1[%c0_18, %c0_19, %c16] : memref<1x4x256xf32, #tpu.memory_space<vmem>>, vector<1x4x222xf32>
    %151 = vector.shape_cast %150 : vector<1x4x222xf32> to vector<4x222xf32>
    %152 = vector.extract_strided_slice %151 {offsets = [0, 0], sizes = [1, 222], strides = [1, 1]} : vector<4x222xf32> to vector<1x222xf32>
    %153 = vector.extract_strided_slice %1 {offsets = [0, 12], sizes = [4, 1], strides = [1, 1]} : vector<4x36xf32> to vector<4x1xf32>
    %154 = vector.broadcast %153 : vector<4x1xf32> to vector<4x222xf32>
    %155 = vector.broadcast %152 : vector<1x222xf32> to vector<4x222xf32>
    %156 = arith.mulf %154, %155 : vector<4x222xf32>
    %157 = arith.addf %144, %156 : vector<4x222xf32>
    %158 = vector.extract_strided_slice %3 {offsets = [0, 12], sizes = [4, 1], strides = [1, 1]} : vector<4x36xf32> to vector<4x1xf32>
    %159 = vector.broadcast %158 : vector<4x1xf32> to vector<4x222xf32>
    %160 = vector.broadcast %152 : vector<1x222xf32> to vector<4x222xf32>
    %161 = arith.mulf %159, %160 : vector<4x222xf32>
    %162 = arith.addf %149, %161 : vector<4x222xf32>
    %163 = vector.extract_strided_slice %151 {offsets = [1, 0], sizes = [1, 222], strides = [1, 1]} : vector<4x222xf32> to vector<1x222xf32>
    %164 = vector.extract_strided_slice %1 {offsets = [0, 13], sizes = [4, 1], strides = [1, 1]} : vector<4x36xf32> to vector<4x1xf32>
    %165 = vector.broadcast %164 : vector<4x1xf32> to vector<4x222xf32>
    %166 = vector.broadcast %163 : vector<1x222xf32> to vector<4x222xf32>
    %167 = arith.mulf %165, %166 : vector<4x222xf32>
    %168 = arith.addf %157, %167 : vector<4x222xf32>
    %169 = vector.extract_strided_slice %3 {offsets = [0, 13], sizes = [4, 1], strides = [1, 1]} : vector<4x36xf32> to vector<4x1xf32>
    %170 = vector.broadcast %169 : vector<4x1xf32> to vector<4x222xf32>
    %171 = vector.broadcast %163 : vector<1x222xf32> to vector<4x222xf32>
    %172 = arith.mulf %170, %171 : vector<4x222xf32>
    %173 = arith.addf %162, %172 : vector<4x222xf32>
    %174 = vector.extract_strided_slice %151 {offsets = [2, 0], sizes = [1, 222], strides = [1, 1]} : vector<4x222xf32> to vector<1x222xf32>
    %175 = vector.extract_strided_slice %1 {offsets = [0, 14], sizes = [4, 1], strides = [1, 1]} : vector<4x36xf32> to vector<4x1xf32>
    %176 = vector.broadcast %175 : vector<4x1xf32> to vector<4x222xf32>
    %177 = vector.broadcast %174 : vector<1x222xf32> to vector<4x222xf32>
    %178 = arith.mulf %176, %177 : vector<4x222xf32>
    %179 = arith.addf %168, %178 : vector<4x222xf32>
    %180 = vector.extract_strided_slice %3 {offsets = [0, 14], sizes = [4, 1], strides = [1, 1]} : vector<4x36xf32> to vector<4x1xf32>
    %181 = vector.broadcast %180 : vector<4x1xf32> to vector<4x222xf32>
    %182 = vector.broadcast %174 : vector<1x222xf32> to vector<4x222xf32>
    %183 = arith.mulf %181, %182 : vector<4x222xf32>
    %184 = arith.addf %173, %183 : vector<4x222xf32>
    %185 = vector.extract_strided_slice %151 {offsets = [3, 0], sizes = [1, 222], strides = [1, 1]} : vector<4x222xf32> to vector<1x222xf32>
    %186 = vector.extract_strided_slice %1 {offsets = [0, 15], sizes = [4, 1], strides = [1, 1]} : vector<4x36xf32> to vector<4x1xf32>
    %187 = vector.broadcast %186 : vector<4x1xf32> to vector<4x222xf32>
    %188 = vector.broadcast %185 : vector<1x222xf32> to vector<4x222xf32>
    %189 = arith.mulf %187, %188 : vector<4x222xf32>
    %190 = arith.addf %179, %189 : vector<4x222xf32>
    %191 = vector.extract_strided_slice %3 {offsets = [0, 15], sizes = [4, 1], strides = [1, 1]} : vector<4x36xf32> to vector<4x1xf32>
    %192 = vector.broadcast %191 : vector<4x1xf32> to vector<4x222xf32>
    %193 = vector.broadcast %185 : vector<1x222xf32> to vector<4x222xf32>
    %194 = arith.mulf %192, %193 : vector<4x222xf32>
    %195 = arith.addf %184, %194 : vector<4x222xf32>
    %c0_20 = arith.constant 0 : index
    %c0_21 = arith.constant 0 : index
    %c17 = arith.constant 17 : index
    %196 = vector.load %arg1[%c0_20, %c0_21, %c17] : memref<1x4x256xf32, #tpu.memory_space<vmem>>, vector<1x4x222xf32>
    %197 = vector.shape_cast %196 : vector<1x4x222xf32> to vector<4x222xf32>
    %198 = vector.extract_strided_slice %197 {offsets = [0, 0], sizes = [1, 222], strides = [1, 1]} : vector<4x222xf32> to vector<1x222xf32>
    %199 = vector.extract_strided_slice %1 {offsets = [0, 16], sizes = [4, 1], strides = [1, 1]} : vector<4x36xf32> to vector<4x1xf32>
    %200 = vector.broadcast %199 : vector<4x1xf32> to vector<4x222xf32>
    %201 = vector.broadcast %198 : vector<1x222xf32> to vector<4x222xf32>
    %202 = arith.mulf %200, %201 : vector<4x222xf32>
    %203 = arith.addf %190, %202 : vector<4x222xf32>
    %204 = vector.extract_strided_slice %3 {offsets = [0, 16], sizes = [4, 1], strides = [1, 1]} : vector<4x36xf32> to vector<4x1xf32>
    %205 = vector.broadcast %204 : vector<4x1xf32> to vector<4x222xf32>
    %206 = vector.broadcast %198 : vector<1x222xf32> to vector<4x222xf32>
    %207 = arith.mulf %205, %206 : vector<4x222xf32>
    %208 = arith.addf %195, %207 : vector<4x222xf32>
    %209 = vector.extract_strided_slice %197 {offsets = [1, 0], sizes = [1, 222], strides = [1, 1]} : vector<4x222xf32> to vector<1x222xf32>
    %210 = vector.extract_strided_slice %1 {offsets = [0, 17], sizes = [4, 1], strides = [1, 1]} : vector<4x36xf32> to vector<4x1xf32>
    %211 = vector.broadcast %210 : vector<4x1xf32> to vector<4x222xf32>
    %212 = vector.broadcast %209 : vector<1x222xf32> to vector<4x222xf32>
    %213 = arith.mulf %211, %212 : vector<4x222xf32>
    %214 = arith.addf %203, %213 : vector<4x222xf32>
    %215 = vector.extract_strided_slice %3 {offsets = [0, 17], sizes = [4, 1], strides = [1, 1]} : vector<4x36xf32> to vector<4x1xf32>
    %216 = vector.broadcast %215 : vector<4x1xf32> to vector<4x222xf32>
    %217 = vector.broadcast %209 : vector<1x222xf32> to vector<4x222xf32>
    %218 = arith.mulf %216, %217 : vector<4x222xf32>
    %219 = arith.addf %208, %218 : vector<4x222xf32>
    %220 = vector.extract_strided_slice %197 {offsets = [2, 0], sizes = [1, 222], strides = [1, 1]} : vector<4x222xf32> to vector<1x222xf32>
    %221 = vector.extract_strided_slice %1 {offsets = [0, 18], sizes = [4, 1], strides = [1, 1]} : vector<4x36xf32> to vector<4x1xf32>
    %222 = vector.broadcast %221 : vector<4x1xf32> to vector<4x222xf32>
    %223 = vector.broadcast %220 : vector<1x222xf32> to vector<4x222xf32>
    %224 = arith.mulf %222, %223 : vector<4x222xf32>
    %225 = arith.addf %214, %224 : vector<4x222xf32>
    %226 = vector.extract_strided_slice %3 {offsets = [0, 18], sizes = [4, 1], strides = [1, 1]} : vector<4x36xf32> to vector<4x1xf32>
    %227 = vector.broadcast %226 : vector<4x1xf32> to vector<4x222xf32>
    %228 = vector.broadcast %220 : vector<1x222xf32> to vector<4x222xf32>
    %229 = arith.mulf %227, %228 : vector<4x222xf32>
    %230 = arith.addf %219, %229 : vector<4x222xf32>
    %231 = vector.extract_strided_slice %197 {offsets = [3, 0], sizes = [1, 222], strides = [1, 1]} : vector<4x222xf32> to vector<1x222xf32>
    %232 = vector.extract_strided_slice %1 {offsets = [0, 19], sizes = [4, 1], strides = [1, 1]} : vector<4x36xf32> to vector<4x1xf32>
    %233 = vector.broadcast %232 : vector<4x1xf32> to vector<4x222xf32>
    %234 = vector.broadcast %231 : vector<1x222xf32> to vector<4x222xf32>
    %235 = arith.mulf %233, %234 : vector<4x222xf32>
    %236 = arith.addf %225, %235 : vector<4x222xf32>
    %237 = vector.extract_strided_slice %3 {offsets = [0, 19], sizes = [4, 1], strides = [1, 1]} : vector<4x36xf32> to vector<4x1xf32>
    %238 = vector.broadcast %237 : vector<4x1xf32> to vector<4x222xf32>
    %239 = vector.broadcast %231 : vector<1x222xf32> to vector<4x222xf32>
    %240 = arith.mulf %238, %239 : vector<4x222xf32>
    %241 = arith.addf %230, %240 : vector<4x222xf32>
    %c0_22 = arith.constant 0 : index
    %c0_23 = arith.constant 0 : index
    %c18 = arith.constant 18 : index
    %242 = vector.load %arg1[%c0_22, %c0_23, %c18] : memref<1x4x256xf32, #tpu.memory_space<vmem>>, vector<1x4x222xf32>
    %243 = vector.shape_cast %242 : vector<1x4x222xf32> to vector<4x222xf32>
    %244 = vector.extract_strided_slice %243 {offsets = [0, 0], sizes = [1, 222], strides = [1, 1]} : vector<4x222xf32> to vector<1x222xf32>
    %245 = vector.extract_strided_slice %1 {offsets = [0, 20], sizes = [4, 1], strides = [1, 1]} : vector<4x36xf32> to vector<4x1xf32>
    %246 = vector.broadcast %245 : vector<4x1xf32> to vector<4x222xf32>
    %247 = vector.broadcast %244 : vector<1x222xf32> to vector<4x222xf32>
    %248 = arith.mulf %246, %247 : vector<4x222xf32>
    %249 = arith.addf %236, %248 : vector<4x222xf32>
    %250 = vector.extract_strided_slice %3 {offsets = [0, 20], sizes = [4, 1], strides = [1, 1]} : vector<4x36xf32> to vector<4x1xf32>
    %251 = vector.broadcast %250 : vector<4x1xf32> to vector<4x222xf32>
    %252 = vector.broadcast %244 : vector<1x222xf32> to vector<4x222xf32>
    %253 = arith.mulf %251, %252 : vector<4x222xf32>
    %254 = arith.addf %241, %253 : vector<4x222xf32>
    %255 = vector.extract_strided_slice %243 {offsets = [1, 0], sizes = [1, 222], strides = [1, 1]} : vector<4x222xf32> to vector<1x222xf32>
    %256 = vector.extract_strided_slice %1 {offsets = [0, 21], sizes = [4, 1], strides = [1, 1]} : vector<4x36xf32> to vector<4x1xf32>
    %257 = vector.broadcast %256 : vector<4x1xf32> to vector<4x222xf32>
    %258 = vector.broadcast %255 : vector<1x222xf32> to vector<4x222xf32>
    %259 = arith.mulf %257, %258 : vector<4x222xf32>
    %260 = arith.addf %249, %259 : vector<4x222xf32>
    %261 = vector.extract_strided_slice %3 {offsets = [0, 21], sizes = [4, 1], strides = [1, 1]} : vector<4x36xf32> to vector<4x1xf32>
    %262 = vector.broadcast %261 : vector<4x1xf32> to vector<4x222xf32>
    %263 = vector.broadcast %255 : vector<1x222xf32> to vector<4x222xf32>
    %264 = arith.mulf %262, %263 : vector<4x222xf32>
    %265 = arith.addf %254, %264 : vector<4x222xf32>
    %266 = vector.extract_strided_slice %243 {offsets = [2, 0], sizes = [1, 222], strides = [1, 1]} : vector<4x222xf32> to vector<1x222xf32>
    %267 = vector.extract_strided_slice %1 {offsets = [0, 22], sizes = [4, 1], strides = [1, 1]} : vector<4x36xf32> to vector<4x1xf32>
    %268 = vector.broadcast %267 : vector<4x1xf32> to vector<4x222xf32>
    %269 = vector.broadcast %266 : vector<1x222xf32> to vector<4x222xf32>
    %270 = arith.mulf %268, %269 : vector<4x222xf32>
    %271 = arith.addf %260, %270 : vector<4x222xf32>
    %272 = vector.extract_strided_slice %3 {offsets = [0, 22], sizes = [4, 1], strides = [1, 1]} : vector<4x36xf32> to vector<4x1xf32>
    %273 = vector.broadcast %272 : vector<4x1xf32> to vector<4x222xf32>
    %274 = vector.broadcast %266 : vector<1x222xf32> to vector<4x222xf32>
    %275 = arith.mulf %273, %274 : vector<4x222xf32>
    %276 = arith.addf %265, %275 : vector<4x222xf32>
    %277 = vector.extract_strided_slice %243 {offsets = [3, 0], sizes = [1, 222], strides = [1, 1]} : vector<4x222xf32> to vector<1x222xf32>
    %278 = vector.extract_strided_slice %1 {offsets = [0, 23], sizes = [4, 1], strides = [1, 1]} : vector<4x36xf32> to vector<4x1xf32>
    %279 = vector.broadcast %278 : vector<4x1xf32> to vector<4x222xf32>
    %280 = vector.broadcast %277 : vector<1x222xf32> to vector<4x222xf32>
    %281 = arith.mulf %279, %280 : vector<4x222xf32>
    %282 = arith.addf %271, %281 : vector<4x222xf32>
    %283 = vector.extract_strided_slice %3 {offsets = [0, 23], sizes = [4, 1], strides = [1, 1]} : vector<4x36xf32> to vector<4x1xf32>
    %284 = vector.broadcast %283 : vector<4x1xf32> to vector<4x222xf32>
    %285 = vector.broadcast %277 : vector<1x222xf32> to vector<4x222xf32>
    %286 = arith.mulf %284, %285 : vector<4x222xf32>
    %287 = arith.addf %276, %286 : vector<4x222xf32>
    %c0_24 = arith.constant 0 : index
    %c0_25 = arith.constant 0 : index
    %c32 = arith.constant 32 : index
    %288 = vector.load %arg1[%c0_24, %c0_25, %c32] : memref<1x4x256xf32, #tpu.memory_space<vmem>>, vector<1x4x222xf32>
    %289 = vector.shape_cast %288 : vector<1x4x222xf32> to vector<4x222xf32>
    %290 = vector.extract_strided_slice %289 {offsets = [0, 0], sizes = [1, 222], strides = [1, 1]} : vector<4x222xf32> to vector<1x222xf32>
    %291 = vector.extract_strided_slice %1 {offsets = [0, 24], sizes = [4, 1], strides = [1, 1]} : vector<4x36xf32> to vector<4x1xf32>
    %292 = vector.broadcast %291 : vector<4x1xf32> to vector<4x222xf32>
    %293 = vector.broadcast %290 : vector<1x222xf32> to vector<4x222xf32>
    %294 = arith.mulf %292, %293 : vector<4x222xf32>
    %295 = arith.addf %282, %294 : vector<4x222xf32>
    %296 = vector.extract_strided_slice %3 {offsets = [0, 24], sizes = [4, 1], strides = [1, 1]} : vector<4x36xf32> to vector<4x1xf32>
    %297 = vector.broadcast %296 : vector<4x1xf32> to vector<4x222xf32>
    %298 = vector.broadcast %290 : vector<1x222xf32> to vector<4x222xf32>
    %299 = arith.mulf %297, %298 : vector<4x222xf32>
    %300 = arith.addf %287, %299 : vector<4x222xf32>
    %301 = vector.extract_strided_slice %289 {offsets = [1, 0], sizes = [1, 222], strides = [1, 1]} : vector<4x222xf32> to vector<1x222xf32>
    %302 = vector.extract_strided_slice %1 {offsets = [0, 25], sizes = [4, 1], strides = [1, 1]} : vector<4x36xf32> to vector<4x1xf32>
    %303 = vector.broadcast %302 : vector<4x1xf32> to vector<4x222xf32>
    %304 = vector.broadcast %301 : vector<1x222xf32> to vector<4x222xf32>
    %305 = arith.mulf %303, %304 : vector<4x222xf32>
    %306 = arith.addf %295, %305 : vector<4x222xf32>
    %307 = vector.extract_strided_slice %3 {offsets = [0, 25], sizes = [4, 1], strides = [1, 1]} : vector<4x36xf32> to vector<4x1xf32>
    %308 = vector.broadcast %307 : vector<4x1xf32> to vector<4x222xf32>
    %309 = vector.broadcast %301 : vector<1x222xf32> to vector<4x222xf32>
    %310 = arith.mulf %308, %309 : vector<4x222xf32>
    %311 = arith.addf %300, %310 : vector<4x222xf32>
    %312 = vector.extract_strided_slice %289 {offsets = [2, 0], sizes = [1, 222], strides = [1, 1]} : vector<4x222xf32> to vector<1x222xf32>
    %313 = vector.extract_strided_slice %1 {offsets = [0, 26], sizes = [4, 1], strides = [1, 1]} : vector<4x36xf32> to vector<4x1xf32>
    %314 = vector.broadcast %313 : vector<4x1xf32> to vector<4x222xf32>
    %315 = vector.broadcast %312 : vector<1x222xf32> to vector<4x222xf32>
    %316 = arith.mulf %314, %315 : vector<4x222xf32>
    %317 = arith.addf %306, %316 : vector<4x222xf32>
    %318 = vector.extract_strided_slice %3 {offsets = [0, 26], sizes = [4, 1], strides = [1, 1]} : vector<4x36xf32> to vector<4x1xf32>
    %319 = vector.broadcast %318 : vector<4x1xf32> to vector<4x222xf32>
    %320 = vector.broadcast %312 : vector<1x222xf32> to vector<4x222xf32>
    %321 = arith.mulf %319, %320 : vector<4x222xf32>
    %322 = arith.addf %311, %321 : vector<4x222xf32>
    %323 = vector.extract_strided_slice %289 {offsets = [3, 0], sizes = [1, 222], strides = [1, 1]} : vector<4x222xf32> to vector<1x222xf32>
    %324 = vector.extract_strided_slice %1 {offsets = [0, 27], sizes = [4, 1], strides = [1, 1]} : vector<4x36xf32> to vector<4x1xf32>
    %325 = vector.broadcast %324 : vector<4x1xf32> to vector<4x222xf32>
    %326 = vector.broadcast %323 : vector<1x222xf32> to vector<4x222xf32>
    %327 = arith.mulf %325, %326 : vector<4x222xf32>
    %328 = arith.addf %317, %327 : vector<4x222xf32>
    %329 = vector.extract_strided_slice %3 {offsets = [0, 27], sizes = [4, 1], strides = [1, 1]} : vector<4x36xf32> to vector<4x1xf32>
    %330 = vector.broadcast %329 : vector<4x1xf32> to vector<4x222xf32>
    %331 = vector.broadcast %323 : vector<1x222xf32> to vector<4x222xf32>
    %332 = arith.mulf %330, %331 : vector<4x222xf32>
    %333 = arith.addf %322, %332 : vector<4x222xf32>
    %c0_26 = arith.constant 0 : index
    %c0_27 = arith.constant 0 : index
    %c33 = arith.constant 33 : index
    %334 = vector.load %arg1[%c0_26, %c0_27, %c33] : memref<1x4x256xf32, #tpu.memory_space<vmem>>, vector<1x4x222xf32>
    %335 = vector.shape_cast %334 : vector<1x4x222xf32> to vector<4x222xf32>
    %336 = vector.extract_strided_slice %335 {offsets = [0, 0], sizes = [1, 222], strides = [1, 1]} : vector<4x222xf32> to vector<1x222xf32>
    %337 = vector.extract_strided_slice %1 {offsets = [0, 28], sizes = [4, 1], strides = [1, 1]} : vector<4x36xf32> to vector<4x1xf32>
    %338 = vector.broadcast %337 : vector<4x1xf32> to vector<4x222xf32>
    %339 = vector.broadcast %336 : vector<1x222xf32> to vector<4x222xf32>
    %340 = arith.mulf %338, %339 : vector<4x222xf32>
    %341 = arith.addf %328, %340 : vector<4x222xf32>
    %342 = vector.extract_strided_slice %3 {offsets = [0, 28], sizes = [4, 1], strides = [1, 1]} : vector<4x36xf32> to vector<4x1xf32>
    %343 = vector.broadcast %342 : vector<4x1xf32> to vector<4x222xf32>
    %344 = vector.broadcast %336 : vector<1x222xf32> to vector<4x222xf32>
    %345 = arith.mulf %343, %344 : vector<4x222xf32>
    %346 = arith.addf %333, %345 : vector<4x222xf32>
    %347 = vector.extract_strided_slice %335 {offsets = [1, 0], sizes = [1, 222], strides = [1, 1]} : vector<4x222xf32> to vector<1x222xf32>
    %348 = vector.extract_strided_slice %1 {offsets = [0, 29], sizes = [4, 1], strides = [1, 1]} : vector<4x36xf32> to vector<4x1xf32>
    %349 = vector.broadcast %348 : vector<4x1xf32> to vector<4x222xf32>
    %350 = vector.broadcast %347 : vector<1x222xf32> to vector<4x222xf32>
    %351 = arith.mulf %349, %350 : vector<4x222xf32>
    %352 = arith.addf %341, %351 : vector<4x222xf32>
    %353 = vector.extract_strided_slice %3 {offsets = [0, 29], sizes = [4, 1], strides = [1, 1]} : vector<4x36xf32> to vector<4x1xf32>
    %354 = vector.broadcast %353 : vector<4x1xf32> to vector<4x222xf32>
    %355 = vector.broadcast %347 : vector<1x222xf32> to vector<4x222xf32>
    %356 = arith.mulf %354, %355 : vector<4x222xf32>
    %357 = arith.addf %346, %356 : vector<4x222xf32>
    %358 = vector.extract_strided_slice %335 {offsets = [2, 0], sizes = [1, 222], strides = [1, 1]} : vector<4x222xf32> to vector<1x222xf32>
    %359 = vector.extract_strided_slice %1 {offsets = [0, 30], sizes = [4, 1], strides = [1, 1]} : vector<4x36xf32> to vector<4x1xf32>
    %360 = vector.broadcast %359 : vector<4x1xf32> to vector<4x222xf32>
    %361 = vector.broadcast %358 : vector<1x222xf32> to vector<4x222xf32>
    %362 = arith.mulf %360, %361 : vector<4x222xf32>
    %363 = arith.addf %352, %362 : vector<4x222xf32>
    %364 = vector.extract_strided_slice %3 {offsets = [0, 30], sizes = [4, 1], strides = [1, 1]} : vector<4x36xf32> to vector<4x1xf32>
    %365 = vector.broadcast %364 : vector<4x1xf32> to vector<4x222xf32>
    %366 = vector.broadcast %358 : vector<1x222xf32> to vector<4x222xf32>
    %367 = arith.mulf %365, %366 : vector<4x222xf32>
    %368 = arith.addf %357, %367 : vector<4x222xf32>
    %369 = vector.extract_strided_slice %335 {offsets = [3, 0], sizes = [1, 222], strides = [1, 1]} : vector<4x222xf32> to vector<1x222xf32>
    %370 = vector.extract_strided_slice %1 {offsets = [0, 31], sizes = [4, 1], strides = [1, 1]} : vector<4x36xf32> to vector<4x1xf32>
    %371 = vector.broadcast %370 : vector<4x1xf32> to vector<4x222xf32>
    %372 = vector.broadcast %369 : vector<1x222xf32> to vector<4x222xf32>
    %373 = arith.mulf %371, %372 : vector<4x222xf32>
    %374 = arith.addf %363, %373 : vector<4x222xf32>
    %375 = vector.extract_strided_slice %3 {offsets = [0, 31], sizes = [4, 1], strides = [1, 1]} : vector<4x36xf32> to vector<4x1xf32>
    %376 = vector.broadcast %375 : vector<4x1xf32> to vector<4x222xf32>
    %377 = vector.broadcast %369 : vector<1x222xf32> to vector<4x222xf32>
    %378 = arith.mulf %376, %377 : vector<4x222xf32>
    %379 = arith.addf %368, %378 : vector<4x222xf32>
    %c0_28 = arith.constant 0 : index
    %c0_29 = arith.constant 0 : index
    %c34 = arith.constant 34 : index
    %380 = vector.load %arg1[%c0_28, %c0_29, %c34] : memref<1x4x256xf32, #tpu.memory_space<vmem>>, vector<1x4x222xf32>
    %381 = vector.shape_cast %380 : vector<1x4x222xf32> to vector<4x222xf32>
    %382 = vector.extract_strided_slice %381 {offsets = [0, 0], sizes = [1, 222], strides = [1, 1]} : vector<4x222xf32> to vector<1x222xf32>
    %383 = vector.extract_strided_slice %1 {offsets = [0, 32], sizes = [4, 1], strides = [1, 1]} : vector<4x36xf32> to vector<4x1xf32>
    %384 = vector.broadcast %383 : vector<4x1xf32> to vector<4x222xf32>
    %385 = vector.broadcast %382 : vector<1x222xf32> to vector<4x222xf32>
    %386 = arith.mulf %384, %385 : vector<4x222xf32>
    %387 = arith.addf %374, %386 : vector<4x222xf32>
    %388 = vector.extract_strided_slice %3 {offsets = [0, 32], sizes = [4, 1], strides = [1, 1]} : vector<4x36xf32> to vector<4x1xf32>
    %389 = vector.broadcast %388 : vector<4x1xf32> to vector<4x222xf32>
    %390 = vector.broadcast %382 : vector<1x222xf32> to vector<4x222xf32>
    %391 = arith.mulf %389, %390 : vector<4x222xf32>
    %392 = arith.addf %379, %391 : vector<4x222xf32>
    %393 = vector.extract_strided_slice %381 {offsets = [1, 0], sizes = [1, 222], strides = [1, 1]} : vector<4x222xf32> to vector<1x222xf32>
    %394 = vector.extract_strided_slice %1 {offsets = [0, 33], sizes = [4, 1], strides = [1, 1]} : vector<4x36xf32> to vector<4x1xf32>
    %395 = vector.broadcast %394 : vector<4x1xf32> to vector<4x222xf32>
    %396 = vector.broadcast %393 : vector<1x222xf32> to vector<4x222xf32>
    %397 = arith.mulf %395, %396 : vector<4x222xf32>
    %398 = arith.addf %387, %397 : vector<4x222xf32>
    %399 = vector.extract_strided_slice %3 {offsets = [0, 33], sizes = [4, 1], strides = [1, 1]} : vector<4x36xf32> to vector<4x1xf32>
    %400 = vector.broadcast %399 : vector<4x1xf32> to vector<4x222xf32>
    %401 = vector.broadcast %393 : vector<1x222xf32> to vector<4x222xf32>
    %402 = arith.mulf %400, %401 : vector<4x222xf32>
    %403 = arith.addf %392, %402 : vector<4x222xf32>
    %404 = vector.extract_strided_slice %381 {offsets = [2, 0], sizes = [1, 222], strides = [1, 1]} : vector<4x222xf32> to vector<1x222xf32>
    %405 = vector.extract_strided_slice %1 {offsets = [0, 34], sizes = [4, 1], strides = [1, 1]} : vector<4x36xf32> to vector<4x1xf32>
    %406 = vector.broadcast %405 : vector<4x1xf32> to vector<4x222xf32>
    %407 = vector.broadcast %404 : vector<1x222xf32> to vector<4x222xf32>
    %408 = arith.mulf %406, %407 : vector<4x222xf32>
    %409 = arith.addf %398, %408 : vector<4x222xf32>
    %410 = vector.extract_strided_slice %3 {offsets = [0, 34], sizes = [4, 1], strides = [1, 1]} : vector<4x36xf32> to vector<4x1xf32>
    %411 = vector.broadcast %410 : vector<4x1xf32> to vector<4x222xf32>
    %412 = vector.broadcast %404 : vector<1x222xf32> to vector<4x222xf32>
    %413 = arith.mulf %411, %412 : vector<4x222xf32>
    %414 = arith.addf %403, %413 : vector<4x222xf32>
    %415 = vector.extract_strided_slice %381 {offsets = [3, 0], sizes = [1, 222], strides = [1, 1]} : vector<4x222xf32> to vector<1x222xf32>
    %416 = vector.extract_strided_slice %1 {offsets = [0, 35], sizes = [4, 1], strides = [1, 1]} : vector<4x36xf32> to vector<4x1xf32>
    %417 = vector.broadcast %416 : vector<4x1xf32> to vector<4x222xf32>
    %418 = vector.broadcast %415 : vector<1x222xf32> to vector<4x222xf32>
    %419 = arith.mulf %417, %418 : vector<4x222xf32>
    %420 = arith.addf %409, %419 : vector<4x222xf32>
    %421 = vector.extract_strided_slice %3 {offsets = [0, 35], sizes = [4, 1], strides = [1, 1]} : vector<4x36xf32> to vector<4x1xf32>
    %422 = vector.broadcast %421 : vector<4x1xf32> to vector<4x222xf32>
    %423 = vector.broadcast %415 : vector<1x222xf32> to vector<4x222xf32>
    %424 = arith.mulf %422, %423 : vector<4x222xf32>
    %425 = arith.addf %414, %424 : vector<4x222xf32>
    %cst = arith.constant 0.000000e+00 : f32
    %426 = vector.broadcast %cst : f32 to vector<4x512xf32>
    %c0_30 = arith.constant 0 : index
    %c0_31 = arith.constant 0 : index
    %427 = vector.load %arg5[%c0_30, %c0_31] : memref<4x512xf32, #tpu.memory_space<vmem>>, vector<4x512xf32>
    tpu.vector_store %arg5[%c0_30, %c0_31], %426 {strides = array<i32>} : memref<4x512xf32, #tpu.memory_space<vmem>>, vector<4x512xf32>,
    %428 = vector.extract_strided_slice %420 {offsets = [0, 0], sizes = [4, 14], strides = [1, 1]} : vector<4x222xf32> to vector<4x14xf32>
    %c0_32 = arith.constant 0 : index
    %c0_33 = arith.constant 0 : index
    %429 = vector.load %arg5[%c0_32, %c0_33] : memref<4x512xf32, #tpu.memory_space<vmem>>, vector<4x14xf32>
    tpu.vector_store %arg5[%c0_32, %c0_33], %428 {strides = array<i32>} : memref<4x512xf32, #tpu.memory_space<vmem>>, vector<4x14xf32>,
    %430 = vector.extract_strided_slice %425 {offsets = [0, 0], sizes = [4, 14], strides = [1, 1]} : vector<4x222xf32> to vector<4x14xf32>
    %c0_34 = arith.constant 0 : index
    %c14 = arith.constant 14 : index
    %431 = vector.load %arg5[%c0_34, %c14] : memref<4x512xf32, #tpu.memory_space<vmem>>, vector<4x14xf32>
    tpu.vector_store %arg5[%c0_34, %c14], %430 {strides = array<i32>} : memref<4x512xf32, #tpu.memory_space<vmem>>, vector<4x14xf32>,
    %432 = vector.extract_strided_slice %420 {offsets = [0, 16], sizes = [4, 14], strides = [1, 1]} : vector<4x222xf32> to vector<4x14xf32>
    %c0_35 = arith.constant 0 : index
    %c28 = arith.constant 28 : index
    %433 = vector.load %arg5[%c0_35, %c28] : memref<4x512xf32, #tpu.memory_space<vmem>>, vector<4x14xf32>
    tpu.vector_store %arg5[%c0_35, %c28], %432 {strides = array<i32>} : memref<4x512xf32, #tpu.memory_space<vmem>>, vector<4x14xf32>,
    %434 = vector.extract_strided_slice %425 {offsets = [0, 16], sizes = [4, 14], strides = [1, 1]} : vector<4x222xf32> to vector<4x14xf32>
    %c0_36 = arith.constant 0 : index
    %c42 = arith.constant 42 : index
    %435 = vector.load %arg5[%c0_36, %c42] : memref<4x512xf32, #tpu.memory_space<vmem>>, vector<4x14xf32>
    tpu.vector_store %arg5[%c0_36, %c42], %434 {strides = array<i32>} : memref<4x512xf32, #tpu.memory_space<vmem>>, vector<4x14xf32>,
    %436 = vector.extract_strided_slice %420 {offsets = [0, 32], sizes = [4, 14], strides = [1, 1]} : vector<4x222xf32> to vector<4x14xf32>
    %c0_37 = arith.constant 0 : index
    %c56 = arith.constant 56 : index
    %437 = vector.load %arg5[%c0_37, %c56] : memref<4x512xf32, #tpu.memory_space<vmem>>, vector<4x14xf32>
    tpu.vector_store %arg5[%c0_37, %c56], %436 {strides = array<i32>} : memref<4x512xf32, #tpu.memory_space<vmem>>, vector<4x14xf32>,
    %438 = vector.extract_strided_slice %425 {offsets = [0, 32], sizes = [4, 14], strides = [1, 1]} : vector<4x222xf32> to vector<4x14xf32>
    %c0_38 = arith.constant 0 : index
    %c70 = arith.constant 70 : index
    %439 = vector.load %arg5[%c0_38, %c70] : memref<4x512xf32, #tpu.memory_space<vmem>>, vector<4x14xf32>
    tpu.vector_store %arg5[%c0_38, %c70], %438 {strides = array<i32>} : memref<4x512xf32, #tpu.memory_space<vmem>>, vector<4x14xf32>,
    %440 = vector.extract_strided_slice %420 {offsets = [0, 48], sizes = [4, 14], strides = [1, 1]} : vector<4x222xf32> to vector<4x14xf32>
    %c0_39 = arith.constant 0 : index
    %c84 = arith.constant 84 : index
    %441 = vector.load %arg5[%c0_39, %c84] : memref<4x512xf32, #tpu.memory_space<vmem>>, vector<4x14xf32>
    tpu.vector_store %arg5[%c0_39, %c84], %440 {strides = array<i32>} : memref<4x512xf32, #tpu.memory_space<vmem>>, vector<4x14xf32>,
    %442 = vector.extract_strided_slice %425 {offsets = [0, 48], sizes = [4, 14], strides = [1, 1]} : vector<4x222xf32> to vector<4x14xf32>
    %c0_40 = arith.constant 0 : index
    %c98 = arith.constant 98 : index
    %443 = vector.load %arg5[%c0_40, %c98] : memref<4x512xf32, #tpu.memory_space<vmem>>, vector<4x14xf32>
    tpu.vector_store %arg5[%c0_40, %c98], %442 {strides = array<i32>} : memref<4x512xf32, #tpu.memory_space<vmem>>, vector<4x14xf32>,
    %444 = vector.extract_strided_slice %420 {offsets = [0, 64], sizes = [4, 14], strides = [1, 1]} : vector<4x222xf32> to vector<4x14xf32>
    %c0_41 = arith.constant 0 : index
    %c112 = arith.constant 112 : index
    %445 = vector.load %arg5[%c0_41, %c112] : memref<4x512xf32, #tpu.memory_space<vmem>>, vector<4x14xf32>
    tpu.vector_store %arg5[%c0_41, %c112], %444 {strides = array<i32>} : memref<4x512xf32, #tpu.memory_space<vmem>>, vector<4x14xf32>,
    %446 = vector.extract_strided_slice %425 {offsets = [0, 64], sizes = [4, 14], strides = [1, 1]} : vector<4x222xf32> to vector<4x14xf32>
    %c0_42 = arith.constant 0 : index
    %c126 = arith.constant 126 : index
    %447 = vector.load %arg5[%c0_42, %c126] : memref<4x512xf32, #tpu.memory_space<vmem>>, vector<4x14xf32>
    tpu.vector_store %arg5[%c0_42, %c126], %446 {strides = array<i32>} : memref<4x512xf32, #tpu.memory_space<vmem>>, vector<4x14xf32>,
    %448 = vector.extract_strided_slice %420 {offsets = [0, 80], sizes = [4, 14], strides = [1, 1]} : vector<4x222xf32> to vector<4x14xf32>
    %c0_43 = arith.constant 0 : index
    %c140 = arith.constant 140 : index
    %449 = vector.load %arg5[%c0_43, %c140] : memref<4x512xf32, #tpu.memory_space<vmem>>, vector<4x14xf32>
    tpu.vector_store %arg5[%c0_43, %c140], %448 {strides = array<i32>} : memref<4x512xf32, #tpu.memory_space<vmem>>, vector<4x14xf32>,
    %450 = vector.extract_strided_slice %425 {offsets = [0, 80], sizes = [4, 14], strides = [1, 1]} : vector<4x222xf32> to vector<4x14xf32>
    %c0_44 = arith.constant 0 : index
    %c154 = arith.constant 154 : index
    %451 = vector.load %arg5[%c0_44, %c154] : memref<4x512xf32, #tpu.memory_space<vmem>>, vector<4x14xf32>
    tpu.vector_store %arg5[%c0_44, %c154], %450 {strides = array<i32>} : memref<4x512xf32, #tpu.memory_space<vmem>>, vector<4x14xf32>,
    %452 = vector.extract_strided_slice %420 {offsets = [0, 96], sizes = [4, 14], strides = [1, 1]} : vector<4x222xf32> to vector<4x14xf32>
    %c0_45 = arith.constant 0 : index
    %c168 = arith.constant 168 : index
    %453 = vector.load %arg5[%c0_45, %c168] : memref<4x512xf32, #tpu.memory_space<vmem>>, vector<4x14xf32>
    tpu.vector_store %arg5[%c0_45, %c168], %452 {strides = array<i32>} : memref<4x512xf32, #tpu.memory_space<vmem>>, vector<4x14xf32>,
    %454 = vector.extract_strided_slice %425 {offsets = [0, 96], sizes = [4, 14], strides = [1, 1]} : vector<4x222xf32> to vector<4x14xf32>
    %c0_46 = arith.constant 0 : index
    %c182 = arith.constant 182 : index
    %455 = vector.load %arg5[%c0_46, %c182] : memref<4x512xf32, #tpu.memory_space<vmem>>, vector<4x14xf32>
    tpu.vector_store %arg5[%c0_46, %c182], %454 {strides = array<i32>} : memref<4x512xf32, #tpu.memory_space<vmem>>, vector<4x14xf32>,
    %456 = vector.extract_strided_slice %420 {offsets = [0, 112], sizes = [4, 14], strides = [1, 1]} : vector<4x222xf32> to vector<4x14xf32>
    %c0_47 = arith.constant 0 : index
    %c196 = arith.constant 196 : index
    %457 = vector.load %arg5[%c0_47, %c196] : memref<4x512xf32, #tpu.memory_space<vmem>>, vector<4x14xf32>
    tpu.vector_store %arg5[%c0_47, %c196], %456 {strides = array<i32>} : memref<4x512xf32, #tpu.memory_space<vmem>>, vector<4x14xf32>,
    %458 = vector.extract_strided_slice %425 {offsets = [0, 112], sizes = [4, 14], strides = [1, 1]} : vector<4x222xf32> to vector<4x14xf32>
    %c0_48 = arith.constant 0 : index
    %c210 = arith.constant 210 : index
    %459 = vector.load %arg5[%c0_48, %c210] : memref<4x512xf32, #tpu.memory_space<vmem>>, vector<4x14xf32>
    tpu.vector_store %arg5[%c0_48, %c210], %458 {strides = array<i32>} : memref<4x512xf32, #tpu.memory_space<vmem>>, vector<4x14xf32>,
    %460 = vector.extract_strided_slice %420 {offsets = [0, 128], sizes = [4, 14], strides = [1, 1]} : vector<4x222xf32> to vector<4x14xf32>
    %c0_49 = arith.constant 0 : index
    %c224 = arith.constant 224 : index
    %461 = vector.load %arg5[%c0_49, %c224] : memref<4x512xf32, #tpu.memory_space<vmem>>, vector<4x14xf32>
    tpu.vector_store %arg5[%c0_49, %c224], %460 {strides = array<i32>} : memref<4x512xf32, #tpu.memory_space<vmem>>, vector<4x14xf32>,
    %462 = vector.extract_strided_slice %425 {offsets = [0, 128], sizes = [4, 14], strides = [1, 1]} : vector<4x222xf32> to vector<4x14xf32>
    %c0_50 = arith.constant 0 : index
    %c238 = arith.constant 238 : index
    %463 = vector.load %arg5[%c0_50, %c238] : memref<4x512xf32, #tpu.memory_space<vmem>>, vector<4x14xf32>
    tpu.vector_store %arg5[%c0_50, %c238], %462 {strides = array<i32>} : memref<4x512xf32, #tpu.memory_space<vmem>>, vector<4x14xf32>,
    %464 = vector.extract_strided_slice %420 {offsets = [0, 144], sizes = [4, 14], strides = [1, 1]} : vector<4x222xf32> to vector<4x14xf32>
    %c0_51 = arith.constant 0 : index
    %c252 = arith.constant 252 : index
    %465 = vector.load %arg5[%c0_51, %c252] : memref<4x512xf32, #tpu.memory_space<vmem>>, vector<4x14xf32>
    tpu.vector_store %arg5[%c0_51, %c252], %464 {strides = array<i32>} : memref<4x512xf32, #tpu.memory_space<vmem>>, vector<4x14xf32>,
    %466 = vector.extract_strided_slice %425 {offsets = [0, 144], sizes = [4, 14], strides = [1, 1]} : vector<4x222xf32> to vector<4x14xf32>
    %c0_52 = arith.constant 0 : index
    %c266 = arith.constant 266 : index
    %467 = vector.load %arg5[%c0_52, %c266] : memref<4x512xf32, #tpu.memory_space<vmem>>, vector<4x14xf32>
    tpu.vector_store %arg5[%c0_52, %c266], %466 {strides = array<i32>} : memref<4x512xf32, #tpu.memory_space<vmem>>, vector<4x14xf32>,
    %468 = vector.extract_strided_slice %420 {offsets = [0, 160], sizes = [4, 14], strides = [1, 1]} : vector<4x222xf32> to vector<4x14xf32>
    %c0_53 = arith.constant 0 : index
    %c280 = arith.constant 280 : index
    %469 = vector.load %arg5[%c0_53, %c280] : memref<4x512xf32, #tpu.memory_space<vmem>>, vector<4x14xf32>
    tpu.vector_store %arg5[%c0_53, %c280], %468 {strides = array<i32>} : memref<4x512xf32, #tpu.memory_space<vmem>>, vector<4x14xf32>,
    %470 = vector.extract_strided_slice %425 {offsets = [0, 160], sizes = [4, 14], strides = [1, 1]} : vector<4x222xf32> to vector<4x14xf32>
    %c0_54 = arith.constant 0 : index
    %c294 = arith.constant 294 : index
    %471 = vector.load %arg5[%c0_54, %c294] : memref<4x512xf32, #tpu.memory_space<vmem>>, vector<4x14xf32>
    tpu.vector_store %arg5[%c0_54, %c294], %470 {strides = array<i32>} : memref<4x512xf32, #tpu.memory_space<vmem>>, vector<4x14xf32>,
    %472 = vector.extract_strided_slice %420 {offsets = [0, 176], sizes = [4, 14], strides = [1, 1]} : vector<4x222xf32> to vector<4x14xf32>
    %c0_55 = arith.constant 0 : index
    %c308 = arith.constant 308 : index
    %473 = vector.load %arg5[%c0_55, %c308] : memref<4x512xf32, #tpu.memory_space<vmem>>, vector<4x14xf32>
    tpu.vector_store %arg5[%c0_55, %c308], %472 {strides = array<i32>} : memref<4x512xf32, #tpu.memory_space<vmem>>, vector<4x14xf32>,
    %474 = vector.extract_strided_slice %425 {offsets = [0, 176], sizes = [4, 14], strides = [1, 1]} : vector<4x222xf32> to vector<4x14xf32>
    %c0_56 = arith.constant 0 : index
    %c322 = arith.constant 322 : index
    %475 = vector.load %arg5[%c0_56, %c322] : memref<4x512xf32, #tpu.memory_space<vmem>>, vector<4x14xf32>
    tpu.vector_store %arg5[%c0_56, %c322], %474 {strides = array<i32>} : memref<4x512xf32, #tpu.memory_space<vmem>>, vector<4x14xf32>,
    %476 = vector.extract_strided_slice %420 {offsets = [0, 192], sizes = [4, 14], strides = [1, 1]} : vector<4x222xf32> to vector<4x14xf32>
    %c0_57 = arith.constant 0 : index
    %c336 = arith.constant 336 : index
    %477 = vector.load %arg5[%c0_57, %c336] : memref<4x512xf32, #tpu.memory_space<vmem>>, vector<4x14xf32>
    tpu.vector_store %arg5[%c0_57, %c336], %476 {strides = array<i32>} : memref<4x512xf32, #tpu.memory_space<vmem>>, vector<4x14xf32>,
    %478 = vector.extract_strided_slice %425 {offsets = [0, 192], sizes = [4, 14], strides = [1, 1]} : vector<4x222xf32> to vector<4x14xf32>
    %c0_58 = arith.constant 0 : index
    %c350 = arith.constant 350 : index
    %479 = vector.load %arg5[%c0_58, %c350] : memref<4x512xf32, #tpu.memory_space<vmem>>, vector<4x14xf32>
    tpu.vector_store %arg5[%c0_58, %c350], %478 {strides = array<i32>} : memref<4x512xf32, #tpu.memory_space<vmem>>, vector<4x14xf32>,
    %480 = vector.extract_strided_slice %420 {offsets = [0, 208], sizes = [4, 14], strides = [1, 1]} : vector<4x222xf32> to vector<4x14xf32>
    %c0_59 = arith.constant 0 : index
    %c364 = arith.constant 364 : index
    %481 = vector.load %arg5[%c0_59, %c364] : memref<4x512xf32, #tpu.memory_space<vmem>>, vector<4x14xf32>
    tpu.vector_store %arg5[%c0_59, %c364], %480 {strides = array<i32>} : memref<4x512xf32, #tpu.memory_space<vmem>>, vector<4x14xf32>,
    %482 = vector.extract_strided_slice %425 {offsets = [0, 208], sizes = [4, 14], strides = [1, 1]} : vector<4x222xf32> to vector<4x14xf32>
    %c0_60 = arith.constant 0 : index
    %c378 = arith.constant 378 : index
    %483 = vector.load %arg5[%c0_60, %c378] : memref<4x512xf32, #tpu.memory_space<vmem>>, vector<4x14xf32>
    tpu.vector_store %arg5[%c0_60, %c378], %482 {strides = array<i32>} : memref<4x512xf32, #tpu.memory_space<vmem>>, vector<4x14xf32>,
    %c2_61 = arith.constant 2 : index
    %c0_62 = arith.constant 0 : index
    %c0_63 = arith.constant 0 : index
    %484 = vector.load %arg2[%c2_61, %c0_62, %c0_63] : memref<3x4x36xf32, #tpu.memory_space<vmem>>, vector<1x4x36xf32>
    %485 = vector.shape_cast %484 : vector<1x4x36xf32> to vector<4x36xf32>
    %c2_64 = arith.constant 2 : index
    %c0_65 = arith.constant 0 : index
    %c0_66 = arith.constant 0 : index
    %486 = vector.load %arg3[%c2_64, %c0_65, %c0_66] : memref<3x4x1xf32, #tpu.memory_space<vmem>>, vector<1x4x1xf32>
    %487 = vector.shape_cast %486 : vector<1x4x1xf32> to vector<4x1xf32>
    %488 = vector.shape_cast %487 : vector<4x1xf32> to vector<4x1xf32>
    %489 = vector.broadcast %488 : vector<4x1xf32> to vector<4x384xf32>
    %c0_67 = arith.constant 0 : index
    %c0_68 = arith.constant 0 : index
    %490 = vector.load %arg5[%c0_67, %c0_68] : memref<4x512xf32, #tpu.memory_space<vmem>>, vector<4x384xf32>
    %491 = vector.extract_strided_slice %485 {offsets = [0, 0], sizes = [4, 1], strides = [1, 1]} : vector<4x36xf32> to vector<4x1xf32>
    %492 = vector.extract_strided_slice %490 {offsets = [0, 0], sizes = [1, 384], strides = [1, 1]} : vector<4x384xf32> to vector<1x384xf32>
    %493 = vector.broadcast %491 : vector<4x1xf32> to vector<4x384xf32>
    %494 = vector.broadcast %492 : vector<1x384xf32> to vector<4x384xf32>
    %495 = arith.mulf %493, %494 : vector<4x384xf32>
    %496 = arith.addf %489, %495 : vector<4x384xf32>
    %497 = vector.extract_strided_slice %485 {offsets = [0, 1], sizes = [4, 1], strides = [1, 1]} : vector<4x36xf32> to vector<4x1xf32>
    %498 = vector.extract_strided_slice %490 {offsets = [1, 0], sizes = [1, 384], strides = [1, 1]} : vector<4x384xf32> to vector<1x384xf32>
    %499 = vector.broadcast %497 : vector<4x1xf32> to vector<4x384xf32>
    %500 = vector.broadcast %498 : vector<1x384xf32> to vector<4x384xf32>
    %501 = arith.mulf %499, %500 : vector<4x384xf32>
    %502 = arith.addf %496, %501 : vector<4x384xf32>
    %503 = vector.extract_strided_slice %485 {offsets = [0, 2], sizes = [4, 1], strides = [1, 1]} : vector<4x36xf32> to vector<4x1xf32>
    %504 = vector.extract_strided_slice %490 {offsets = [2, 0], sizes = [1, 384], strides = [1, 1]} : vector<4x384xf32> to vector<1x384xf32>
    %505 = vector.broadcast %503 : vector<4x1xf32> to vector<4x384xf32>
    %506 = vector.broadcast %504 : vector<1x384xf32> to vector<4x384xf32>
    %507 = arith.mulf %505, %506 : vector<4x384xf32>
    %508 = arith.addf %502, %507 : vector<4x384xf32>
    %509 = vector.extract_strided_slice %485 {offsets = [0, 3], sizes = [4, 1], strides = [1, 1]} : vector<4x36xf32> to vector<4x1xf32>
    %510 = vector.extract_strided_slice %490 {offsets = [3, 0], sizes = [1, 384], strides = [1, 1]} : vector<4x384xf32> to vector<1x384xf32>
    %511 = vector.broadcast %509 : vector<4x1xf32> to vector<4x384xf32>
    %512 = vector.broadcast %510 : vector<1x384xf32> to vector<4x384xf32>
    %513 = arith.mulf %511, %512 : vector<4x384xf32>
    %514 = arith.addf %508, %513 : vector<4x384xf32>
    %c0_69 = arith.constant 0 : index
    %c1_70 = arith.constant 1 : index
    %515 = vector.load %arg5[%c0_69, %c1_70] : memref<4x512xf32, #tpu.memory_space<vmem>>, vector<4x384xf32>
    %516 = vector.extract_strided_slice %485 {offsets = [0, 4], sizes = [4, 1], strides = [1, 1]} : vector<4x36xf32> to vector<4x1xf32>
    %517 = vector.extract_strided_slice %515 {offsets = [0, 0], sizes = [1, 384], strides = [1, 1]} : vector<4x384xf32> to vector<1x384xf32>
    %518 = vector.broadcast %516 : vector<4x1xf32> to vector<4x384xf32>
    %519 = vector.broadcast %517 : vector<1x384xf32> to vector<4x384xf32>
    %520 = arith.mulf %518, %519 : vector<4x384xf32>
    %521 = arith.addf %514, %520 : vector<4x384xf32>
    %522 = vector.extract_strided_slice %485 {offsets = [0, 5], sizes = [4, 1], strides = [1, 1]} : vector<4x36xf32> to vector<4x1xf32>
    %523 = vector.extract_strided_slice %515 {offsets = [1, 0], sizes = [1, 384], strides = [1, 1]} : vector<4x384xf32> to vector<1x384xf32>
    %524 = vector.broadcast %522 : vector<4x1xf32> to vector<4x384xf32>
    %525 = vector.broadcast %523 : vector<1x384xf32> to vector<4x384xf32>
    %526 = arith.mulf %524, %525 : vector<4x384xf32>
    %527 = arith.addf %521, %526 : vector<4x384xf32>
    %528 = vector.extract_strided_slice %485 {offsets = [0, 6], sizes = [4, 1], strides = [1, 1]} : vector<4x36xf32> to vector<4x1xf32>
    %529 = vector.extract_strided_slice %515 {offsets = [2, 0], sizes = [1, 384], strides = [1, 1]} : vector<4x384xf32> to vector<1x384xf32>
    %530 = vector.broadcast %528 : vector<4x1xf32> to vector<4x384xf32>
    %531 = vector.broadcast %529 : vector<1x384xf32> to vector<4x384xf32>
    %532 = arith.mulf %530, %531 : vector<4x384xf32>
    %533 = arith.addf %527, %532 : vector<4x384xf32>
    %534 = vector.extract_strided_slice %485 {offsets = [0, 7], sizes = [4, 1], strides = [1, 1]} : vector<4x36xf32> to vector<4x1xf32>
    %535 = vector.extract_strided_slice %515 {offsets = [3, 0], sizes = [1, 384], strides = [1, 1]} : vector<4x384xf32> to vector<1x384xf32>
    %536 = vector.broadcast %534 : vector<4x1xf32> to vector<4x384xf32>
    %537 = vector.broadcast %535 : vector<1x384xf32> to vector<4x384xf32>
    %538 = arith.mulf %536, %537 : vector<4x384xf32>
    %539 = arith.addf %533, %538 : vector<4x384xf32>
    %c0_71 = arith.constant 0 : index
    %c2_72 = arith.constant 2 : index
    %540 = vector.load %arg5[%c0_71, %c2_72] : memref<4x512xf32, #tpu.memory_space<vmem>>, vector<4x384xf32>
    %541 = vector.extract_strided_slice %485 {offsets = [0, 8], sizes = [4, 1], strides = [1, 1]} : vector<4x36xf32> to vector<4x1xf32>
    %542 = vector.extract_strided_slice %540 {offsets = [0, 0], sizes = [1, 384], strides = [1, 1]} : vector<4x384xf32> to vector<1x384xf32>
    %543 = vector.broadcast %541 : vector<4x1xf32> to vector<4x384xf32>
    %544 = vector.broadcast %542 : vector<1x384xf32> to vector<4x384xf32>
    %545 = arith.mulf %543, %544 : vector<4x384xf32>
    %546 = arith.addf %539, %545 : vector<4x384xf32>
    %547 = vector.extract_strided_slice %485 {offsets = [0, 9], sizes = [4, 1], strides = [1, 1]} : vector<4x36xf32> to vector<4x1xf32>
    %548 = vector.extract_strided_slice %540 {offsets = [1, 0], sizes = [1, 384], strides = [1, 1]} : vector<4x384xf32> to vector<1x384xf32>
    %549 = vector.broadcast %547 : vector<4x1xf32> to vector<4x384xf32>
    %550 = vector.broadcast %548 : vector<1x384xf32> to vector<4x384xf32>
    %551 = arith.mulf %549, %550 : vector<4x384xf32>
    %552 = arith.addf %546, %551 : vector<4x384xf32>
    %553 = vector.extract_strided_slice %485 {offsets = [0, 10], sizes = [4, 1], strides = [1, 1]} : vector<4x36xf32> to vector<4x1xf32>
    %554 = vector.extract_strided_slice %540 {offsets = [2, 0], sizes = [1, 384], strides = [1, 1]} : vector<4x384xf32> to vector<1x384xf32>
    %555 = vector.broadcast %553 : vector<4x1xf32> to vector<4x384xf32>
    %556 = vector.broadcast %554 : vector<1x384xf32> to vector<4x384xf32>
    %557 = arith.mulf %555, %556 : vector<4x384xf32>
    %558 = arith.addf %552, %557 : vector<4x384xf32>
    %559 = vector.extract_strided_slice %485 {offsets = [0, 11], sizes = [4, 1], strides = [1, 1]} : vector<4x36xf32> to vector<4x1xf32>
    %560 = vector.extract_strided_slice %540 {offsets = [3, 0], sizes = [1, 384], strides = [1, 1]} : vector<4x384xf32> to vector<1x384xf32>
    %561 = vector.broadcast %559 : vector<4x1xf32> to vector<4x384xf32>
    %562 = vector.broadcast %560 : vector<1x384xf32> to vector<4x384xf32>
    %563 = arith.mulf %561, %562 : vector<4x384xf32>
    %564 = arith.addf %558, %563 : vector<4x384xf32>
    %c0_73 = arith.constant 0 : index
    %c28_74 = arith.constant 28 : index
    %565 = vector.load %arg5[%c0_73, %c28_74] : memref<4x512xf32, #tpu.memory_space<vmem>>, vector<4x384xf32>
    %566 = vector.extract_strided_slice %485 {offsets = [0, 12], sizes = [4, 1], strides = [1, 1]} : vector<4x36xf32> to vector<4x1xf32>
    %567 = vector.extract_strided_slice %565 {offsets = [0, 0], sizes = [1, 384], strides = [1, 1]} : vector<4x384xf32> to vector<1x384xf32>
    %568 = vector.broadcast %566 : vector<4x1xf32> to vector<4x384xf32>
    %569 = vector.broadcast %567 : vector<1x384xf32> to vector<4x384xf32>
    %570 = arith.mulf %568, %569 : vector<4x384xf32>
    %571 = arith.addf %564, %570 : vector<4x384xf32>
    %572 = vector.extract_strided_slice %485 {offsets = [0, 13], sizes = [4, 1], strides = [1, 1]} : vector<4x36xf32> to vector<4x1xf32>
    %573 = vector.extract_strided_slice %565 {offsets = [1, 0], sizes = [1, 384], strides = [1, 1]} : vector<4x384xf32> to vector<1x384xf32>
    %574 = vector.broadcast %572 : vector<4x1xf32> to vector<4x384xf32>
    %575 = vector.broadcast %573 : vector<1x384xf32> to vector<4x384xf32>
    %576 = arith.mulf %574, %575 : vector<4x384xf32>
    %577 = arith.addf %571, %576 : vector<4x384xf32>
    %578 = vector.extract_strided_slice %485 {offsets = [0, 14], sizes = [4, 1], strides = [1, 1]} : vector<4x36xf32> to vector<4x1xf32>
    %579 = vector.extract_strided_slice %565 {offsets = [2, 0], sizes = [1, 384], strides = [1, 1]} : vector<4x384xf32> to vector<1x384xf32>
    %580 = vector.broadcast %578 : vector<4x1xf32> to vector<4x384xf32>
    %581 = vector.broadcast %579 : vector<1x384xf32> to vector<4x384xf32>
    %582 = arith.mulf %580, %581 : vector<4x384xf32>
    %583 = arith.addf %577, %582 : vector<4x384xf32>
    %584 = vector.extract_strided_slice %485 {offsets = [0, 15], sizes = [4, 1], strides = [1, 1]} : vector<4x36xf32> to vector<4x1xf32>
    %585 = vector.extract_strided_slice %565 {offsets = [3, 0], sizes = [1, 384], strides = [1, 1]} : vector<4x384xf32> to vector<1x384xf32>
    %586 = vector.broadcast %584 : vector<4x1xf32> to vector<4x384xf32>
    %587 = vector.broadcast %585 : vector<1x384xf32> to vector<4x384xf32>
    %588 = arith.mulf %586, %587 : vector<4x384xf32>
    %589 = arith.addf %583, %588 : vector<4x384xf32>
    %c0_75 = arith.constant 0 : index
    %c29 = arith.constant 29 : index
    %590 = vector.load %arg5[%c0_75, %c29] : memref<4x512xf32, #tpu.memory_space<vmem>>, vector<4x384xf32>
    %591 = vector.extract_strided_slice %485 {offsets = [0, 16], sizes = [4, 1], strides = [1, 1]} : vector<4x36xf32> to vector<4x1xf32>
    %592 = vector.extract_strided_slice %590 {offsets = [0, 0], sizes = [1, 384], strides = [1, 1]} : vector<4x384xf32> to vector<1x384xf32>
    %593 = vector.broadcast %591 : vector<4x1xf32> to vector<4x384xf32>
    %594 = vector.broadcast %592 : vector<1x384xf32> to vector<4x384xf32>
    %595 = arith.mulf %593, %594 : vector<4x384xf32>
    %596 = arith.addf %589, %595 : vector<4x384xf32>
    %597 = vector.extract_strided_slice %485 {offsets = [0, 17], sizes = [4, 1], strides = [1, 1]} : vector<4x36xf32> to vector<4x1xf32>
    %598 = vector.extract_strided_slice %590 {offsets = [1, 0], sizes = [1, 384], strides = [1, 1]} : vector<4x384xf32> to vector<1x384xf32>
    %599 = vector.broadcast %597 : vector<4x1xf32> to vector<4x384xf32>
    %600 = vector.broadcast %598 : vector<1x384xf32> to vector<4x384xf32>
    %601 = arith.mulf %599, %600 : vector<4x384xf32>
    %602 = arith.addf %596, %601 : vector<4x384xf32>
    %603 = vector.extract_strided_slice %485 {offsets = [0, 18], sizes = [4, 1], strides = [1, 1]} : vector<4x36xf32> to vector<4x1xf32>
    %604 = vector.extract_strided_slice %590 {offsets = [2, 0], sizes = [1, 384], strides = [1, 1]} : vector<4x384xf32> to vector<1x384xf32>
    %605 = vector.broadcast %603 : vector<4x1xf32> to vector<4x384xf32>
    %606 = vector.broadcast %604 : vector<1x384xf32> to vector<4x384xf32>
    %607 = arith.mulf %605, %606 : vector<4x384xf32>
    %608 = arith.addf %602, %607 : vector<4x384xf32>
    %609 = vector.extract_strided_slice %485 {offsets = [0, 19], sizes = [4, 1], strides = [1, 1]} : vector<4x36xf32> to vector<4x1xf32>
    %610 = vector.extract_strided_slice %590 {offsets = [3, 0], sizes = [1, 384], strides = [1, 1]} : vector<4x384xf32> to vector<1x384xf32>
    %611 = vector.broadcast %609 : vector<4x1xf32> to vector<4x384xf32>
    %612 = vector.broadcast %610 : vector<1x384xf32> to vector<4x384xf32>
    %613 = arith.mulf %611, %612 : vector<4x384xf32>
    %614 = arith.addf %608, %613 : vector<4x384xf32>
    %c0_76 = arith.constant 0 : index
    %c30 = arith.constant 30 : index
    %615 = vector.load %arg5[%c0_76, %c30] : memref<4x512xf32, #tpu.memory_space<vmem>>, vector<4x384xf32>
    %616 = vector.extract_strided_slice %485 {offsets = [0, 20], sizes = [4, 1], strides = [1, 1]} : vector<4x36xf32> to vector<4x1xf32>
    %617 = vector.extract_strided_slice %615 {offsets = [0, 0], sizes = [1, 384], strides = [1, 1]} : vector<4x384xf32> to vector<1x384xf32>
    %618 = vector.broadcast %616 : vector<4x1xf32> to vector<4x384xf32>
    %619 = vector.broadcast %617 : vector<1x384xf32> to vector<4x384xf32>
    %620 = arith.mulf %618, %619 : vector<4x384xf32>
    %621 = arith.addf %614, %620 : vector<4x384xf32>
    %622 = vector.extract_strided_slice %485 {offsets = [0, 21], sizes = [4, 1], strides = [1, 1]} : vector<4x36xf32> to vector<4x1xf32>
    %623 = vector.extract_strided_slice %615 {offsets = [1, 0], sizes = [1, 384], strides = [1, 1]} : vector<4x384xf32> to vector<1x384xf32>
    %624 = vector.broadcast %622 : vector<4x1xf32> to vector<4x384xf32>
    %625 = vector.broadcast %623 : vector<1x384xf32> to vector<4x384xf32>
    %626 = arith.mulf %624, %625 : vector<4x384xf32>
    %627 = arith.addf %621, %626 : vector<4x384xf32>
    %628 = vector.extract_strided_slice %485 {offsets = [0, 22], sizes = [4, 1], strides = [1, 1]} : vector<4x36xf32> to vector<4x1xf32>
    %629 = vector.extract_strided_slice %615 {offsets = [2, 0], sizes = [1, 384], strides = [1, 1]} : vector<4x384xf32> to vector<1x384xf32>
    %630 = vector.broadcast %628 : vector<4x1xf32> to vector<4x384xf32>
    %631 = vector.broadcast %629 : vector<1x384xf32> to vector<4x384xf32>
    %632 = arith.mulf %630, %631 : vector<4x384xf32>
    %633 = arith.addf %627, %632 : vector<4x384xf32>
    %634 = vector.extract_strided_slice %485 {offsets = [0, 23], sizes = [4, 1], strides = [1, 1]} : vector<4x36xf32> to vector<4x1xf32>
    %635 = vector.extract_strided_slice %615 {offsets = [3, 0], sizes = [1, 384], strides = [1, 1]} : vector<4x384xf32> to vector<1x384xf32>
    %636 = vector.broadcast %634 : vector<4x1xf32> to vector<4x384xf32>
    %637 = vector.broadcast %635 : vector<1x384xf32> to vector<4x384xf32>
    %638 = arith.mulf %636, %637 : vector<4x384xf32>
    %639 = arith.addf %633, %638 : vector<4x384xf32>
    %c0_77 = arith.constant 0 : index
    %c56_78 = arith.constant 56 : index
    %640 = vector.load %arg5[%c0_77, %c56_78] : memref<4x512xf32, #tpu.memory_space<vmem>>, vector<4x384xf32>
    %641 = vector.extract_strided_slice %485 {offsets = [0, 24], sizes = [4, 1], strides = [1, 1]} : vector<4x36xf32> to vector<4x1xf32>
    %642 = vector.extract_strided_slice %640 {offsets = [0, 0], sizes = [1, 384], strides = [1, 1]} : vector<4x384xf32> to vector<1x384xf32>
    %643 = vector.broadcast %641 : vector<4x1xf32> to vector<4x384xf32>
    %644 = vector.broadcast %642 : vector<1x384xf32> to vector<4x384xf32>
    %645 = arith.mulf %643, %644 : vector<4x384xf32>
    %646 = arith.addf %639, %645 : vector<4x384xf32>
    %647 = vector.extract_strided_slice %485 {offsets = [0, 25], sizes = [4, 1], strides = [1, 1]} : vector<4x36xf32> to vector<4x1xf32>
    %648 = vector.extract_strided_slice %640 {offsets = [1, 0], sizes = [1, 384], strides = [1, 1]} : vector<4x384xf32> to vector<1x384xf32>
    %649 = vector.broadcast %647 : vector<4x1xf32> to vector<4x384xf32>
    %650 = vector.broadcast %648 : vector<1x384xf32> to vector<4x384xf32>
    %651 = arith.mulf %649, %650 : vector<4x384xf32>
    %652 = arith.addf %646, %651 : vector<4x384xf32>
    %653 = vector.extract_strided_slice %485 {offsets = [0, 26], sizes = [4, 1], strides = [1, 1]} : vector<4x36xf32> to vector<4x1xf32>
    %654 = vector.extract_strided_slice %640 {offsets = [2, 0], sizes = [1, 384], strides = [1, 1]} : vector<4x384xf32> to vector<1x384xf32>
    %655 = vector.broadcast %653 : vector<4x1xf32> to vector<4x384xf32>
    %656 = vector.broadcast %654 : vector<1x384xf32> to vector<4x384xf32>
    %657 = arith.mulf %655, %656 : vector<4x384xf32>
    %658 = arith.addf %652, %657 : vector<4x384xf32>
    %659 = vector.extract_strided_slice %485 {offsets = [0, 27], sizes = [4, 1], strides = [1, 1]} : vector<4x36xf32> to vector<4x1xf32>
    %660 = vector.extract_strided_slice %640 {offsets = [3, 0], sizes = [1, 384], strides = [1, 1]} : vector<4x384xf32> to vector<1x384xf32>
    %661 = vector.broadcast %659 : vector<4x1xf32> to vector<4x384xf32>
    %662 = vector.broadcast %660 : vector<1x384xf32> to vector<4x384xf32>
    %663 = arith.mulf %661, %662 : vector<4x384xf32>
    %664 = arith.addf %658, %663 : vector<4x384xf32>
    %c0_79 = arith.constant 0 : index
    %c57 = arith.constant 57 : index
    %665 = vector.load %arg5[%c0_79, %c57] : memref<4x512xf32, #tpu.memory_space<vmem>>, vector<4x384xf32>
    %666 = vector.extract_strided_slice %485 {offsets = [0, 28], sizes = [4, 1], strides = [1, 1]} : vector<4x36xf32> to vector<4x1xf32>
    %667 = vector.extract_strided_slice %665 {offsets = [0, 0], sizes = [1, 384], strides = [1, 1]} : vector<4x384xf32> to vector<1x384xf32>
    %668 = vector.broadcast %666 : vector<4x1xf32> to vector<4x384xf32>
    %669 = vector.broadcast %667 : vector<1x384xf32> to vector<4x384xf32>
    %670 = arith.mulf %668, %669 : vector<4x384xf32>
    %671 = arith.addf %664, %670 : vector<4x384xf32>
    %672 = vector.extract_strided_slice %485 {offsets = [0, 29], sizes = [4, 1], strides = [1, 1]} : vector<4x36xf32> to vector<4x1xf32>
    %673 = vector.extract_strided_slice %665 {offsets = [1, 0], sizes = [1, 384], strides = [1, 1]} : vector<4x384xf32> to vector<1x384xf32>
    %674 = vector.broadcast %672 : vector<4x1xf32> to vector<4x384xf32>
    %675 = vector.broadcast %673 : vector<1x384xf32> to vector<4x384xf32>
    %676 = arith.mulf %674, %675 : vector<4x384xf32>
    %677 = arith.addf %671, %676 : vector<4x384xf32>
    %678 = vector.extract_strided_slice %485 {offsets = [0, 30], sizes = [4, 1], strides = [1, 1]} : vector<4x36xf32> to vector<4x1xf32>
    %679 = vector.extract_strided_slice %665 {offsets = [2, 0], sizes = [1, 384], strides = [1, 1]} : vector<4x384xf32> to vector<1x384xf32>
    %680 = vector.broadcast %678 : vector<4x1xf32> to vector<4x384xf32>
    %681 = vector.broadcast %679 : vector<1x384xf32> to vector<4x384xf32>
    %682 = arith.mulf %680, %681 : vector<4x384xf32>
    %683 = arith.addf %677, %682 : vector<4x384xf32>
    %684 = vector.extract_strided_slice %485 {offsets = [0, 31], sizes = [4, 1], strides = [1, 1]} : vector<4x36xf32> to vector<4x1xf32>
    %685 = vector.extract_strided_slice %665 {offsets = [3, 0], sizes = [1, 384], strides = [1, 1]} : vector<4x384xf32> to vector<1x384xf32>
    %686 = vector.broadcast %684 : vector<4x1xf32> to vector<4x384xf32>
    %687 = vector.broadcast %685 : vector<1x384xf32> to vector<4x384xf32>
    %688 = arith.mulf %686, %687 : vector<4x384xf32>
    %689 = arith.addf %683, %688 : vector<4x384xf32>
    %c0_80 = arith.constant 0 : index
    %c58 = arith.constant 58 : index
    %690 = vector.load %arg5[%c0_80, %c58] : memref<4x512xf32, #tpu.memory_space<vmem>>, vector<4x384xf32>
    %691 = vector.extract_strided_slice %485 {offsets = [0, 32], sizes = [4, 1], strides = [1, 1]} : vector<4x36xf32> to vector<4x1xf32>
    %692 = vector.extract_strided_slice %690 {offsets = [0, 0], sizes = [1, 384], strides = [1, 1]} : vector<4x384xf32> to vector<1x384xf32>
    %693 = vector.broadcast %691 : vector<4x1xf32> to vector<4x384xf32>
    %694 = vector.broadcast %692 : vector<1x384xf32> to vector<4x384xf32>
    %695 = arith.mulf %693, %694 : vector<4x384xf32>
    %696 = arith.addf %689, %695 : vector<4x384xf32>
    %697 = vector.extract_strided_slice %485 {offsets = [0, 33], sizes = [4, 1], strides = [1, 1]} : vector<4x36xf32> to vector<4x1xf32>
    %698 = vector.extract_strided_slice %690 {offsets = [1, 0], sizes = [1, 384], strides = [1, 1]} : vector<4x384xf32> to vector<1x384xf32>
    %699 = vector.broadcast %697 : vector<4x1xf32> to vector<4x384xf32>
    %700 = vector.broadcast %698 : vector<1x384xf32> to vector<4x384xf32>
    %701 = arith.mulf %699, %700 : vector<4x384xf32>
    %702 = arith.addf %696, %701 : vector<4x384xf32>
    %703 = vector.extract_strided_slice %485 {offsets = [0, 34], sizes = [4, 1], strides = [1, 1]} : vector<4x36xf32> to vector<4x1xf32>
    %704 = vector.extract_strided_slice %690 {offsets = [2, 0], sizes = [1, 384], strides = [1, 1]} : vector<4x384xf32> to vector<1x384xf32>
    %705 = vector.broadcast %703 : vector<4x1xf32> to vector<4x384xf32>
    %706 = vector.broadcast %704 : vector<1x384xf32> to vector<4x384xf32>
    %707 = arith.mulf %705, %706 : vector<4x384xf32>
    %708 = arith.addf %702, %707 : vector<4x384xf32>
    %709 = vector.extract_strided_slice %485 {offsets = [0, 35], sizes = [4, 1], strides = [1, 1]} : vector<4x36xf32> to vector<4x1xf32>
    %710 = vector.extract_strided_slice %690 {offsets = [3, 0], sizes = [1, 384], strides = [1, 1]} : vector<4x384xf32> to vector<1x384xf32>
    %711 = vector.broadcast %709 : vector<4x1xf32> to vector<4x384xf32>
    %712 = vector.broadcast %710 : vector<1x384xf32> to vector<4x384xf32>
    %713 = arith.mulf %711, %712 : vector<4x384xf32>
    %714 = arith.addf %708, %713 : vector<4x384xf32>
    %c0_81 = arith.constant 0 : index
    %c0_82 = arith.constant 0 : index
    %c0_83 = arith.constant 0 : index
    %715 = vector.load %arg4[%c0_81, %c0_82, %c0_83] : memref<1x4x384xf32, #tpu.memory_space<vmem>>, vector<1x4x384xf32>
    %716 = vector.shape_cast %715 : vector<1x4x384xf32> to vector<4x384xf32>
    %717 = vector.shape_cast %714 : vector<4x384xf32> to vector<1x4x384xf32>
    tpu.vector_store %arg4[%c0_81, %c0_82, %c0_83], %717 {strides = array<i32>} : memref<1x4x384xf32, #tpu.memory_space<vmem>>, vector<1x4x384xf32>,
    return
  }
  func.func @transform_0(%arg0: i32) -> (i32, i32, i32) {
    %c0_i32 = arith.constant 0 : i32
    %c0_i32_0 = arith.constant 0 : i32
    %c0_i32_1 = arith.constant 0 : i32
    return %arg0, %c0_i32, %c0_i32_0 : i32, i32, i32
  }
  func.func @transform_1(%arg0: i32) -> (i32, i32, i32) {
    %c0_i32 = arith.constant 0 : i32
    %c0_i32_0 = arith.constant 0 : i32
    %c0_i32_1 = arith.constant 0 : i32
    %c0_i32_2 = arith.constant 0 : i32
    return %c0_i32, %c0_i32_0, %c0_i32_1 : i32, i32, i32
  }
  func.func @transform_2(%arg0: i32) -> (i32, i32, i32) {
    %c0_i32 = arith.constant 0 : i32
    %c0_i32_0 = arith.constant 0 : i32
    %c0_i32_1 = arith.constant 0 : i32
    %c0_i32_2 = arith.constant 0 : i32
    return %c0_i32, %c0_i32_0, %c0_i32_1 : i32, i32, i32
  }
  func.func @transform_3(%arg0: i32) -> (i32, i32, i32) {
    %c0_i32 = arith.constant 0 : i32
    %c0_i32_0 = arith.constant 0 : i32
    %c0_i32_1 = arith.constant 0 : i32
    return %arg0, %c0_i32, %c0_i32_0 : i32, i32, i32
  }
}

</mosaic_0001>

<bundles_post_ra>
// kernel: _lambda_.1
= control target key start
LH: loop header
LB: loop body
LE: loop exit
PB: predicated region body
PF: predicated region fallthrough
CT: control target
= control target key end

     0   :  { %s3181_s12 = smov 0   ;;  %s4961_s0 = inlined_call_operand.vmem [shape: f32[2,4,256], index: 0, kind: input, shape index: {}]   ;;  %s4962_s1 = inlined_call_operand.vmem [shape: f32[3,4,36], index: 1, kind: input, shape index: {}]   ;;  %s4963_s2 = inlined_call_operand.vmem [shape: f32[3,4,1], index: 2, kind: input, shape index: {}]   ;;  %s4964_s3 = inlined_call_operand.vmem [shape: f32[2,4,384], index: 3, kind: output, shape index: {}]  }
   0x1 LB: > { %s2886_s13 = sadd.s32 4294967295, %s3085_s12   ;;  %p2890_p0 = scmp.ge.s32.totalorder %s3085_s12, 1  ;;  %s3085_s12 = sphi %s3181_s12, %s13_s12  }
   0x2   : > { %p137_p1 = scmp.lt.s32.totalorder %s3085_s12, 3 }
   0x4   : > { %p138_p2 = pnand %p2890_p0, %p137_p1 }
   0x6   : > { %141 = sbr.rel (%p138_p2) target bundleno = 6756 (0x1a64), region = 32 }
   0xb   : > { %v3192_v0 = vld [vmem:[%s4962_s1] sm:$0xf]  ;;  %v4977_v1 = vmov 1   ;;  %v4978_v2 = vmov 0   ;;  %v3201_v3 = vld [vmem:[%s4962_s1 + $0x4] sm:$0xf]  ;;  %v194_v15 = vlaneseq }
   0xc   : > { %2985 = vset.pattern.permute.xlu0 %v4977_v1  ;;  %2984 = vset.pattern.permute.xlu1 %v4978_v2  ;;  %v4976_v4 = vmov 2   ;;  %v4975_v5 = vmov 4   ;;  %v4974_v6 = vmov 5   ;;  %v4973_v7 = vmov 3   ;;  %p161_p3 = scmp.lt.s32.totalorder %s2886_s13, 1  ;;  %s3100_s22 = smov 127  }
   0xd   : > { %226 = vperm.xlu0 %2985, %v3192_v0   ;;  %190 = vperm.xlu1 %2984, %v3192_v0   ;;  %v4972_v8 = vmov 6   ;;  %v4971_v9 = vmov 7   ;;  %v4970_v10 = vmov 8   ;;  %v4969_v11 = vmov 9   ;;  %s3101_s23 = smov 126   ;;  %s3103_s24 = smov 112  }
   0xe   : > { %v4967_v12 = vmov 11   ;;  %v4968_v13 = vmov 10   ;;  %v4966_v14 = vmov 12   ;;  %s5337_s13 = smov (!%p161_p3, %s2886_s13), 1  ;;  %v3249_v16 = vshrl.u32 %v194_v15, 7  ;;  %s3108_s25 = smov 111  }
   0xf   : > { %s2900_s18 = sshll.u32 %s5337_s13, 3  ;;  %s3113_s26 = smov 110   ;;  %vm339_vm0 = vcmask 1039360   ;;  %vm476_vm1 = vcmask 1031168   ;;  %vm613_vm2 = vcmask 916480   ;;  %vm750_vm3 = vcmask 908288  }
  0x10   : > { %s165_s21 = scalar_lea.vmem %s4961_s0, %s2900_s18  ;;  %v3259_v19 = vsub.s32 0, %v3249_v16  ;;  %v3266_v22 = vsub.s32 4, %v3249_v16  ;;  %v3291_v35 = vsub.s32 1, %v3249_v16  ;;  %v3294_v36 = vsub.s32 5, %v3249_v16  ;;  %s3118_s27 = smov 96  }
  0x11   : > { %2988 = vset.pattern.permute.xlu0 %v4976_v4  ;;  %218 = vperm.xlu1 %2984, %v3201_v3   ;;  %v3261_v20 = vld [vmem:[%s165_s21] sm:$0xff]  ;;  %v3305_v42 = vsub.s32 6, %v3249_v16  ;;  %v3310_v45 = vsub.s32 3, %v3249_v16  ;;  %v3321_v51 = vsub.s32 2, %v3249_v16  ;;  %s3123_s28 = smov 95   ;;  %s3128_s6 = smov 94  }
  0x12   : > { %286 = vperm.xlu0 %2988, %v3201_v3   ;;  %5072 = vst [vmem:[#allocation3_spill] sm:$0xff] %v3259_v19  ;;  %5073 = vst [vmem:[#allocation4_spill] sm:$0xff] %v3266_v22  ;;  %v197_v23 = vrot.slane %v3261_v20, %v3259_v19  ;;  %v201_v25 = vrot.slane %v3261_v20, %v3266_v22  ;;  %v232_v40 = vrot.slane %v3261_v20, %v3291_v35  ;;  %vm887_vm4 = vcmask 900096   ;;  %s3132_s11 = smov 12   ;;  %s3133_s14 = smov 24  }
  0x13   : > { %5074 = vst [vmem:[#allocation5_spill] sm:$0xff] %v3291_v35  ;;  %5075 = vst [vmem:[#allocation6_spill] sm:$0xff] %v3294_v36  ;;  %v236_v41 = vrot.slane %v3261_v20, %v3294_v36  ;;  %v270_v48 = vrot.slane %v3261_v20, %v3305_v42  ;;  %v300_v52 = vrot.slane %v3261_v20, %v3310_v45  ;;  %vm1024_vm5 = vcmask 785408   ;;  %s3134_s15 = smov 36   ;;  %s3135_s16 = smov 48  }
  0x14   : > { %v3275_v26 = vrot.slane %v197_v23, %v3259_v19  ;;  %v3281_v30 = vrot.slane %v201_v25, %v3259_v19  ;;  %5076 = vst [vmem:[#allocation7_spill] sm:$0xff] %v3305_v42  ;;  %5077 = vst [vmem:[#allocation8_spill] sm:$0xff] %v3310_v45  ;;  %v3313_v46 = vrot.slane %v232_v40, %v3291_v35  ;;  %vm1161_vm6 = vcmask 777216   ;;  %s3136_s17 = smov 60   ;;  %s3137_s18 = smov 72  }
  0x15   : > { %2986 = vset.pattern.permute.xlu1 %v4977_v1  ;;  %v3316_v47 = vrot.slane %v236_v41, %v3291_v35  ;;  %5078 = vst [vmem:[#allocation9_spill] sm:$0xff] %v3321_v51  ;;  %v3328_v55 = vrot.slane %v270_v48, %v3321_v51  ;;  %v3334_v57 = vrot.slane %v300_v52, %v3310_v45  ;;  %vm1298_vm7 = vcmask 769024   ;;  %s3138_s19 = smov 84   ;;  %s3139_s20 = smov 108  }
  0x16   : > { %2990 = vset.pattern.permute.xlu0 %v4975_v5  ;;  %252 = vperm.xlu1 %2986, %v3201_v3   ;;  %v266_v61 = vrot.slane %v3261_v20, %v3321_v51  ;;  %vm1425_vm8 = vcmask 109568   ;;  %s3140_s21 = smov 120   ;;  %s3145_s4 = smov 26   ;;  %vm1431_vm9 = vcmask 224368   ;;  %vm1437_vm10 = vcmask 339168  }
  0x17   : > { %328 = vperm.xlu0 %2990, %v3192_v0   ;;  %s3146_s7 = smov 38   ;;  %s3147_s8 = smov 50   ;;  %vm1442_vm11 = vcmask 453968   ;;  %vm1447_vm12 = vcmask 568768   ;;  %vm1452_vm13 = vcmask 683568   ;;  %vm1457_vm14 = vcmask 798368  }
  0x18   : > { %v3344_v23 = vrot.slane %v266_v61, %v3321_v51  ;;  %s3148_s9 = smov 62   ;;  %s3149_s10 = smov 74   ;;  %vm1462_vm15 = vcmask 913168  }
  0x1a   : > { %2987 = vset.pattern.permute.xlu1 %v4976_v4 }
  0x1b   : > { %346 = vperm.xlu0 %2990, %v3201_v3   ;;  %260 = vperm.xlu1 %2987, %v3192_v0  }
  0x1f   : > { %2992 = vset.pattern.permute.xlu0 %v4974_v6  ;;  %2989 = vset.pattern.permute.xlu1 %v4973_v7 }
  0x20   : > { %380 = vperm.xlu0 %2992, %v3201_v3   ;;  %294 = vperm.xlu1 %2989, %v3192_v0  }
  0x24   : > { %2993 = vset.pattern.permute.xlu0 %v4972_v8  ;;  %320 = vperm.xlu1 %2989, %v3201_v3  }
  0x25   : > { %397 = vperm.xlu0 %2993, %v3192_v0  }
  0x28   : > { %2991 = vset.pattern.permute.xlu1 %v4974_v6 }
  0x29   : > { %414 = vperm.xlu0 %2993, %v3201_v3   ;;  %363 = vperm.xlu1 %2991, %v3192_v0  }
  0x2d   : > { %2995 = vset.pattern.permute.xlu0 %v4971_v9  ;;  %2994 = vset.pattern.permute.xlu1 %v4971_v9 }
  0x2e   : > { %448 = vperm.xlu0 %2995, %v3201_v3   ;;  %431 = vperm.xlu1 %2994, %v3192_v0  }
  0x32   : > { %2996 = vset.pattern.permute.xlu0 %v4970_v10  ;;  %2997 = vset.pattern.permute.xlu1 %v4969_v11 }
  0x33   : > { %465 = vperm.xlu0 %2996, %v3192_v0   ;;  %500 = vperm.xlu1 %2997, %v3192_v0  }
  0x37   : > { %483 = vperm.xlu0 %2996, %v3201_v3   ;;  %3000 = vset.pattern.permute.xlu1 %v4967_v12 }
  0x38   : > { %568 = vperm.xlu1 %3000, %v3192_v0  }
  0x3b   : > { %2998 = vset.pattern.permute.xlu0 %v4969_v11 }
  0x3c   : > { %517 = vperm.xlu0 %2998, %v3201_v3  }
  0x40   : > { %2999 = vset.pattern.permute.xlu0 %v4968_v13 }
  0x41   : > { %534 = vperm.xlu0 %2999, %v3192_v0  }
  0x45   : > { %551 = vperm.xlu0 %2999, %v3201_v3  }
  0x49   : > { %3001 = vset.pattern.permute.xlu0 %v4967_v12 }
  0x4a   : > { %585 = vperm.xlu0 %3001, %v3201_v3  }
  0x4e   : > { %3002 = vset.pattern.permute.xlu0 %v4966_v14 }
  0x88   : > { %v3251_v17 = vpop.permute.xlu0 %226  ;;  %v3253_v18 = vpop.permute.xlu1 %190 }
  0x8c   : > { %v3263_v21 = vpop.permute.xlu1 %218 }
  0x8d   : > { %v3270_v24 = vpop.permute.xlu0 %286 }
  0x91   : > { %v3277_v27 = vpop.permute.xlu1 %252 }
  0x92   : > { %v329_v28 = vpop.permute.xlu0 %328 }
  0x93   : > { %v331_v29 = vmul.f32 %v329_v28, %v3275_v26  ;;  %v332_v33 = vmul.f32 %v329_v28, %v3281_v30 }
  0x95   : > { %335 = vrot.lane.b32.xlu1 %v331_v29, %s3100_s22 }
  0x96   : > { %v347_v31 = vpop.permute.xlu0 %346  ;;  %v3284_v32 = vpop.permute.xlu1 %260 }
  0x97   : > { %v350_v34 = vmul.f32 %v347_v31, %v3281_v30  ;;  %v349_v37 = vmul.f32 %v347_v31, %v3275_v26  ;;  %v3350_v31 = vsub.s32 7, %v3249_v16 }
  0x99   : > { %355 = vrot.lane.b32.xlu0 %v350_v34, %s3100_s22  ;;  %337 = vrot.lane.b32.xlu1 %v332_v33, %s3100_s22  ;;  %5079 = vst [vmem:[#allocation10_spill] sm:$0xff] %v3350_v31 }
  0x9b   : > { %v381_v38 = vpop.permute.xlu0 %380  ;;  %v3297_v39 = vpop.permute.xlu1 %294 }
  0x9c   : > { %v383_v56 = vmul.f32 %v381_v38, %v3313_v46  ;;  %v384_v63 = vmul.f32 %v381_v38, %v3316_v47  ;;  %v304_v38 = vrot.slane %v3261_v20, %v3350_v31  ;;  %v4986_v31 = vmov 14  }
  0x9d   : > { %353 = vrot.lane.b32.xlu1 %v349_v37, %s3100_s22 }
  0x9e   : > { %v3363_v41 = vrot.slane %v304_v38, %v3310_v45  ;;  %v4995_v45 = vmov 15  }
  0x9f   : > { %v3307_v43 = vpop.permute.xlu1 %320 }
  0xa0   : > { %v398_v44 = vpop.permute.xlu0 %397 }
  0xa1   : > { %v400_v25 = vmul.f32 %v398_v44, %v3344_v23  ;;  %v401_v34 = vmul.f32 %v398_v44, %v3328_v55 }
  0xa4   : > { %v415_v49 = vpop.permute.xlu0 %414  ;;  %v364_v50 = vpop.permute.xlu1 %363 }
  0xa5   : > { %v366_v53 = vmul.f32 %v364_v50, %v3313_v46  ;;  %v367_v54 = vmul.f32 %v364_v50, %v3316_v47  ;;  %v418_v58 = vmul.f32 %v415_v49, %v3328_v55  ;;  %v417_v16 = vmul.f32 %v415_v49, %v3344_v23 }
  0xa7   : > { %370 = vrot.lane.b32.xlu0 %v366_v53, %s3100_s22  ;;  %372 = vrot.lane.b32.xlu1 %v367_v54, %s3100_s22 }
  0xa9   : > { %v449_v59 = vpop.permute.xlu0 %448  ;;  %v432_v60 = vpop.permute.xlu1 %431 }
  0xaa   : > { %v434_v62 = vmul.f32 %v432_v60, %v3334_v57  ;;  %v435_v48 = vmul.f32 %v432_v60, %v3363_v41  ;;  %v451_v20 = vmul.f32 %v449_v59, %v3334_v57  ;;  %v452_v54 = vmul.f32 %v449_v59, %v3363_v41 }
  0xab   : > { %423 = vrot.lane.b32.xlu0 %v418_v58, %s3100_s22  ;;  %387 = vrot.lane.b32.xlu1 %v383_v56, %s3100_s22  ;;  %v4965_v59 = vmov 13  }
  0xac   : > { %3003 = vset.pattern.permute.xlu1 %v4965_v59 }
  0xae   : > { %v466_v15 = vpop.permute.xlu0 %465  ;;  %v501_v29 = vpop.permute.xlu1 %500 }
  0xaf   : > { %389 = vrot.lane.b32.xlu1 %v384_v63, %s3100_s22  ;;  %438 = vrot.lane.b32.xlu0 %v434_v62, %s3100_s22  ;;  %v503_v37 = vmul.f32 %v501_v29, %v3313_v46  ;;  %v468_v56 = vmul.f32 %v466_v15, %v3275_v26  ;;  %v469_v58 = vmul.f32 %v466_v15, %v3281_v30 }
  0xb0   : > { %v504_v61 = vmul.f32 %v501_v29, %v3316_v47 }
  0xb2   : > { %v484_v28 = vpop.permute.xlu0 %483 }
  0xb3   : > { %v487_v33 = vmul.f32 %v484_v28, %v3281_v30  ;;  %404 = vrot.lane.b32.xlu1 %v400_v25, %s3100_s22  ;;  %v569_v52 = vpop.permute.xlu1 %568  ;;  %v486_v60 = vmul.f32 %v484_v28, %v3275_v26 }
  0xb4   : > { %v571_v49 = vmul.f32 %v569_v52, %v3334_v57  ;;  %v572_v29 = vmul.f32 %v569_v52, %v3363_v41 }
  0xb5   : > { %492 = vrot.lane.b32.xlu0 %v487_v33, %s3101_s23 }
  0xb7   : > { %v518_v40 = vpop.permute.xlu0 %517  ;;  %406 = vrot.lane.b32.xlu1 %v401_v34, %s3100_s22 }
  0xb8   : > { %v520_v62 = vmul.f32 %v518_v40, %v3313_v46  ;;  %v521_v63 = vmul.f32 %v518_v40, %v3316_v47 }
  0xb9   : > { %507 = vrot.lane.b32.xlu0 %v503_v37, %s3101_s23 }
  0xbb   : > { %421 = vrot.lane.b32.xlu1 %v417_v16, %s3100_s22 }
  0xbc   : > { %v535_v44 = vpop.permute.xlu0 %534 }
  0xbd   : > { %v537_v15 = vmul.f32 %v535_v44, %v3344_v23  ;;  %v538_v25 = vmul.f32 %v535_v44, %v3328_v55 }
  0xbf   : > { %440 = vrot.lane.b32.xlu1 %v435_v48, %s3100_s22 }
  0xc0   : > { %v552_v50 = vpop.permute.xlu0 %551 }
  0xc1   : > { %v555_v53 = vmul.f32 %v552_v50, %v3328_v55  ;;  %v554_v28 = vmul.f32 %v552_v50, %v3344_v23 }
  0xc3   : > { %560 = vrot.lane.b32.xlu0 %v555_v53, %s3101_s23  ;;  %455 = vrot.lane.b32.xlu1 %v451_v20, %s3100_s22 }
  0xc5   : > { %v586_v33 = vpop.permute.xlu0 %585 }
  0xc6   : > { %v588_v34 = vmul.f32 %v586_v33, %v3334_v57  ;;  %v589_v37 = vmul.f32 %v586_v33, %v3363_v41 }
  0xc7   : > { %575 = vrot.lane.b32.xlu0 %v571_v49, %s3101_s23  ;;  %457 = vrot.lane.b32.xlu1 %v452_v54, %s3100_s22 }
  0xcb   : > { %602 = vperm.xlu0 %3002, %v3192_v0   ;;  %472 = vrot.lane.b32.xlu1 %v468_v56, %s3101_s23 }
  0xcf   : > { %620 = vperm.xlu0 %3002, %v3201_v3   ;;  %474 = vrot.lane.b32.xlu1 %v469_v58, %s3101_s23 }
  0xd3   : > { %490 = vrot.lane.b32.xlu1 %v486_v60, %s3101_s23  ;;  %3004 = vset.pattern.permute.xlu0 %v4965_v59 }
  0xd7   : > { %509 = vrot.lane.b32.xlu1 %v504_v61, %s3101_s23 }
  0xdb   : > { %524 = vrot.lane.b32.xlu1 %v520_v62, %s3101_s23 }
  0xdf   : > { %526 = vrot.lane.b32.xlu1 %v521_v63, %s3101_s23 }
  0xe3   : > { %541 = vrot.lane.b32.xlu1 %v537_v15, %s3101_s23 }
  0xe7   : > { %543 = vrot.lane.b32.xlu1 %v538_v25, %s3101_s23 }
  0xeb   : > { %558 = vrot.lane.b32.xlu1 %v554_v28, %s3101_s23 }
  0xef   : > { %577 = vrot.lane.b32.xlu1 %v572_v29, %s3101_s23 }
  0xf3   : > { %592 = vrot.lane.b32.xlu1 %v588_v34, %s3101_s23 }
  0xf7   : > { %594 = vrot.lane.b32.xlu1 %v589_v37, %s3101_s23 }
 0x107   : > { %v3414_v50 = vpop.permute.xlu1 %335 }
 0x10b   : > { %v3404_v38 = vpop.permute.xlu0 %355  ;;  %v3418_v20 = vpop.permute.xlu1 %337 }
 0x10f   : > { %v3422_v49 = vpop.permute.xlu1 %353 }
 0x119   : > { %v3406_v40 = vpop.permute.xlu0 %370  ;;  %v3426_v56 = vpop.permute.xlu1 %372 }
 0x11d   : > { %v3408_v16 = vpop.permute.xlu0 %423  ;;  %v3432_v15 = vpop.permute.xlu1 %387 }
 0x121   : > { %v3410_v44 = vpop.permute.xlu0 %438  ;;  %v3438_v28 = vpop.permute.xlu1 %389 }
 0x125   : > { %v3441_v29 = vpop.permute.xlu1 %404 }
 0x127   : > { %v3412_v48 = vpop.permute.xlu0 %492 }
 0x129   : > { %v3443_v33 = vpop.permute.xlu1 %406 }
 0x12b   : > { %v3416_v52 = vpop.permute.xlu0 %507 }
 0x12d   : > { %v3445_v34 = vpop.permute.xlu1 %421 }
 0x131   : > { %v3447_v37 = vpop.permute.xlu1 %440 }
 0x135   : > { %v3420_v53 = vpop.permute.xlu0 %560 }
 0x139   : > { %v3424_v54 = vpop.permute.xlu0 %575 }
 0x146   : > { %v603_v58 = vpop.permute.xlu0 %602 }
 0x147   : > { %v605_v60 = vmul.f32 %v603_v58, %v3275_v26  ;;  %v606_v62 = vmul.f32 %v603_v58, %v3281_v30  ;;  %v3449_v58 = vpop.permute.xlu1 %455 }
 0x149   : > { %609 = vrot.lane.b32.xlu1 %v605_v60, %s3103_s24 }
 0x14a   : > { %v621_v61 = vpop.permute.xlu0 %620 }
 0x14b   : > { %v624_v63 = vmul.f32 %v621_v61, %v3281_v30  ;;  %v623_v25 = vmul.f32 %v621_v61, %v3275_v26  ;;  %v3451_v60 = vpop.permute.xlu1 %457 }
 0x14d   : > { %629 = vrot.lane.b32.xlu0 %v624_v63, %s3103_s24  ;;  %611 = vrot.lane.b32.xlu1 %v606_v62, %s3103_s24 }
 0x14f   : > { %v3453_v62 = vpop.permute.xlu1 %472 }
 0x151   : > { %627 = vrot.lane.b32.xlu1 %v623_v25, %s3103_s24 }
 0x153   : > { %v3455_v61 = vpop.permute.xlu1 %474 }
 0x155   : > { %637 = vperm.xlu1 %3003, %v3192_v0  }
 0x157   : > { %v3457_v63 = vpop.permute.xlu1 %490 }
 0x159   : > { %3006 = vset.pattern.permute.xlu1 %v4995_v45 }
 0x15b   : > { %v3459_v25 = vpop.permute.xlu1 %509 }
 0x15f   : > { %v3461_v59 = vpop.permute.xlu1 %524 }
 0x163   : > { %v3463_v14 = vpop.permute.xlu1 %526 }
 0x167   : > { %v3465_v12 = vpop.permute.xlu1 %541 }
 0x16b   : > { %v3467_v13 = vpop.permute.xlu1 %543 }
 0x16f   : > { %v3469_v11 = vpop.permute.xlu1 %558 }
 0x173   : > { %v3471_v10 = vpop.permute.xlu1 %577 }
 0x177   : > { %v3473_v9 = vpop.permute.xlu1 %592 }
 0x178   : > { %5080 = vst [vmem:[#allocation11_spill] sm:$0xff] %v3473_v9 }
 0x17b   : > { %v3475_v8 = vpop.permute.xlu1 %594 }
 0x1bb   : > { %v3477_v7 = vpop.permute.xlu1 %609 }
 0x1bf   : > { %v3479_v6 = vpop.permute.xlu1 %611  ;;  %v3493_v42 = vpop.permute.xlu0 %629 }
 0x1c0   : > { %5082 = vst [vmem:[#allocation13_spill] sm:$0xff] %v3493_v42 }
 0x1c3   : > { %v3481_v5 = vpop.permute.xlu1 %627 }
 0x1c4   : > { %5081 = vst [vmem:[#allocation12_spill] sm:$0xff] %v3481_v5 }
 0x1d0   : > { %v638_v4 = vpop.permute.xlu1 %637 }
 0x1d1   : > { %v640_v1 = vmul.f32 %v638_v4, %v3313_v46  ;;  %v641_v2 = vmul.f32 %v638_v4, %v3316_v47 }
 0x1d3   : > { %646 = vrot.lane.b32.xlu1 %v641_v2, %s3103_s24  ;;  %644 = vrot.lane.b32.xlu0 %v640_v1, %s3103_s24 }
 0x1d7   : > { %654 = vperm.xlu0 %3004, %v3201_v3  }
 0x1db   : > { %3005 = vset.pattern.permute.xlu0 %v4986_v31 }
 0x1dc   : > { %671 = vperm.xlu0 %3005, %v3192_v0  }
 0x1e0   : > { %688 = vperm.xlu0 %3005, %v3201_v3  }
 0x1e4   : > { %3007 = vset.pattern.permute.xlu0 %v4995_v45 }
 0x245   : > { %v3495_v4 = vpop.permute.xlu0 %644 }
 0x246   : > { %5083 = vst [vmem:[#allocation14_spill] sm:$0xff] %v3495_v4  ;;  %v255_v4 = vmul.f32 %v3277_v27, %v3313_v46 }
 0x252   : > { %v655_v2 = vpop.permute.xlu0 %654 }
 0x253   : > { %v657_v1 = vmul.f32 %v655_v2, %v3313_v46  ;;  %v658_v31 = vmul.f32 %v655_v2, %v3316_v47  ;;  %v3510_v2 = vpop.permute.xlu1 %646 }
 0x254   : > { %5084 = vst [vmem:[#allocation15_spill] sm:$0xff] %v3510_v2  ;;  %v289_v2 = vmul.f32 %v3270_v24, %v3344_v23 }
 0x255   : > { %661 = vrot.lane.b32.xlu1 %v657_v1, %s3103_s24 }
 0x257   : > { %v672_v51 = vpop.permute.xlu0 %671 }
 0x258   : > { %v674_v36 = vmul.f32 %v672_v51, %v3344_v23  ;;  %v675_v45 = vmul.f32 %v672_v51, %v3328_v55 }
 0x259   : > { %663 = vrot.lane.b32.xlu1 %v658_v31, %s3103_s24 }
 0x25b   : > { %v689_v35 = vpop.permute.xlu0 %688 }
 0x25c   : > { %v692_v19 = vmul.f32 %v689_v35, %v3328_v55  ;;  %v691_v1 = vmul.f32 %v689_v35, %v3344_v23 }
 0x25d   : > { %678 = vrot.lane.b32.xlu1 %v674_v36, %s3103_s24 }
 0x25e   : > { %697 = vrot.lane.b32.xlu0 %v692_v19, %s3103_s24 }
 0x261   : > { %680 = vrot.lane.b32.xlu1 %v675_v45, %s3103_s24 }
 0x265   : > { %695 = vrot.lane.b32.xlu1 %v691_v1, %s3103_s24  ;;  %v4998_v1 = vmov 16  }
 0x269   : > { %705 = vperm.xlu1 %3006, %v3192_v0  }
 0x2c7   : > { %v3512_v31 = vpop.permute.xlu1 %661 }
 0x2c8   : > { %5085 = vst [vmem:[#allocation16_spill] sm:$0xff] %v3512_v31  ;;  %v5002_v31 = vmov 17  }
 0x2c9   : > { %3009 = vset.pattern.permute.xlu1 %v5002_v31 }
 0x2cb   : > { %v3514_v22 = vpop.permute.xlu1 %663 }
 0x2cc   : > { %5086 = vst [vmem:[#allocation17_spill] sm:$0xff] %v3514_v22 }
 0x2cf   : > { %v3516_v5 = vpop.permute.xlu1 %678 }
 0x2d0   : > { %5087 = vst [vmem:[#allocation18_spill] sm:$0xff] %v3516_v5 }
 0x2d3   : > { %v3518_v36 = vpop.permute.xlu1 %680 }
 0x2d4   : > { %5088 = vst [vmem:[#allocation19_spill] sm:$0xff] %v3518_v36 }
 0x2d7   : > { %v3520_v19 = vpop.permute.xlu1 %695 }
 0x2d8   : > { %5089 = vst [vmem:[#allocation20_spill] sm:$0xff] %v3520_v19  ;;  %v3532_v19 = vpop.permute.xlu0 %697 }
 0x2d9   : > { %5090 = vst [vmem:[#allocation21_spill] sm:$0xff] %v3532_v19 }
 0x2e4   : > { %v706_v51 = vpop.permute.xlu1 %705 }
 0x2e5   : > { %v708_v45 = vmul.f32 %v706_v51, %v3334_v57  ;;  %v709_v35 = vmul.f32 %v706_v51, %v3363_v41 }
 0x2e7   : > { %714 = vrot.lane.b32.xlu1 %v709_v35, %s3103_s24  ;;  %712 = vrot.lane.b32.xlu0 %v708_v45, %s3103_s24 }
 0x2eb   : > { %722 = vperm.xlu0 %3007, %v3201_v3  }
 0x2ef   : > { %3008 = vset.pattern.permute.xlu0 %v4998_v1 }
 0x2f0   : > { %739 = vperm.xlu0 %3008, %v3192_v0  }
 0x2f4   : > { %757 = vperm.xlu0 %3008, %v3201_v3  }
 0x2f8   : > { %3010 = vset.pattern.permute.xlu0 %v5002_v31 }
 0x359   : > { %v3534_v51 = vpop.permute.xlu0 %712 }
 0x35a   : > { %5091 = vst [vmem:[#allocation22_spill] sm:$0xff] %v3534_v51 }
 0x366   : > { %v723_v35 = vpop.permute.xlu0 %722 }
 0x367   : > { %v725_v45 = vmul.f32 %v723_v35, %v3334_v57  ;;  %v726_v1 = vmul.f32 %v723_v35, %v3363_v41  ;;  %v3549_v35 = vpop.permute.xlu1 %714 }
 0x368   : > { %5092 = vst [vmem:[#allocation23_spill] sm:$0xff] %v3549_v35 }
 0x369   : > { %729 = vrot.lane.b32.xlu1 %v725_v45, %s3103_s24 }
 0x36b   : > { %v740_v22 = vpop.permute.xlu0 %739 }
 0x36c   : > { %v742_v5 = vmul.f32 %v740_v22, %v3275_v26  ;;  %v743_v31 = vmul.f32 %v740_v22, %v3281_v30 }
 0x36d   : > { %731 = vrot.lane.b32.xlu1 %v726_v1, %s3103_s24  ;;  %s3141_s24 = smov 4  }
 0x36f   : > { %v758_v36 = vpop.permute.xlu0 %757 }
 0x370   : > { %v761_v42 = vmul.f32 %v758_v36, %v3281_v30  ;;  %v760_v45 = vmul.f32 %v758_v36, %v3275_v26 }
 0x371   : > { %746 = vrot.lane.b32.xlu1 %v742_v5, %s3108_s25 }
 0x372   : > { %766 = vrot.lane.b32.xlu0 %v761_v42, %s3108_s25 }
 0x375   : > { %748 = vrot.lane.b32.xlu1 %v743_v31, %s3108_s25 }
 0x379   : > { %764 = vrot.lane.b32.xlu1 %v760_v45, %s3108_s25  ;;  %v5004_v45 = vmov 18  }
 0x37d   : > { %774 = vperm.xlu1 %3009, %v3192_v0  }
 0x3db   : > { %v3551_v1 = vpop.permute.xlu1 %729 }
 0x3dc   : > { %5093 = vst [vmem:[#allocation24_spill] sm:$0xff] %v3551_v1  ;;  %v5008_v1 = vmov 19  }
 0x3dd   : > { %3012 = vset.pattern.permute.xlu1 %v5008_v1 }
 0x3df   : > { %v3553_v19 = vpop.permute.xlu1 %731 }
 0x3e0   : > { %5094 = vst [vmem:[#allocation25_spill] sm:$0xff] %v3553_v19 }
 0x3e3   : > { %v3555_v51 = vpop.permute.xlu1 %746 }
 0x3e4   : > { %5095 = vst [vmem:[#allocation26_spill] sm:$0xff] %v3555_v51 }
 0x3e7   : > { %v3557_v5 = vpop.permute.xlu1 %748 }
 0x3e8   : > { %5096 = vst [vmem:[#allocation27_spill] sm:$0xff] %v3557_v5 }
 0x3eb   : > { %v3559_v42 = vpop.permute.xlu1 %764 }
 0x3ec   : > { %5097 = vst [vmem:[#allocation28_spill] sm:$0xff] %v3559_v42  ;;  %v3571_v42 = vpop.permute.xlu0 %766 }
 0x3ed   : > { %5098 = vst [vmem:[#allocation29_spill] sm:$0xff] %v3571_v42 }
 0x3f8   : > { %v775_v22 = vpop.permute.xlu1 %774 }
 0x3f9   : > { %v777_v31 = vmul.f32 %v775_v22, %v3313_v46  ;;  %v778_v36 = vmul.f32 %v775_v22, %v3316_v47 }
 0x3fb   : > { %783 = vrot.lane.b32.xlu1 %v778_v36, %s3108_s25  ;;  %781 = vrot.lane.b32.xlu0 %v777_v31, %s3108_s25 }
 0x3ff   : > { %791 = vperm.xlu0 %3010, %v3201_v3  }
 0x403   : > { %3011 = vset.pattern.permute.xlu0 %v5004_v45 }
 0x404   : > { %808 = vperm.xlu0 %3011, %v3192_v0  }
 0x408   : > { %825 = vperm.xlu0 %3011, %v3201_v3  }
 0x40c   : > { %3013 = vset.pattern.permute.xlu0 %v5008_v1 }
 0x46d   : > { %v3573_v22 = vpop.permute.xlu0 %781 }
 0x46e   : > { %5099 = vst [vmem:[#allocation30_spill] sm:$0xff] %v3573_v22 }
 0x47a   : > { %v792_v36 = vpop.permute.xlu0 %791 }
 0x47b   : > { %v794_v31 = vmul.f32 %v792_v36, %v3313_v46  ;;  %v795_v45 = vmul.f32 %v792_v36, %v3316_v47  ;;  %v3588_v36 = vpop.permute.xlu1 %783 }
 0x47c   : > { %5100 = vst [vmem:[#allocation31_spill] sm:$0xff] %v3588_v36 }
 0x47d   : > { %798 = vrot.lane.b32.xlu1 %v794_v31, %s3108_s25 }
 0x47f   : > { %v809_v19 = vpop.permute.xlu0 %808 }
 0x480   : > { %v811_v51 = vmul.f32 %v809_v19, %v3344_v23  ;;  %v812_v1 = vmul.f32 %v809_v19, %v3328_v55 }
 0x481   : > { %800 = vrot.lane.b32.xlu1 %v795_v45, %s3108_s25 }
 0x483   : > { %v826_v5 = vpop.permute.xlu0 %825 }
 0x484   : > { %v829_v35 = vmul.f32 %v826_v5, %v3328_v55  ;;  %v828_v31 = vmul.f32 %v826_v5, %v3344_v23 }
 0x485   : > { %815 = vrot.lane.b32.xlu1 %v811_v51, %s3108_s25 }
 0x486   : > { %834 = vrot.lane.b32.xlu0 %v829_v35, %s3108_s25 }
 0x489   : > { %817 = vrot.lane.b32.xlu1 %v812_v1, %s3108_s25 }
 0x48d   : > { %832 = vrot.lane.b32.xlu1 %v828_v31, %s3108_s25  ;;  %v5010_v31 = vmov 20  }
 0x491   : > { %842 = vperm.xlu1 %3012, %v3192_v0  }
 0x4ef   : > { %v3590_v45 = vpop.permute.xlu1 %798 }
 0x4f0   : > { %5101 = vst [vmem:[#allocation32_spill] sm:$0xff] %v3590_v45  ;;  %v5014_v45 = vmov 21  }
 0x4f1   : > { %3015 = vset.pattern.permute.xlu1 %v5014_v45 }
 0x4f3   : > { %v3592_v42 = vpop.permute.xlu1 %800 }
 0x4f4   : > { %5102 = vst [vmem:[#allocation33_spill] sm:$0xff] %v3592_v42 }
 0x4f7   : > { %v3594_v22 = vpop.permute.xlu1 %815 }
 0x4f8   : > { %5103 = vst [vmem:[#allocation34_spill] sm:$0xff] %v3594_v22 }
 0x4fb   : > { %v3596_v51 = vpop.permute.xlu1 %817 }
 0x4fc   : > { %5104 = vst [vmem:[#allocation35_spill] sm:$0xff] %v3596_v51 }
 0x4ff   : > { %v3598_v35 = vpop.permute.xlu1 %832 }
 0x500   : > { %5105 = vst [vmem:[#allocation36_spill] sm:$0xff] %v3598_v35  ;;  %v3610_v35 = vpop.permute.xlu0 %834 }
 0x501   : > { %5106 = vst [vmem:[#allocation37_spill] sm:$0xff] %v3610_v35 }
 0x50c   : > { %v843_v19 = vpop.permute.xlu1 %842 }
 0x50d   : > { %v845_v1 = vmul.f32 %v843_v19, %v3334_v57  ;;  %v846_v5 = vmul.f32 %v843_v19, %v3363_v41 }
 0x50f   : > { %851 = vrot.lane.b32.xlu1 %v846_v5, %s3108_s25  ;;  %849 = vrot.lane.b32.xlu0 %v845_v1, %s3108_s25 }
 0x513   : > { %859 = vperm.xlu0 %3013, %v3201_v3  }
 0x517   : > { %3014 = vset.pattern.permute.xlu0 %v5010_v31 }
 0x518   : > { %876 = vperm.xlu0 %3014, %v3192_v0  }
 0x51c   : > { %894 = vperm.xlu0 %3014, %v3201_v3  }
 0x520   : > { %3016 = vset.pattern.permute.xlu0 %v5014_v45 }
 0x581   : > { %v3612_v19 = vpop.permute.xlu0 %849 }
 0x582   : > { %5107 = vst [vmem:[#allocation38_spill] sm:$0xff] %v3612_v19 }
 0x58e   : > { %v860_v5 = vpop.permute.xlu0 %859 }
 0x58f   : > { %v862_v1 = vmul.f32 %v860_v5, %v3334_v57  ;;  %v863_v31 = vmul.f32 %v860_v5, %v3363_v41  ;;  %v3627_v5 = vpop.permute.xlu1 %851 }
 0x590   : > { %5108 = vst [vmem:[#allocation39_spill] sm:$0xff] %v3627_v5 }
 0x591   : > { %866 = vrot.lane.b32.xlu1 %v862_v1, %s3108_s25 }
 0x593   : > { %v877_v42 = vpop.permute.xlu0 %876 }
 0x594   : > { %v879_v22 = vmul.f32 %v877_v42, %v3275_v26  ;;  %v880_v45 = vmul.f32 %v877_v42, %v3281_v30 }
 0x595   : > { %868 = vrot.lane.b32.xlu1 %v863_v31, %s3108_s25  ;;  %s3142_s25 = smov 16  }
 0x597   : > { %v895_v51 = vpop.permute.xlu0 %894 }
 0x598   : > { %v898_v36 = vmul.f32 %v895_v51, %v3281_v30  ;;  %v897_v1 = vmul.f32 %v895_v51, %v3275_v26 }
 0x599   : > { %883 = vrot.lane.b32.xlu1 %v879_v22, %s3113_s26 }
 0x59a   : > { %903 = vrot.lane.b32.xlu0 %v898_v36, %s3113_s26 }
 0x59d   : > { %885 = vrot.lane.b32.xlu1 %v880_v45, %s3113_s26 }
 0x5a1   : > { %901 = vrot.lane.b32.xlu1 %v897_v1, %s3113_s26  ;;  %v5016_v1 = vmov 22  }
 0x5a5   : > { %911 = vperm.xlu1 %3015, %v3192_v0  }
 0x603   : > { %v3629_v31 = vpop.permute.xlu1 %866 }
 0x604   : > { %5109 = vst [vmem:[#allocation40_spill] sm:$0xff] %v3629_v31  ;;  %v5020_v31 = vmov 23  }
 0x605   : > { %3018 = vset.pattern.permute.xlu1 %v5020_v31 }
 0x607   : > { %v3631_v35 = vpop.permute.xlu1 %868 }
 0x608   : > { %5110 = vst [vmem:[#allocation41_spill] sm:$0xff] %v3631_v35 }
 0x60b   : > { %v3633_v19 = vpop.permute.xlu1 %883 }
 0x60c   : > { %5111 = vst [vmem:[#allocation42_spill] sm:$0xff] %v3633_v19 }
 0x60f   : > { %v3635_v22 = vpop.permute.xlu1 %885 }
 0x610   : > { %5112 = vst [vmem:[#allocation43_spill] sm:$0xff] %v3635_v22 }
 0x613   : > { %v3637_v36 = vpop.permute.xlu1 %901 }
 0x614   : > { %5113 = vst [vmem:[#allocation44_spill] sm:$0xff] %v3637_v36  ;;  %v3649_v36 = vpop.permute.xlu0 %903 }
 0x615   : > { %5114 = vst [vmem:[#allocation45_spill] sm:$0xff] %v3649_v36 }
 0x620   : > { %v912_v42 = vpop.permute.xlu1 %911 }
 0x621   : > { %v914_v45 = vmul.f32 %v912_v42, %v3313_v46  ;;  %v915_v51 = vmul.f32 %v912_v42, %v3316_v47 }
 0x623   : > { %920 = vrot.lane.b32.xlu1 %v915_v51, %s3113_s26  ;;  %918 = vrot.lane.b32.xlu0 %v914_v45, %s3113_s26 }
 0x627   : > { %928 = vperm.xlu0 %3016, %v3201_v3  }
 0x62b   : > { %3017 = vset.pattern.permute.xlu0 %v5016_v1 }
 0x62c   : > { %945 = vperm.xlu0 %3017, %v3192_v0  }
 0x630   : > { %962 = vperm.xlu0 %3017, %v3201_v3  }
 0x634   : > { %3019 = vset.pattern.permute.xlu0 %v5020_v31 }
 0x695   : > { %v3651_v42 = vpop.permute.xlu0 %918 }
 0x696   : > { %5115 = vst [vmem:[#allocation46_spill] sm:$0xff] %v3651_v42 }
 0x6a2   : > { %v929_v51 = vpop.permute.xlu0 %928 }
 0x6a3   : > { %v931_v45 = vmul.f32 %v929_v51, %v3313_v46  ;;  %v932_v1 = vmul.f32 %v929_v51, %v3316_v47  ;;  %v3666_v51 = vpop.permute.xlu1 %920 }
 0x6a4   : > { %5116 = vst [vmem:[#allocation47_spill] sm:$0xff] %v3666_v51 }
 0x6a5   : > { %935 = vrot.lane.b32.xlu1 %v931_v45, %s3113_s26 }
 0x6a7   : > { %v946_v35 = vpop.permute.xlu0 %945 }
 0x6a8   : > { %v948_v19 = vmul.f32 %v946_v35, %v3344_v23  ;;  %v949_v31 = vmul.f32 %v946_v35, %v3328_v55 }
 0x6a9   : > { %937 = vrot.lane.b32.xlu1 %v932_v1, %s3113_s26 }
 0x6ab   : > { %v963_v22 = vpop.permute.xlu0 %962 }
 0x6ac   : > { %v966_v5 = vmul.f32 %v963_v22, %v3328_v55  ;;  %v965_v45 = vmul.f32 %v963_v22, %v3344_v23 }
 0x6ad   : > { %952 = vrot.lane.b32.xlu1 %v948_v19, %s3113_s26 }
 0x6ae   : > { %971 = vrot.lane.b32.xlu0 %v966_v5, %s3113_s26 }
 0x6b1   : > { %954 = vrot.lane.b32.xlu1 %v949_v31, %s3113_s26 }
 0x6b5   : > { %969 = vrot.lane.b32.xlu1 %v965_v45, %s3113_s26  ;;  %v5022_v45 = vmov 24  }
 0x6b9   : > { %979 = vperm.xlu1 %3018, %v3192_v0  }
 0x717   : > { %v3668_v1 = vpop.permute.xlu1 %935 }
 0x718   : > { %5117 = vst [vmem:[#allocation48_spill] sm:$0xff] %v3668_v1  ;;  %v5026_v1 = vmov 25  }
 0x719   : > { %3021 = vset.pattern.permute.xlu1 %v5026_v1 }
 0x71b   : > { %v3670_v36 = vpop.permute.xlu1 %937 }
 0x71c   : > { %5118 = vst [vmem:[#allocation49_spill] sm:$0xff] %v3670_v36 }
 0x71f   : > { %v3672_v42 = vpop.permute.xlu1 %952 }
 0x720   : > { %5119 = vst [vmem:[#allocation50_spill] sm:$0xff] %v3672_v42 }
 0x723   : > { %v3674_v19 = vpop.permute.xlu1 %954 }
 0x724   : > { %5120 = vst [vmem:[#allocation51_spill] sm:$0xff] %v3674_v19 }
 0x727   : > { %v3676_v5 = vpop.permute.xlu1 %969 }
 0x728   : > { %5121 = vst [vmem:[#allocation52_spill] sm:$0xff] %v3676_v5  ;;  %v3688_v5 = vpop.permute.xlu0 %971 }
 0x729   : > { %5122 = vst [vmem:[#allocation53_spill] sm:$0xff] %v3688_v5 }
 0x734   : > { %v980_v35 = vpop.permute.xlu1 %979 }
 0x735   : > { %v982_v31 = vmul.f32 %v980_v35, %v3334_v57  ;;  %v983_v22 = vmul.f32 %v980_v35, %v3363_v41 }
 0x737   : > { %988 = vrot.lane.b32.xlu1 %v983_v22, %s3113_s26  ;;  %986 = vrot.lane.b32.xlu0 %v982_v31, %s3113_s26 }
 0x73b   : > { %996 = vperm.xlu0 %3019, %v3201_v3  }
 0x73f   : > { %3020 = vset.pattern.permute.xlu0 %v5022_v45 }
 0x740   : > { %1013 = vperm.xlu0 %3020, %v3192_v0  }
 0x744   : > { %1031 = vperm.xlu0 %3020, %v3201_v3  }
 0x748   : > { %3022 = vset.pattern.permute.xlu0 %v5026_v1 }
 0x7a9   : > { %v3690_v35 = vpop.permute.xlu0 %986 }
 0x7aa   : > { %5123 = vst [vmem:[#allocation54_spill] sm:$0xff] %v3690_v35 }
 0x7b6   : > { %v997_v22 = vpop.permute.xlu0 %996 }
 0x7b7   : > { %v999_v31 = vmul.f32 %v997_v22, %v3334_v57  ;;  %v1000_v45 = vmul.f32 %v997_v22, %v3363_v41  ;;  %v3705_v22 = vpop.permute.xlu1 %988 }
 0x7b8   : > { %5124 = vst [vmem:[#allocation55_spill] sm:$0xff] %v3705_v22 }
 0x7b9   : > { %1003 = vrot.lane.b32.xlu1 %v999_v31, %s3113_s26 }
 0x7bb   : > { %v1014_v36 = vpop.permute.xlu0 %1013 }
 0x7bc   : > { %v1016_v42 = vmul.f32 %v1014_v36, %v3275_v26  ;;  %v1017_v1 = vmul.f32 %v1014_v36, %v3281_v30 }
 0x7bd   : > { %1005 = vrot.lane.b32.xlu1 %v1000_v45, %s3113_s26 }
 0x7bf   : > { %v1032_v19 = vpop.permute.xlu0 %1031 }
 0x7c0   : > { %v1035_v51 = vmul.f32 %v1032_v19, %v3281_v30  ;;  %v1034_v31 = vmul.f32 %v1032_v19, %v3275_v26 }
 0x7c1   : > { %1020 = vrot.lane.b32.xlu1 %v1016_v42, %s3118_s27 }
 0x7c2   : > { %1040 = vrot.lane.b32.xlu0 %v1035_v51, %s3118_s27 }
 0x7c5   : > { %1022 = vrot.lane.b32.xlu1 %v1017_v1, %s3118_s27 }
 0x7c9   : > { %1038 = vrot.lane.b32.xlu1 %v1034_v31, %s3118_s27  ;;  %v5028_v31 = vmov 26  }
 0x7cd   : > { %1048 = vperm.xlu1 %3021, %v3192_v0  }
 0x82b   : > { %v3707_v45 = vpop.permute.xlu1 %1003 }
 0x82c   : > { %5125 = vst [vmem:[#allocation56_spill] sm:$0xff] %v3707_v45  ;;  %v5032_v45 = vmov 27  }
 0x82d   : > { %3024 = vset.pattern.permute.xlu1 %v5032_v45 }
 0x82f   : > { %v3709_v5 = vpop.permute.xlu1 %1005 }
 0x830   : > { %5126 = vst [vmem:[#allocation57_spill] sm:$0xff] %v3709_v5 }
 0x833   : > { %v3711_v35 = vpop.permute.xlu1 %1020 }
 0x834   : > { %5127 = vst [vmem:[#allocation58_spill] sm:$0xff] %v3711_v35 }
 0x837   : > { %v3713_v42 = vpop.permute.xlu1 %1022 }
 0x838   : > { %5128 = vst [vmem:[#allocation59_spill] sm:$0xff] %v3713_v42 }
 0x83b   : > { %v3715_v51 = vpop.permute.xlu1 %1038 }
 0x83c   : > { %5129 = vst [vmem:[#allocation60_spill] sm:$0xff] %v3715_v51  ;;  %v3727_v51 = vpop.permute.xlu0 %1040 }
 0x83d   : > { %5130 = vst [vmem:[#allocation61_spill] sm:$0xff] %v3727_v51 }
 0x848   : > { %v1049_v36 = vpop.permute.xlu1 %1048 }
 0x849   : > { %v1051_v1 = vmul.f32 %v1049_v36, %v3313_v46  ;;  %v1052_v19 = vmul.f32 %v1049_v36, %v3316_v47 }
 0x84b   : > { %1057 = vrot.lane.b32.xlu1 %v1052_v19, %s3118_s27  ;;  %1055 = vrot.lane.b32.xlu0 %v1051_v1, %s3118_s27 }
 0x84f   : > { %1065 = vperm.xlu0 %3022, %v3201_v3  }
 0x853   : > { %3023 = vset.pattern.permute.xlu0 %v5028_v31 }
 0x854   : > { %1082 = vperm.xlu0 %3023, %v3192_v0  }
 0x858   : > { %1099 = vperm.xlu0 %3023, %v3201_v3  }
 0x85c   : > { %3025 = vset.pattern.permute.xlu0 %v5032_v45 }
 0x8bd   : > { %v3729_v36 = vpop.permute.xlu0 %1055 }
 0x8be   : > { %5131 = vst [vmem:[#allocation62_spill] sm:$0xff] %v3729_v36 }
 0x8ca   : > { %v1066_v19 = vpop.permute.xlu0 %1065 }
 0x8cb   : > { %v1068_v1 = vmul.f32 %v1066_v19, %v3313_v46  ;;  %v1069_v31 = vmul.f32 %v1066_v19, %v3316_v47  ;;  %v3744_v19 = vpop.permute.xlu1 %1057 }
 0x8cc   : > { %5132 = vst [vmem:[#allocation63_spill] sm:$0xff] %v3744_v19 }
 0x8cd   : > { %1072 = vrot.lane.b32.xlu1 %v1068_v1, %s3118_s27 }
 0x8cf   : > { %v1083_v5 = vpop.permute.xlu0 %1082 }
 0x8d0   : > { %v1085_v35 = vmul.f32 %v1083_v5, %v3344_v23  ;;  %v1086_v45 = vmul.f32 %v1083_v5, %v3328_v55 }
 0x8d1   : > { %1074 = vrot.lane.b32.xlu1 %v1069_v31, %s3118_s27 }
 0x8d3   : > { %v1100_v42 = vpop.permute.xlu0 %1099 }
 0x8d4   : > { %v1103_v22 = vmul.f32 %v1100_v42, %v3328_v55  ;;  %v1102_v1 = vmul.f32 %v1100_v42, %v3344_v23 }
 0x8d5   : > { %1089 = vrot.lane.b32.xlu1 %v1085_v35, %s3118_s27 }
 0x8d6   : > { %1108 = vrot.lane.b32.xlu0 %v1103_v22, %s3118_s27 }
 0x8d9   : > { %1091 = vrot.lane.b32.xlu1 %v1086_v45, %s3118_s27 }
 0x8dd   : > { %1106 = vrot.lane.b32.xlu1 %v1102_v1, %s3118_s27  ;;  %v5034_v1 = vmov 28  }
 0x8e1   : > { %1116 = vperm.xlu1 %3024, %v3192_v0  }
 0x93f   : > { %v3746_v31 = vpop.permute.xlu1 %1072 }
 0x940   : > { %5133 = vst [vmem:[#allocation64_spill] sm:$0xff] %v3746_v31  ;;  %v5036_v31 = vmov 29  }
 0x941   : > { %3027 = vset.pattern.permute.xlu1 %v5036_v31 }
 0x943   : > { %v3748_v51 = vpop.permute.xlu1 %1074 }
 0x944   : > { %5134 = vst [vmem:[#allocation65_spill] sm:$0xff] %v3748_v51 }
 0x947   : > { %v3750_v36 = vpop.permute.xlu1 %1089 }
 0x948   : > { %5135 = vst [vmem:[#allocation66_spill] sm:$0xff] %v3750_v36 }
 0x94b   : > { %v3752_v35 = vpop.permute.xlu1 %1091 }
 0x94c   : > { %5136 = vst [vmem:[#allocation67_spill] sm:$0xff] %v3752_v35 }
 0x94f   : > { %v3754_v22 = vpop.permute.xlu1 %1106 }
 0x950   : > { %5137 = vst [vmem:[#allocation68_spill] sm:$0xff] %v3754_v22  ;;  %v3766_v22 = vpop.permute.xlu0 %1108 }
 0x951   : > { %5138 = vst [vmem:[#allocation69_spill] sm:$0xff] %v3766_v22 }
 0x95c   : > { %v1117_v5 = vpop.permute.xlu1 %1116 }
 0x95d   : > { %v1119_v45 = vmul.f32 %v1117_v5, %v3334_v57  ;;  %v1120_v42 = vmul.f32 %v1117_v5, %v3363_v41 }
 0x95f   : > { %1125 = vrot.lane.b32.xlu1 %v1120_v42, %s3118_s27  ;;  %1123 = vrot.lane.b32.xlu0 %v1119_v45, %s3118_s27 }
 0x963   : > { %1133 = vperm.xlu0 %3025, %v3201_v3  }
 0x967   : > { %3026 = vset.pattern.permute.xlu0 %v5034_v1 }
 0x968   : > { %1150 = vperm.xlu0 %3026, %v3192_v0  }
 0x96c   : > { %1168 = vperm.xlu0 %3026, %v3201_v3  }
 0x970   : > { %3028 = vset.pattern.permute.xlu0 %v5036_v31 }
 0x9d1   : > { %v3768_v5 = vpop.permute.xlu0 %1123 }
 0x9d2   : > { %5139 = vst [vmem:[#allocation70_spill] sm:$0xff] %v3768_v5 }
 0x9de   : > { %v1134_v42 = vpop.permute.xlu0 %1133 }
 0x9df   : > { %v1136_v45 = vmul.f32 %v1134_v42, %v3334_v57  ;;  %v1137_v1 = vmul.f32 %v1134_v42, %v3363_v41  ;;  %v3788_v42 = vpop.permute.xlu1 %1125 }
 0x9e0   : > { %5140 = vst [vmem:[#allocation71_spill] sm:$0xff] %v3788_v42 }
 0x9e1   : > { %1140 = vrot.lane.b32.xlu1 %v1136_v45, %s3118_s27 }
 0x9e3   : > { %v1151_v51 = vpop.permute.xlu0 %1150 }
 0x9e4   : > { %v1153_v0 = vmul.f32 %v1151_v51, %v3275_v26  ;;  %v1154_v31 = vmul.f32 %v1151_v51, %v3281_v30 }
 0x9e5   : > { %1142 = vrot.lane.b32.xlu1 %v1137_v1, %s3118_s27  ;;  %v3785_v1 = vld [vmem:[%s4962_s1] sm:$0xf] }
 0x9e7   : > { %v1169_v3 = vpop.permute.xlu0 %1168 }
 0x9e8   : > { %v1172_v36 = vmul.f32 %v1169_v3, %v3281_v30  ;;  %v1171_v45 = vmul.f32 %v1169_v3, %v3275_v26 }
 0x9e9   : > { %1157 = vrot.lane.b32.xlu1 %v1153_v0, %s3123_s28 }
 0x9ea   : > { %1177 = vrot.lane.b32.xlu0 %v1172_v36, %s3123_s28 }
 0x9ed   : > { %1159 = vrot.lane.b32.xlu1 %v1154_v31, %s3123_s28 }
 0x9f1   : > { %1175 = vrot.lane.b32.xlu1 %v1171_v45, %s3123_s28 }
 0x9f5   : > { %1185 = vperm.xlu1 %3027, %v3785_v1  }
 0xa53   : > { %v3790_v0 = vpop.permute.xlu1 %1140 }
 0xa54   : > { %5141 = vst [vmem:[#allocation72_spill] sm:$0xff] %v3790_v0  ;;  %v3807_v0 = vld [vmem:[%s4962_s1 + $0x4] sm:$0xf] }
 0xa57   : > { %v3792_v36 = vpop.permute.xlu1 %1142 }
 0xa58   : > { %5142 = vst [vmem:[#allocation73_spill] sm:$0xff] %v3792_v36  ;;  %v5039_v36 = vmov 30  }
 0xa5b   : > { %v3794_v51 = vpop.permute.xlu1 %1157 }
 0xa5c   : > { %5143 = vst [vmem:[#allocation74_spill] sm:$0xff] %v3794_v51 }
 0xa5f   : > { %v3796_v31 = vpop.permute.xlu1 %1159 }
 0xa60   : > { %5144 = vst [vmem:[#allocation75_spill] sm:$0xff] %v3796_v31 }
 0xa63   : > { %v3798_v3 = vpop.permute.xlu1 %1175 }
 0xa64   : > { %5145 = vst [vmem:[#allocation76_spill] sm:$0xff] %v3798_v3  ;;  %v5044_v3 = vmov 31  }
 0xa65   : > { %3030 = vset.pattern.permute.xlu1 %v5044_v3 }
 0xa70   : > { %v1186_v45 = vpop.permute.xlu1 %1185 }
 0xa71   : > { %v1188_v22 = vmul.f32 %v1186_v45, %v3313_v46  ;;  %v1189_v5 = vmul.f32 %v1186_v45, %v3316_v47 }
 0xa73   : > { %1194 = vrot.lane.b32.xlu1 %v1189_v5, %s3123_s28  ;;  %1192 = vrot.lane.b32.xlu0 %v1188_v22, %s3123_s28  ;;  %v3815_v22 = vpop.permute.xlu0 %1177 }
 0xa74   : > { %5146 = vst [vmem:[#allocation77_spill] sm:$0xff] %v3815_v22 }
 0xa77   : > { %1202 = vperm.xlu0 %3028, %v3807_v0  }
 0xa7b   : > { %3029 = vset.pattern.permute.xlu0 %v5039_v36 }
 0xa7c   : > { %1219 = vperm.xlu0 %3029, %v3785_v1  }
 0xa80   : > { %1236 = vperm.xlu0 %3029, %v3807_v0  }
 0xa84   : > { %3031 = vset.pattern.permute.xlu0 %v5044_v3 }
 0xae5   : > { %v3817_v5 = vpop.permute.xlu0 %1192 }
 0xae6   : > { %5147 = vst [vmem:[#allocation78_spill] sm:$0xff] %v3817_v5 }
 0xaf2   : > { %v1203_v45 = vpop.permute.xlu0 %1202 }
 0xaf3   : > { %v1205_v51 = vmul.f32 %v1203_v45, %v3313_v46  ;;  %v1206_v36 = vmul.f32 %v1203_v45, %v3316_v47  ;;  %v3832_v45 = vpop.permute.xlu1 %1194 }
 0xaf4   : > { %5148 = vst [vmem:[#allocation79_spill] sm:$0xff] %v3832_v45 }
 0xaf5   : > { %1209 = vrot.lane.b32.xlu1 %v1205_v51, %s3123_s28 }
 0xaf7   : > { %v1220_v31 = vpop.permute.xlu0 %1219 }
 0xaf8   : > { %v1222_v42 = vmul.f32 %v1220_v31, %v3344_v23  ;;  %v1223_v3 = vmul.f32 %v1220_v31, %v3328_v55 }
 0xaf9   : > { %1211 = vrot.lane.b32.xlu1 %v1206_v36, %s3123_s28 }
 0xafb   : > { %v1237_v35 = vpop.permute.xlu0 %1236 }
 0xafc   : > { %v1240_v19 = vmul.f32 %v1237_v35, %v3328_v55  ;;  %v1239_v51 = vmul.f32 %v1237_v35, %v3344_v23 }
 0xafd   : > { %1226 = vrot.lane.b32.xlu1 %v1222_v42, %s3123_s28 }
 0xafe   : > { %1245 = vrot.lane.b32.xlu0 %v1240_v19, %s3123_s28 }
 0xb01   : > { %1228 = vrot.lane.b32.xlu1 %v1223_v3, %s3123_s28 }
 0xb05   : > { %1243 = vrot.lane.b32.xlu1 %v1239_v51, %s3123_s28  ;;  %v5046_v51 = vmov 32  }
 0xb09   : > { %1253 = vperm.xlu1 %3030, %v3785_v1  }
 0xb67   : > { %v3834_v36 = vpop.permute.xlu1 %1209 }
 0xb68   : > { %5149 = vst [vmem:[#allocation80_spill] sm:$0xff] %v3834_v36  ;;  %v5050_v36 = vmov 33  }
 0xb69   : > { %3033 = vset.pattern.permute.xlu1 %v5050_v36 }
 0xb6b   : > { %v3836_v22 = vpop.permute.xlu1 %1211 }
 0xb6c   : > { %5150 = vst [vmem:[#allocation81_spill] sm:$0xff] %v3836_v22 }
 0xb6f   : > { %v3838_v5 = vpop.permute.xlu1 %1226 }
 0xb70   : > { %5151 = vst [vmem:[#allocation82_spill] sm:$0xff] %v3838_v5 }
 0xb73   : > { %v3840_v42 = vpop.permute.xlu1 %1228 }
 0xb74   : > { %5152 = vst [vmem:[#allocation83_spill] sm:$0xff] %v3840_v42 }
 0xb77   : > { %v3842_v19 = vpop.permute.xlu1 %1243 }
 0xb78   : > { %5153 = vst [vmem:[#allocation84_spill] sm:$0xff] %v3842_v19  ;;  %v3854_v19 = vpop.permute.xlu0 %1245 }
 0xb79   : > { %5154 = vst [vmem:[#allocation85_spill] sm:$0xff] %v3854_v19 }
 0xb84   : > { %v1254_v31 = vpop.permute.xlu1 %1253 }
 0xb85   : > { %v1256_v3 = vmul.f32 %v1254_v31, %v3334_v57  ;;  %v1257_v35 = vmul.f32 %v1254_v31, %v3363_v41 }
 0xb87   : > { %1262 = vrot.lane.b32.xlu1 %v1257_v35, %s3123_s28  ;;  %1260 = vrot.lane.b32.xlu0 %v1256_v3, %s3123_s28 }
 0xb8b   : > { %1270 = vperm.xlu0 %3031, %v3807_v0  }
 0xb8f   : > { %3032 = vset.pattern.permute.xlu0 %v5046_v51 }
 0xb90   : > { %1287 = vperm.xlu0 %3032, %v3785_v1  }
 0xb94   : > { %1305 = vperm.xlu0 %3032, %v3807_v0  }
 0xb98   : > { %3034 = vset.pattern.permute.xlu0 %v5050_v36 }
 0xbf9   : > { %v3856_v31 = vpop.permute.xlu0 %1260 }
 0xbfa   : > { %5155 = vst [vmem:[#allocation86_spill] sm:$0xff] %v3856_v31 }
 0xc06   : > { %v1271_v35 = vpop.permute.xlu0 %1270 }
 0xc07   : > { %v1273_v3 = vmul.f32 %v1271_v35, %v3334_v57  ;;  %v1274_v51 = vmul.f32 %v1271_v35, %v3363_v41  ;;  %v3871_v35 = vpop.permute.xlu1 %1262 }
 0xc08   : > { %5156 = vst [vmem:[#allocation87_spill] sm:$0xff] %v3871_v35 }
 0xc09   : > { %1277 = vrot.lane.b32.xlu1 %v1273_v3, %s3123_s28 }
 0xc0b   : > { %v1288_v22 = vpop.permute.xlu0 %1287 }
 0xc0c   : > { %v1290_v5 = vmul.f32 %v1288_v22, %v3275_v26  ;;  %v1291_v36 = vmul.f32 %v1288_v22, %v3281_v30 }
 0xc0d   : > { %1279 = vrot.lane.b32.xlu1 %v1274_v51, %s3123_s28  ;;  %s3144_s28 = smov 28  }
 0xc0f   : > { %v1306_v42 = vpop.permute.xlu0 %1305 }
 0xc10   : > { %v1309_v45 = vmul.f32 %v1306_v42, %v3281_v30  ;;  %v1308_v3 = vmul.f32 %v1306_v42, %v3275_v26 }
 0xc11   : > { %1294 = vrot.lane.b32.xlu1 %v1290_v5, %s3128_s6 }
 0xc12   : > { %1314 = vrot.lane.b32.xlu0 %v1309_v45, %s3128_s6 }
 0xc15   : > { %1296 = vrot.lane.b32.xlu1 %v1291_v36, %s3128_s6 }
 0xc19   : > { %1312 = vrot.lane.b32.xlu1 %v1308_v3, %s3128_s6  ;;  %v5052_v3 = vmov 34  }
 0xc1d   : > { %1322 = vperm.xlu1 %3033, %v3785_v1  }
 0xc7b   : > { %v3873_v51 = vpop.permute.xlu1 %1277 }
 0xc7c   : > { %5157 = vst [vmem:[#allocation88_spill] sm:$0xff] %v3873_v51  ;;  %v5056_v51 = vmov 35  }
 0xc7d   : > { %3036 = vset.pattern.permute.xlu1 %v5056_v51 }
 0xc7f   : > { %v3875_v19 = vpop.permute.xlu1 %1279 }
 0xc80   : > { %5158 = vst [vmem:[#allocation89_spill] sm:$0xff] %v3875_v19 }
 0xc83   : > { %v3877_v31 = vpop.permute.xlu1 %1294 }
 0xc84   : > { %5159 = vst [vmem:[#allocation90_spill] sm:$0xff] %v3877_v31 }
 0xc87   : > { %v3879_v5 = vpop.permute.xlu1 %1296 }
 0xc88   : > { %5160 = vst [vmem:[#allocation91_spill] sm:$0xff] %v3879_v5 }
 0xc8b   : > { %v3881_v45 = vpop.permute.xlu1 %1312 }
 0xc8c   : > { %5161 = vst [vmem:[#allocation92_spill] sm:$0xff] %v3881_v45  ;;  %v3893_v45 = vpop.permute.xlu0 %1314 }
 0xc8d   : > { %5162 = vst [vmem:[#allocation93_spill] sm:$0xff] %v3893_v45 }
 0xc98   : > { %v1323_v22 = vpop.permute.xlu1 %1322 }
 0xc99   : > { %v1325_v36 = vmul.f32 %v1323_v22, %v3313_v46  ;;  %v1326_v42 = vmul.f32 %v1323_v22, %v3316_v47 }
 0xc9b   : > { %1331 = vrot.lane.b32.xlu1 %v1326_v42, %s3128_s6  ;;  %1329 = vrot.lane.b32.xlu0 %v1325_v36, %s3128_s6 }
 0xc9f   : > { %1339 = vperm.xlu0 %3034, %v3807_v0  }
 0xca3   : > { %3035 = vset.pattern.permute.xlu0 %v5052_v3 }
 0xca4   : > { %1356 = vperm.xlu0 %3035, %v3785_v1  }
 0xca8   : > { %1373 = vperm.xlu0 %3035, %v3807_v0  }
 0xcac   : > { %3037 = vset.pattern.permute.xlu0 %v5056_v51 }
 0xd0d   : > { %v3895_v22 = vpop.permute.xlu0 %1329 }
 0xd0e   : > { %5163 = vst [vmem:[#allocation94_spill] sm:$0xff] %v3895_v22 }
 0xd1a   : > { %v1340_v42 = vpop.permute.xlu0 %1339 }
 0xd1b   : > { %v1342_v36 = vmul.f32 %v1340_v42, %v3313_v46  ;;  %v1343_v3 = vmul.f32 %v1340_v42, %v3316_v47  ;;  %v5164_v42 = vmov 0  }
 0xd1d   : > { %1346 = vrot.lane.b32.xlu1 %v1342_v36, %s3128_s6 }
 0xd1f   : > { %v1357_v19 = vpop.permute.xlu0 %1356 }
 0xd20   : > { %v1359_v31 = vmul.f32 %v1357_v19, %v3344_v23  ;;  %v1360_v51 = vmul.f32 %v1357_v19, %v3328_v55 }
 0xd21   : > { %1348 = vrot.lane.b32.xlu1 %v1343_v3, %s3128_s6  ;;  %v3911_v3 = vpop.permute.xlu1 %1331 }
 0xd22   : > { %5165 = vst [vmem:[#allocation95_spill] sm:$0xff] %v3911_v3 }
 0xd23   : > { %v1374_v5 = vpop.permute.xlu0 %1373 }
 0xd24   : > { %v1377_v35 = vmul.f32 %v1374_v5, %v3328_v55  ;;  %v1376_v36 = vmul.f32 %v1374_v5, %v3344_v23 }
 0xd25   : > { %1363 = vrot.lane.b32.xlu1 %v1359_v31, %s3128_s6 }
 0xd26   : > { %1382 = vrot.lane.b32.xlu0 %v1377_v35, %s3128_s6 }
 0xd29   : > { %1365 = vrot.lane.b32.xlu1 %v1360_v51, %s3128_s6 }
 0xd2d   : > { %1380 = vrot.lane.b32.xlu1 %v1376_v36, %s3128_s6 }
 0xd31   : > { %1390 = vperm.xlu1 %3036, %v3785_v1   ;;  %v174_v1 = vld [vmem:[%s4963_s2] sm:$0xf] }
 0xd35   : > { %3039 = vset.pattern.permute.xlu1 %v5164_v42 }
 0xd8f   : > { %v3913_v45 = vpop.permute.xlu1 %1346 }
 0xd90   : > { %5166 = vst [vmem:[#allocation96_spill] sm:$0xff] %v3913_v45  ;;  %v3131_v45 = vmov 0.0  }
 0xd91   : > { %1423 = vst [vmem:[#allocation2] sm:$0xff] %v3131_v45  ;;  %1424 = vst [vmem:[#allocation2 + $0x8] sm:$0xff] %v3131_v45  ;;  %v247_v45 = vmul.f32 %v3313_v46, %v3251_v17  ;;  %v340_v46 = vsel %vm339_vm0, %v3414_v50, %v3418_v20  ;;  %v357_v50 = vsel %vm339_vm0, %v3422_v49, %v3404_v38 }
 0xd92   : > { %v442_v49 = vsel %vm339_vm0, %v3410_v44, %v3447_v37  ;;  %v290_v44 = vmul.f32 %v3270_v24, %v3328_v55  ;;  %v545_v24 = vsel %vm476_vm1, %v3465_v12, %v3467_v13 }
 0xd93   : > { %v3915_v22 = vpop.permute.xlu1 %1348 }
 0xd94   : > { %5167 = vst [vmem:[#allocation97_spill] sm:$0xff] %v3915_v22 }
 0xd97   : > { %v3917_v31 = vpop.permute.xlu1 %1363 }
 0xd98   : > { %5168 = vst [vmem:[#allocation98_spill] sm:$0xff] %v3917_v31 }
 0xd9b   : > { %v3919_v35 = vpop.permute.xlu1 %1365 }
 0xd9c   : > { %5169 = vst [vmem:[#allocation99_spill] sm:$0xff] %v3919_v35  ;;  %v281_v35 = vmul.f32 %v3344_v23, %v3284_v32  ;;  %v374_v23 = vsel %vm339_vm0, %v3406_v40, %v3426_v56  ;;  %v256_v40 = vmul.f32 %v3277_v27, %v3316_v47  ;;  %v477_v27 = vsel %vm476_vm1, %v3453_v62, %v3455_v61 }
 0xd9f   : > { %v3921_v19 = vpop.permute.xlu1 %1380 }
 0xda0   : > { %5170 = vst [vmem:[#allocation100_spill] sm:$0xff] %v3921_v19  ;;  %v2895_v19 = vld [vmem:[%s4963_s2 + $0x4] sm:$0xf] }
 0xdac   : > { %v1391_v51 = vpop.permute.xlu1 %1390 }
 0xdad   : > { %v1393_v5 = vmul.f32 %v1391_v51, %v3334_v57  ;;  %v1394_v36 = vmul.f32 %v1391_v51, %v3363_v41  ;;  %v3935_v51 = vpop.permute.xlu0 %1382 }
 0xdae   : > { %5171 = vst [vmem:[#allocation101_spill] sm:$0xff] %v3935_v51  ;;  %v248_v51 = vmul.f32 %v3316_v47, %v3251_v17  ;;  %v315_v17 = vmul.f32 %v3334_v57, %v3297_v39 }
 0xdaf   : > { %1399 = vrot.lane.b32.xlu1 %v1394_v36, %s3128_s6  ;;  %1397 = vrot.lane.b32.xlu0 %v1393_v5, %s3128_s6 }
 0xdb3   : > { %1407 = vperm.xlu0 %3037, %v3807_v0  }
 0xdb7   : > { %3038 = vset.pattern.permute.xlu0 %v5164_v42  ;;  %v212_v42 = vmul.f32 %v3275_v26, %v3253_v18 }
 0xdb8   : > { %177 = vperm.xlu0 %3038, %v174_v1   ;;  %v213_v1 = vmul.f32 %v3281_v30, %v3253_v18  ;;  %v282_v18 = vmul.f32 %v3328_v55, %v3284_v32 }
 0xdbc   : > { %184 = vperm.xlu0 %3038, %v2895_v19  }
 0xe21   : > { %v3937_v5 = vpop.permute.xlu0 %1397 }
 0xe22   : > { %5172 = vst [vmem:[#allocation102_spill] sm:$0xff] %v3937_v5 }
 0xe2e   : > { %v1408_v0 = vpop.permute.xlu0 %1407 }
 0xe2f   : > { %v1410_v36 = vmul.f32 %v1408_v0, %v3334_v57  ;;  %v1411_v19 = vmul.f32 %v1408_v0, %v3363_v41 }
 0xe31   : > { %1414 = vrot.lane.b32.xlu1 %v1410_v36, %s3128_s6  ;;  %v221_v36 = vmul.f32 %v3263_v21, %v3275_v26  ;;  %v316_v26 = vmul.f32 %v3363_v41, %v3297_v39 }
 0xe33   : > { %v178_v22 = vpop.permute.xlu0 %177 }
 0xe34   : > { %v214_v5 = vadd.f32 %v212_v42, %v178_v22  ;;  %v215_v31 = vadd.f32 %v213_v1, %v178_v22 }
 0xe35   : > { %1416 = vrot.lane.b32.xlu1 %v1411_v19, %s3128_s6 }
 0xe36   : > { %v249_v0 = vadd.f32 %v247_v45, %v214_v5  ;;  %v250_v3 = vadd.f32 %v248_v51, %v215_v31  ;;  %v323_v51 = vmul.f32 %v3307_v43, %v3334_v57  ;;  %v408_v57 = vsel %vm339_vm0, %v3441_v29, %v3443_v33 }
 0xe37   : > { %v185_v22 = vpop.permute.xlu0 %184 }
 0xe38   : > { %v283_v42 = vadd.f32 %v281_v35, %v249_v0  ;;  %v284_v1 = vadd.f32 %v282_v18, %v250_v3  ;;  %v223_v19 = vadd.f32 %v221_v36, %v185_v22  ;;  %v222_v3 = vmul.f32 %v3263_v21, %v3281_v30 }
 0xe3a   : > { %v317_v32 = vadd.f32 %v315_v17, %v283_v42  ;;  %v318_v5 = vadd.f32 %v316_v26, %v284_v1  ;;  %v257_v31 = vadd.f32 %v255_v4, %v223_v19 }
 0xe3c   : > { %v343_v45 = vadd.f32 %v340_v46, %v317_v32  ;;  %v344_v9 = vadd.f32 %v3418_v20, %v318_v5  ;;  %v291_v39 = vadd.f32 %v289_v2, %v257_v31  ;;  %v224_v20 = vadd.f32 %v222_v3, %v185_v22  ;;  %v5173_v46 = vld [vmem:[#allocation11_spill] sm:$0xff] }
 0xe3e   : > { %v377_v35 = vadd.f32 %v374_v23, %v343_v45  ;;  %v378_v4 = vadd.f32 %v3426_v56, %v344_v9  ;;  %v325_v36 = vadd.f32 %v323_v51, %v291_v39  ;;  %v391_v9 = vsel %vm339_vm0, %v3432_v15, %v3438_v28  ;;  %v5174_v51 = vld [vmem:[#allocation15_spill] sm:$0xff]  ;;  %v5176_v23 = vld [vmem:[#allocation13_spill] sm:$0xff] }
 0xe3f   : > { %v258_v47 = vadd.f32 %v256_v40, %v224_v20 }
 0xe40   : > { %v411_v2 = vadd.f32 %v408_v57, %v377_v35  ;;  %v412_v21 = vadd.f32 %v3443_v33, %v378_v4  ;;  %v360_v30 = vadd.f32 %v357_v50, %v325_v36  ;;  %v425_v33 = vsel %vm339_vm0, %v3445_v34, %v3408_v16  ;;  %v5177_v35 = vld [vmem:[#allocation12_spill] sm:$0xff]  ;;  %v5178_v4 = vld [vmem:[#allocation19_spill] sm:$0xff]  ;;  %v5179_v36 = vld [vmem:[#allocation18_spill] sm:$0xff] }
 0xe41   : > { %v511_v34 = vsel %vm476_vm1, %v3416_v52, %v3459_v25  ;;  %v292_v55 = vadd.f32 %v290_v44, %v258_v47  ;;  %v324_v52 = vmul.f32 %v3307_v43, %v3363_v41  ;;  %v614_v43 = vsel %vm613_vm2, %v3477_v7, %v3479_v6  ;;  %v5186_v44 = vld [vmem:[#allocation31_spill] sm:$0xff] }
 0xe42   : > { %v445_v56 = vadd.f32 %v442_v49, %v411_v2  ;;  %v446_v29 = vadd.f32 %v3447_v37, %v412_v21  ;;  %v394_v18 = vadd.f32 %v391_v9, %v360_v30  ;;  %v459_v37 = vsel %vm339_vm0, %v3449_v58, %v3451_v60  ;;  %v5180_v21 = vld [vmem:[#allocation23_spill] sm:$0xff]  ;;  %v5181_v30 = vld [vmem:[#allocation22_spill] sm:$0xff]  ;;  %v5182_v9 = vld [vmem:[#allocation17_spill] sm:$0xff] }
 0xe43   : > { %v326_v41 = vadd.f32 %v324_v52, %v292_v55  ;;  %v631_v7 = vsel %vm613_vm2, %v5177_v35, %v5176_v23  ;;  %v716_v40 = vsel %vm613_vm2, %v5181_v30, %v5180_v21  ;;  %v5183_v49 = vld [vmem:[#allocation16_spill] sm:$0xff]  ;;  %v5190_v55 = vld [vmem:[#allocation35_spill] sm:$0xff]  ;;  %v5205_v30 = vld [vmem:[#allocation54_spill] sm:$0xff] }
 0xe44   : > { %v480_v0 = vadd.f32 %v477_v27, %v445_v56  ;;  %v481_v15 = vadd.f32 %v3455_v61, %v446_v29  ;;  %v428_v17 = vadd.f32 %v425_v33, %v394_v18  ;;  %v494_v61 = vsel %vm476_vm1, %v3457_v63, %v3412_v48  ;;  %v5184_v33 = vld [vmem:[#allocation27_spill] sm:$0xff]  ;;  %v5185_v27 = vld [vmem:[#allocation26_spill] sm:$0xff]  ;;  %v5201_v35 = vld [vmem:[#allocation28_spill] sm:$0xff] }
 0xe45   : > { %v579_v63 = vsel %vm476_vm1, %v3424_v54, %v3471_v10  ;;  %v596_v54 = vsel %vm476_vm1, %v5173_v46, %v3475_v8  ;;  %v361_v50 = vadd.f32 %v3404_v38, %v326_v41  ;;  %v665_v56 = vsel %vm613_vm2, %v5183_v49, %v5182_v9  ;;  %v5206_v49 = vld [vmem:[#allocation33_spill] sm:$0xff] }
 0xe46   : > { %v514_v22 = vadd.f32 %v511_v34, %v480_v0  ;;  %v515_v26 = vadd.f32 %v3459_v25, %v481_v15  ;;  %v462_v62 = vadd.f32 %v459_v37, %v428_v17  ;;  %v528_v25 = vsel %vm476_vm1, %v3461_v59, %v3463_v14  ;;  %v5187_v37 = vld [vmem:[#allocation30_spill] sm:$0xff] }
 0xe47   : > { %v751_v38 = vsel %vm750_vm3, %v5185_v27, %v5184_v33  ;;  %v395_v47 = vadd.f32 %v3438_v28, %v361_v50  ;;  %v785_v34 = vsel %vm750_vm3, %v5187_v37, %v5186_v44  ;;  %v5203_v50 = vld [vmem:[#allocation50_spill] sm:$0xff]  ;;  %v5208_v27 = vld [vmem:[#allocation59_spill] sm:$0xff] }
 0xe48   : > { %v548_v42 = vadd.f32 %v545_v24, %v514_v22  ;;  %v549_v58 = vadd.f32 %v3467_v13, %v515_v26  ;;  %v497_v1 = vadd.f32 %v494_v61, %v462_v62  ;;  %v562_v13 = vsel %vm476_vm1, %v3469_v11, %v3420_v53  ;;  %v5188_v22 = vld [vmem:[#allocation21_spill] sm:$0xff]  ;;  %v5189_v26 = vld [vmem:[#allocation20_spill] sm:$0xff] }
 0xe49   : > { %v699_v62 = vsel %vm613_vm2, %v5189_v26, %v5188_v22  ;;  %v429_v28 = vadd.f32 %v3408_v16, %v395_v47  ;;  %v5213_v26 = vld [vmem:[#allocation36_spill] sm:$0xff] }
 0xe4a   : > { %v582_v19 = vadd.f32 %v579_v63, %v548_v42  ;;  %v583_v12 = vadd.f32 %v3471_v10, %v549_v58  ;;  %v531_v32 = vadd.f32 %v528_v25, %v497_v1  ;;  %v5175_v10 = vld [vmem:[#allocation14_spill] sm:$0xff]  ;;  %v5192_v63 = vld [vmem:[#allocation39_spill] sm:$0xff] }
 0xe4b   : > { %v648_v45 = vsel %vm613_vm2, %v5175_v10, %v5174_v51  ;;  %v5191_v42 = vld [vmem:[#allocation34_spill] sm:$0xff]  ;;  %v463_v46 = vadd.f32 %v3451_v60, %v429_v28 }
 0xe4c   : > { %v617_v5 = vadd.f32 %v614_v43, %v582_v19  ;;  %v618_v59 = vadd.f32 %v3479_v6, %v583_v12  ;;  %v565_v31 = vadd.f32 %v562_v13, %v531_v32  ;;  %v682_v6 = vsel %vm613_vm2, %v5179_v36, %v5178_v4  ;;  %v5193_v19 = vld [vmem:[#allocation38_spill] sm:$0xff]  ;;  %v5194_v32 = vld [vmem:[#allocation25_spill] sm:$0xff]  ;;  %v5195_v13 = vld [vmem:[#allocation24_spill] sm:$0xff] }
 0xe4d   : > { %v819_v58 = vsel %vm750_vm3, %v5191_v42, %v5190_v55  ;;  %v853_v12 = vsel %vm750_vm3, %v5193_v19, %v5192_v63  ;;  %v733_v43 = vsel %vm613_vm2, %v5195_v13, %v5194_v32  ;;  %v498_v60 = vadd.f32 %v3412_v48, %v463_v46  ;;  %v5215_v42 = vld [vmem:[#allocation66_spill] sm:$0xff]  ;;  %v5218_v19 = vld [vmem:[#allocation41_spill] sm:$0xff] }
 0xe4e   : > { %v651_v39 = vadd.f32 %v648_v45, %v617_v5  ;;  %v652_v11 = vadd.f32 %v5174_v51, %v618_v59  ;;  %v599_v3 = vadd.f32 %v596_v54, %v565_v31  ;;  %v5196_v59 = vld [vmem:[#allocation43_spill] sm:$0xff]  ;;  %v5197_v31 = vld [vmem:[#allocation42_spill] sm:$0xff]  ;;  %vm1467_vm2 = vcmask 1027968  }
 0xe4f   : > { %v888_v16 = vsel %vm887_vm4, %v5197_v31, %v5196_v59  ;;  %v5198_v45 = vld [vmem:[#allocation47_spill] sm:$0xff]  ;;  %v532_v48 = vadd.f32 %v3463_v14, %v498_v60 }
 0xe50   : > { %v685_v57 = vadd.f32 %v682_v6, %v651_v39  ;;  %v686_v20 = vadd.f32 %v5178_v4, %v652_v11  ;;  %v634_v2 = vadd.f32 %v631_v7, %v599_v3  ;;  %v5199_v39 = vld [vmem:[#allocation46_spill] sm:$0xff]  ;;  %v5200_v3 = vld [vmem:[#allocation29_spill] sm:$0xff]  ;;  %v5202_v6 = vld [vmem:[#allocation51_spill] sm:$0xff] }
 0xe51   : > { %v922_v11 = vsel %vm887_vm4, %v5199_v39, %v5198_v45  ;;  %v768_v7 = vsel %vm750_vm3, %v5201_v35, %v5200_v3  ;;  %v566_v28 = vadd.f32 %v3420_v53, %v532_v48  ;;  %v5225_v39 = vld [vmem:[#allocation44_spill] sm:$0xff]  ;;  %v5228_v60 = vld [vmem:[#allocation87_spill] sm:$0xff] }
 0xe52   : > { %v719_v29 = vadd.f32 %v716_v40, %v685_v57  ;;  %v720_v18 = vadd.f32 %v5180_v21, %v686_v20  ;;  %v668_v0 = vadd.f32 %v665_v56, %v634_v2  ;;  %v956_v57 = vsel %vm887_vm4, %v5203_v50, %v5202_v6  ;;  %v5204_v21 = vld [vmem:[#allocation55_spill] sm:$0xff]  ;;  %v5207_v56 = vld [vmem:[#allocation32_spill] sm:$0xff] }
 0xe53   : > { %v990_v40 = vsel %vm887_vm4, %v5205_v30, %v5204_v21  ;;  %v600_v53 = vadd.f32 %v3475_v8, %v566_v28  ;;  %v5231_v30 = vld [vmem:[#allocation48_spill] sm:$0xff]  ;;  %v5234_v48 = vld [vmem:[#allocation95_spill] sm:$0xff] }
 0xe54   : > { %v754_v15 = vadd.f32 %v751_v38, %v719_v29  ;;  %v755_v17 = vadd.f32 %v5184_v33, %v720_v18  ;;  %v702_v1 = vadd.f32 %v699_v62, %v668_v0  ;;  %v802_v29 = vsel %vm750_vm3, %v5207_v56, %v5206_v49  ;;  %v5209_v38 = vld [vmem:[#allocation58_spill] sm:$0xff] }
 0xe55   : > { %v1025_v47 = vsel %vm1024_vm5, %v5209_v38, %v5208_v27  ;;  %v635_v50 = vadd.f32 %v5176_v23, %v600_v53 }
 0xe56   : > { %v788_v61 = vadd.f32 %v785_v34, %v754_v15  ;;  %v789_v24 = vadd.f32 %v5186_v44, %v755_v17  ;;  %v736_v54 = vadd.f32 %v733_v43, %v702_v1  ;;  %v5210_v17 = vld [vmem:[#allocation63_spill] sm:$0xff]  ;;  %v5211_v44 = vld [vmem:[#allocation62_spill] sm:$0xff]  ;;  %v5212_v34 = vld [vmem:[#allocation37_spill] sm:$0xff] }
 0xe57   : > { %v1059_v37 = vsel %vm1024_vm5, %v5211_v44, %v5210_v17  ;;  %v836_v62 = vsel %vm750_vm3, %v5213_v26, %v5212_v34  ;;  %v669_v23 = vadd.f32 %v5182_v9, %v635_v50  ;;  %v5237_v44 = vld [vmem:[#allocation52_spill] sm:$0xff]  ;;  %v1400_v26 = vpop.permute.xlu1 %1399  ;;  %v5249_v50 = vld [vmem:[#allocation73_spill] sm:$0xff] }
 0xe58   : > { %v822_v52 = vadd.f32 %v819_v58, %v788_v61  ;;  %v823_v25 = vadd.f32 %v5190_v55, %v789_v24  ;;  %v771_v20 = vadd.f32 %v768_v7, %v736_v54  ;;  %v5214_v55 = vld [vmem:[#allocation67_spill] sm:$0xff] }
 0xe59   : > { %v1093_v58 = vsel %vm1024_vm5, %v5215_v42, %v5214_v55  ;;  %v5222_v54 = vld [vmem:[#allocation79_spill] sm:$0xff]  ;;  %v703_v9 = vadd.f32 %v5188_v22, %v669_v23  ;;  %v5243_v22 = vld [vmem:[#allocation61_spill] sm:$0xff] }
 0xe5a   : > { %v856_v41 = vadd.f32 %v853_v12, %v822_v52  ;;  %v857_v5 = vadd.f32 %v5192_v63, %v823_v25  ;;  %v805_v0 = vadd.f32 %v802_v29, %v771_v20  ;;  %v5216_v52 = vld [vmem:[#allocation71_spill] sm:$0xff]  ;;  %v5217_v25 = vld [vmem:[#allocation70_spill] sm:$0xff]  ;;  %v5219_v12 = vld [vmem:[#allocation40_spill] sm:$0xff] }
 0xe5b   : > { %v1127_v63 = vsel %vm1024_vm5, %v5217_v25, %v5216_v52  ;;  %v870_v13 = vsel %vm750_vm3, %v5219_v12, %v5218_v19  ;;  %v5229_v20 = vld [vmem:[#allocation86_spill] sm:$0xff]  ;;  %v5241_v25 = vld [vmem:[#allocation57_spill] sm:$0xff]  ;;  %vm1475_vm3 = vcmask 1044464  }
 0xe5c   : > { %v891_v51 = vadd.f32 %v888_v16, %v856_v41  ;;  %v892_v10 = vadd.f32 %v5196_v59, %v857_v5  ;;  %v839_v14 = vadd.f32 %v836_v62, %v805_v0  ;;  %v5220_v5 = vld [vmem:[#allocation75_spill] sm:$0xff]  ;;  %v5221_v59 = vld [vmem:[#allocation74_spill] sm:$0xff] }
 0xe5d   : > { %v1162_v31 = vsel %vm1161_vm6, %v5221_v59, %v5220_v5  ;;  %v5235_v0 = vld [vmem:[#allocation94_spill] sm:$0xff]  ;;  %v5244_v59 = vld [vmem:[#allocation60_spill] sm:$0xff] }
 0xe5e   : > { %v925_v4 = vadd.f32 %v922_v11, %v891_v51  ;;  %v926_v36 = vadd.f32 %v5198_v45, %v892_v10  ;;  %v873_v16 = vadd.f32 %v870_v13, %v839_v14  ;;  %v5223_v51 = vld [vmem:[#allocation78_spill] sm:$0xff]  ;;  %v5224_v45 = vld [vmem:[#allocation45_spill] sm:$0xff] }
 0xe5f   : > { %v1196_v10 = vsel %vm1161_vm6, %v5223_v51, %v5222_v54  ;;  %v905_v11 = vsel %vm887_vm4, %v5225_v39, %v5224_v45  ;;  %v5240_v14 = vld [vmem:[#allocation102_spill] sm:$0xff]  ;;  %v5245_v51 = vld [vmem:[#allocation65_spill] sm:$0xff] }
 0xe60   : > { %v959_v2 = vadd.f32 %v956_v57, %v925_v4  ;;  %v960_v33 = vadd.f32 %v5202_v6, %v926_v36  ;;  %v5226_v4 = vld [vmem:[#allocation83_spill] sm:$0xff]  ;;  %v5227_v36 = vld [vmem:[#allocation82_spill] sm:$0xff]  ;;  %v908_v8 = vadd.f32 %v905_v11, %v873_v16 }
 0xe61   : > { %v1230_v6 = vsel %vm1161_vm6, %v5227_v36, %v5226_v4 }
 0xe62   : > { %v993_v18 = vadd.f32 %v990_v40, %v959_v2  ;;  %v994_v24 = vadd.f32 %v5204_v21, %v960_v33  ;;  %v1264_v2 = vsel %vm1161_vm6, %v5229_v20, %v5228_v60  ;;  %v5230_v21 = vld [vmem:[#allocation49_spill] sm:$0xff]  ;;  %v5233_v33 = vld [vmem:[#allocation90_spill] sm:$0xff] }
 0xe63   : > { %v939_v40 = vsel %vm887_vm4, %v5231_v30, %v5230_v21  ;;  %v5252_v30 = vld [vmem:[#allocation76_spill] sm:$0xff] }
 0xe64   : > { %v1028_v15 = vadd.f32 %v1025_v47, %v993_v18  ;;  %v1029_v41 = vadd.f32 %v5208_v27, %v994_v24  ;;  %v5232_v18 = vld [vmem:[#allocation91_spill] sm:$0xff]  ;;  %v942_v38 = vadd.f32 %v939_v40, %v908_v8  ;;  %v5250_v8 = vld [vmem:[#allocation72_spill] sm:$0xff] }
 0xe65   : > { %v1299_v27 = vsel %vm1298_vm7, %v5233_v33, %v5232_v18  ;;  %v5238_v24 = vld [vmem:[#allocation99_spill] sm:$0xff]  ;;  %v5254_v33 = vld [vmem:[#allocation80_spill] sm:$0xff] }
 0xe66   : > { %v1062_v61 = vadd.f32 %v1059_v37, %v1028_v15  ;;  %v1063_v7 = vadd.f32 %v5210_v17, %v1029_v41  ;;  %v1333_v15 = vsel %vm1298_vm7, %v5235_v0, %v5234_v48  ;;  %v5236_v17 = vld [vmem:[#allocation53_spill] sm:$0xff] }
 0xe67   : > { %v973_v37 = vsel %vm887_vm4, %v5237_v44, %v5236_v17  ;;  %v5257_v44 = vld [vmem:[#allocation89_spill] sm:$0xff] }
 0xe68   : > { %v1096_v1 = vadd.f32 %v1093_v58, %v1062_v61  ;;  %v1097_v29 = vadd.f32 %v5214_v55, %v1063_v7  ;;  %v5239_v55 = vld [vmem:[#allocation98_spill] sm:$0xff]  ;;  %v976_v58 = vadd.f32 %v973_v37, %v942_v38  ;;  %v5248_v7 = vld [vmem:[#allocation68_spill] sm:$0xff]  ;;  %v5255_v38 = vld [vmem:[#allocation85_spill] sm:$0xff] }
 0xe69   : > { %v1367_v42 = vsel %vm1298_vm7, %v5239_v55, %v5238_v24  ;;  %v5258_v37 = vld [vmem:[#allocation88_spill] sm:$0xff] }
 0xe6a   : > { %v1130_v43 = vadd.f32 %v1127_v63, %v1096_v1  ;;  %v1131_v61 = vadd.f32 %v5216_v52, %v1097_v29  ;;  %v1401_v1 = vsel %vm1298_vm7, %v5240_v14, %v1400_v26  ;;  %v5242_v63 = vld [vmem:[#allocation56_spill] sm:$0xff]  ;;  %v737_v52 = vadd.f32 %v5194_v32, %v703_v9  ;;  %v5253_v29 = vld [vmem:[#allocation81_spill] sm:$0xff] }
 0xe6b   : > { %v1007_v12 = vsel %vm887_vm4, %v5242_v63, %v5241_v25  ;;  %v5260_v55 = vld [vmem:[#allocation92_spill] sm:$0xff]  ;;  %v5263_v63 = vld [vmem:[#allocation101_spill] sm:$0xff]  ;;  %vm1476_vm4 = vcmask 97284  }
 0xe6c   : > { %v1165_v46 = vadd.f32 %v1162_v31, %v1130_v43  ;;  %v1166_v43 = vadd.f32 %v5220_v5, %v1131_v61  ;;  %v1010_v41 = vadd.f32 %v1007_v12, %v976_v58  ;;  %v1042_v31 = vsel %vm1024_vm5, %v5244_v59, %v5243_v22  ;;  %v5262_v58 = vld [vmem:[#allocation96_spill] sm:$0xff] }
 0xe6d   : > { %v772_v16 = vadd.f32 %v5200_v3, %v737_v52  ;;  %v5264_v12 = vld [vmem:[#allocation100_spill] sm:$0xff] }
 0xe6e   : > { %v1199_v35 = vadd.f32 %v1196_v10, %v1165_v46  ;;  %v1200_v53 = vadd.f32 %v5222_v54, %v1166_v43  ;;  %v1045_v46 = vadd.f32 %v1042_v31, %v1010_v41  ;;  %v5246_v10 = vld [vmem:[#allocation64_spill] sm:$0xff] }
 0xe6f   : > { %v1076_v5 = vsel %vm1024_vm5, %v5246_v10, %v5245_v51  ;;  %v806_v39 = vadd.f32 %v5206_v49, %v772_v16  ;;  %v5265_v10 = vmov 1  }
 0xe70   : > { %v1233_v57 = vadd.f32 %v1230_v6, %v1199_v35  ;;  %v1234_v32 = vadd.f32 %v5226_v4, %v1200_v53  ;;  %v1079_v11 = vadd.f32 %v1076_v5, %v1045_v46  ;;  %v5247_v35 = vld [vmem:[#allocation69_spill] sm:$0xff]  ;;  %v1144_v4 = vsel %vm1024_vm5, %v5250_v8, %v5249_v50  ;;  %v2897_v53 = vld [vmem:[%s4963_s2 + $0x8] sm:$0xf] }
 0xe71   : > { %v1110_v54 = vsel %vm1024_vm5, %v5248_v7, %v5247_v35  ;;  %v840_v36 = vadd.f32 %v5212_v34, %v806_v39  ;;  %v4228_v46 = vld [vmem:[%s4962_s1 + $0x8] sm:$0xf]  ;;  %vm1472_vm5 = vcmask 506880  }
 0xe72   : > { %v1267_v56 = vadd.f32 %v1264_v2, %v1233_v57  ;;  %v1268_v3 = vadd.f32 %v5228_v60, %v1234_v32  ;;  %v1113_v6 = vadd.f32 %v1110_v54, %v1079_v11  ;;  %v5251_v2 = vld [vmem:[#allocation77_spill] sm:$0xff]  ;;  %v5266_v32 = vmov 2  }
 0xe73   : > { %v874_v57 = vadd.f32 %v5218_v19, %v840_v36  ;;  %v1179_v60 = vsel %vm1161_vm6, %v5252_v30, %v5251_v2  ;;  %v5267_v11 = vmov 4   ;;  %v5268_v54 = vmov 5  }
 0xe74   : > { %v1302_v47 = vadd.f32 %v1299_v27, %v1267_v56  ;;  %v1303_v49 = vadd.f32 %v5232_v18, %v1268_v3  ;;  %v1147_v20 = vadd.f32 %v1144_v4, %v1113_v6  ;;  %v1213_v18 = vsel %vm1161_vm6, %v5254_v33, %v5253_v29 }
 0xe75   : > { %v909_v40 = vadd.f32 %v5224_v45, %v874_v57  ;;  %v5269_v6 = vmov 3  }
 0xe76   : > { %v1336_v62 = vadd.f32 %v1333_v15, %v1302_v47  ;;  %v1337_v34 = vadd.f32 %v5234_v48, %v1303_v49  ;;  %v1182_v56 = vadd.f32 %v1179_v60, %v1147_v20  ;;  %v5256_v47 = vld [vmem:[#allocation84_spill] sm:$0xff] }
 0xe77   : > { %v943_v27 = vadd.f32 %v5230_v21, %v909_v40  ;;  %v1247_v48 = vsel %vm1161_vm6, %v5256_v47, %v5255_v38 }
 0xe78   : > { %v1370_v28 = vadd.f32 %v1367_v42, %v1336_v62  ;;  %v1371_v19 = vadd.f32 %v5238_v24, %v1337_v34  ;;  %v1216_v23 = vadd.f32 %v1213_v18, %v1182_v56  ;;  %v1281_v62 = vsel %vm1161_vm6, %v5258_v37, %v5257_v44  ;;  %v5259_v24 = vld [vmem:[#allocation93_spill] sm:$0xff]  ;;  %vm1477_vm6 = vmor %vm1476_vm4, %vm1475_vm3 }
 0xe79   : > { %v977_v0 = vadd.f32 %v5236_v17, %v943_v27  ;;  %v1316_v42 = vsel %vm1298_vm7, %v5260_v55, %v5259_v24  ;;  %v5261_v17 = vld [vmem:[#allocation97_spill] sm:$0xff]  ;;  %vm1519_vm3 = vcmask 1011568  }
 0xe7a   : > { %v1404_v13 = vadd.f32 %v1401_v1, %v1370_v28  ;;  %v1405_v45 = vadd.f32 %v1400_v26, %v1371_v19  ;;  %v1250_v15 = vadd.f32 %v1247_v48, %v1216_v23  ;;  %v1350_v28 = vsel %vm1298_vm7, %v5262_v58, %v5261_v17  ;;  %v5273_v58 = vld [vmem:[#allocation3_spill] sm:$0xff] }
 0xe7b   : > { %v1011_v61 = vadd.f32 %v5241_v25, %v977_v0 }
 0xe7c   : > { %1434 = vrot.lane.b32.xlu1 %v1404_v13, %s3132_s11  ;;  %1426 = vst.msk [vmem:[#allocation2] sm:$0xf] %vm1425_vm8, %v1404_v13  ;;  %v1284_v21 = vadd.f32 %v1281_v62, %v1250_v15  ;;  %s3150_s11 = smov 86   ;;  %vm1487_vm8 = vcmask 322768  }
 0xe7d   : > { %v1046_v26 = vadd.f32 %v5243_v22, %v1011_v61 }
 0xe7e   : > { %v1319_v9 = vadd.f32 %v1316_v42, %v1284_v21 }
 0xe7f   : > { %v1080_v1 = vadd.f32 %v5245_v51, %v1046_v26 }
 0xe80   : > { %1444 = vrot.lane.b32.xlu1 %v1404_v13, %s3133_s14  ;;  %v1353_v25 = vadd.f32 %v1350_v28, %v1319_v9  ;;  %s3151_s14 = smov 98   ;;  %v5272_v9 = vld [vmem:[#allocation4_spill] sm:$0xff] }
 0xe81   : > { %v1114_v52 = vadd.f32 %v5247_v35, %v1080_v1 }
 0xe83   : > { %v1148_v31 = vadd.f32 %v5249_v50, %v1114_v52  ;;  %v5270_v50 = vmov 6  }
 0xe84   : > { %1454 = vrot.lane.b32.xlu1 %v1404_v13, %s3134_s15  ;;  %s3152_s15 = smov 122  }
 0xe85   : > { %v1183_v16 = vadd.f32 %v5251_v2, %v1148_v31 }
 0xe87   : > { %v1217_v51 = vadd.f32 %v5253_v29, %v1183_v16 }
 0xe88   : > { %1464 = vrot.lane.b32.xlu1 %v1404_v13, %s3135_s16  ;;  %s3153_s16 = smov 6  }
 0xe89   : > { %v1251_v5 = vadd.f32 %v5255_v38, %v1217_v51 }
 0xe8b   : > { %v1285_v39 = vadd.f32 %v5257_v44, %v1251_v5 }
 0xe8c   : > { %1479 = vrot.lane.b32.xlu1 %v1404_v13, %s3136_s17  ;;  %s3154_s17 = smov 18  }
 0xe8d   : > { %v1320_v35 = vadd.f32 %v5259_v24, %v1285_v39 }
 0xe8f   : > { %v1354_v7 = vadd.f32 %v5261_v17, %v1320_v35 }
 0xe90   : > { %1489 = vrot.lane.b32.xlu1 %v1404_v13, %s3137_s18 }
 0xe91   : > { %v1388_v3 = vadd.f32 %v5263_v63, %v1354_v7  ;;  %v5277_v7 = vld [vmem:[#allocation6_spill] sm:$0xff] }
 0xe94   : > { %1499 = vrot.lane.b32.xlu1 %v1404_v13, %s3138_s19  ;;  %v1384_v13 = vsel %vm1298_vm7, %v5264_v12, %v5263_v63  ;;  %s3155_s19 = smov 30  }
 0xe95   : > { %v1387_v41 = vadd.f32 %v1384_v13, %v1353_v25 }
 0xe98   : > { %1510 = vrot.lane.b32.xlu1 %v1405_v45, %s3118_s27  ;;  %s3143_s27 = smov 14  }
 0xe9c   : > { %1521 = vrot.lane.b32.xlu1 %v1405_v45, %s3139_s20  ;;  %s3156_s20 = smov 42  }
 0xea0   : > { %1536 = vrot.lane.b32.xlu1 %v1405_v45, %s3140_s21 }
 0xea3   : > { %v1415_v14 = vpop.permute.xlu1 %1414 }
 0xea4   : > { %1546 = vrot.lane.b32.xlu1 %v1405_v45, %s3141_s24  ;;  %s3159_s24 = smov 71  }
 0xea7   : > { %v1417_v43 = vpop.permute.xlu1 %1416 }
 0xea8   : > { %v1418_v22 = vsel %vm1298_vm7, %v1415_v14, %v1417_v43  ;;  %1556 = vrot.lane.b32.xlu1 %v1405_v45, %s3142_s25  ;;  %v1422_v36 = vadd.f32 %v1417_v43, %v1388_v3  ;;  %vm1482_vm7 = vcmask 207968   ;;  %s2901_s25 = smul.u32 12, %s5337_s13 }
 0xea9   : > { %v1421_v59 = vadd.f32 %v1418_v22, %v1387_v41 }
 0xeaa   : > { %s170_s29 = scalar_lea.vmem %s4964_s3, %s2901_s25 }
 0xeab   : > { %1428 = vrot.lane.b32.xlu0 %v1421_v59, %s3143_s27 }
 0xeac   : > { %1566 = vrot.lane.b32.xlu1 %v1405_v45, %s3144_s28 }
 0xeaf   : > { %1439 = vrot.lane.b32.xlu0 %v1421_v59, %s3145_s4 }
 0xeb0   : > { %1587 = vperm.xlu1 %3039, %v2897_v53  }
 0xeb3   : > { %1449 = vrot.lane.b32.xlu0 %v1421_v59, %s3146_s7 }
 0xeb4   : > { %3040 = vset.pattern.permute.xlu1 %v5265_v10 }
 0xeb5   : > { %1633 = vperm.xlu1 %3040, %v4228_v46  }
 0xeb7   : > { %1459 = vrot.lane.b32.xlu0 %v1421_v59, %s3147_s8 }
 0xeb9   : > { %3041 = vset.pattern.permute.xlu1 %v5266_v32  ;;  %v5274_v32 = vmov 24  }
 0xeba   : > { %1670 = vperm.xlu1 %3041, %v4228_v46  }
 0xebb   : > { %1469 = vrot.lane.b32.xlu0 %v1421_v59, %s3148_s9 }
 0xebe   : > { %3043 = vset.pattern.permute.xlu1 %v5267_v11  ;;  %v5276_v11 = vld [vmem:[#allocation5_spill] sm:$0xff] }
 0xebf   : > { %1484 = vrot.lane.b32.xlu0 %v1421_v59, %s3149_s10  ;;  %1746 = vperm.xlu1 %3043, %v4228_v46  }
 0xec3   : > { %1494 = vrot.lane.b32.xlu0 %v1421_v59, %s3150_s11  ;;  %3044 = vset.pattern.permute.xlu1 %v5268_v54 }
 0xec7   : > { %1504 = vrot.lane.b32.xlu0 %v1421_v59, %s3151_s14 }
 0xecb   : > { %1516 = vrot.lane.b32.xlu0 %v1422_v36, %s3113_s26 }
 0xecf   : > { %1531 = vrot.lane.b32.xlu0 %v1422_v36, %s3152_s15 }
 0xed3   : > { %1541 = vrot.lane.b32.xlu0 %v1422_v36, %s3153_s16 }
 0xed7   : > { %1551 = vrot.lane.b32.xlu0 %v1422_v36, %s3154_s17 }
 0xedb   : > { %1561 = vrot.lane.b32.xlu0 %v1422_v36, %s3155_s19 }
 0xedf   : > { %1571 = vrot.lane.b32.xlu0 %v1422_v36, %s3156_s20 }
 0xee3   : > { %1594 = vperm.xlu0 %3038, %v4228_v46  }
 0xee7   : > { %3042 = vset.pattern.permute.xlu0 %v5269_v6 }
 0xee8   : > { %1707 = vperm.xlu0 %3042, %v4228_v46  }
 0xeec   : > { %3045 = vset.pattern.permute.xlu0 %v5270_v50 }
 0xeee   : > { %v1435_v8 = vpop.permute.xlu1 %1434 }
 0xef2   : > { %v1445_v4 = vpop.permute.xlu1 %1444 }
 0xef6   : > { %v1455_v49 = vpop.permute.xlu1 %1454 }
 0xefa   : > { %v1465_v57 = vpop.permute.xlu1 %1464 }
 0xefe   : > { %v1480_v20 = vpop.permute.xlu1 %1479 }
 0xf02   : > { %v1490_v2 = vpop.permute.xlu1 %1489 }
 0xf06   : > { %v1500_v30 = vpop.permute.xlu1 %1499 }
 0xf0a   : > { %v1511_v60 = vpop.permute.xlu1 %1510 }
 0xf0e   : > { %v1522_v34 = vpop.permute.xlu1 %1521 }
 0xf0f   : > { %v1523_v37 = vrot.slane %v1522_v34, 4 }
 0xf12   : > { %v1537_v56 = vpop.permute.xlu1 %1536 }
 0xf16   : > { %v1547_v18 = vpop.permute.xlu1 %1546 }
 0xf1a   : > { %v1557_v27 = vpop.permute.xlu1 %1556 }
 0xf1d   : > { %v1429_v40 = vpop.permute.xlu0 %1428 }
 0xf1e   : > { %1432 = vst.msk [vmem:[#allocation2] sm:$0xf] %vm1431_vm9, %v1429_v40  ;;  %vm1492_vm9 = vcmask 437568   ;;  %v1567_v45 = vpop.permute.xlu1 %1566 }
 0xf1f   : > { %1438 = vst.msk [vmem:[#allocation2] sm:$0xf] %vm1437_vm10, %v1435_v8  ;;  %vm1497_vm10 = vcmask 552368  }
 0xf21   : > { %v1440_v29 = vpop.permute.xlu0 %1439 }
 0xf22   : > { %1443 = vst.msk [vmem:[#allocation2] sm:$0xf] %vm1442_vm11, %v1440_v29  ;;  %vm1502_vm11 = vcmask 667168  }
 0xf23   : > { %1448 = vst.msk [vmem:[#allocation2] sm:$0xf] %vm1447_vm12, %v1445_v4  ;;  %vm1507_vm12 = vcmask 781968  }
 0xf25   : > { %v1450_v33 = vpop.permute.xlu0 %1449 }
 0xf26   : > { %1453 = vst.msk [vmem:[#allocation2] sm:$0xf] %vm1452_vm13, %v1450_v33  ;;  %vm1513_vm13 = vcmask 896768  }
 0xf27   : > { %1458 = vst.msk [vmem:[#allocation2] sm:$0xf] %vm1457_vm14, %v1455_v49  ;;  %vm1527_vm14 = vcmask 1044448  }
 0xf29   : > { %v1460_v19 = vpop.permute.xlu0 %1459 }
 0xf2a   : > { %1463 = vst.msk [vmem:[#allocation2] sm:$0xf] %vm1462_vm15, %v1460_v19  ;;  %vm1528_vm15 = vcmask 80900   ;;  %v5281_v19 = vld [vmem:[#allocation9_spill] sm:$0xff] }
 0xf2b   : > { %1468 = vst.msk [vmem:[#allocation2] sm:$0xf] %vm1467_vm2, %v1465_v57  ;;  %v4249_v15 = vpop.permute.xlu1 %1587  ;;  %vm1524_vm2 = vcmask 883712   ;;  %vm1529_vm4 = vmor %vm1528_vm15, %vm1527_vm14  ;;  %vm1578_vm14 = vcmask 64516   ;;  %vm1574_vm15 = vcmask 343040  }
 0xf2c   : > { %v1525_v21 = vsel %vm1524_vm2, %v1523_v37, %v1522_v34  ;;  %v5278_v34 = vmov 7  }
 0xf2d   : > { %v1470_v23 = vpop.permute.xlu0 %1469 }
 0xf2e   : > { %v1471_v38 = vrot.slane %v1470_v23, 4 }
 0xf30   : > { %v1473_v47 = vsel %vm1472_vm5, %v1471_v38, %v1470_v23  ;;  %v4251_v61 = vpop.permute.xlu1 %1633  ;;  %vm1534_vm5 = vcmask 191568  }
 0xf31   : > { %v1485_v48 = vpop.permute.xlu0 %1484  ;;  %1478 = vst.msk [vmem:[#allocation2] sm:$0xff] %vm1477_vm6, %v1473_v47  ;;  %5271 = vst [vmem:[#allocation11_spill] sm:$0xff] %v4251_v61  ;;  %vm1539_vm6 = vcmask 306368   ;;  %v5282_v47 = vld [vmem:[#allocation7_spill] sm:$0xff] }
 0xf32   : > { %1483 = vst.msk [vmem:[#allocation2 + $0x4] sm:$0xf] %vm1482_vm7, %v1480_v20  ;;  %vm1544_vm7 = vcmask 421168  }
 0xf33   : > { %1488 = vst.msk [vmem:[#allocation2 + $0x4] sm:$0xf] %vm1487_vm8, %v1485_v48  ;;  %vm1549_vm8 = vcmask 535968  }
 0xf34   : > { %1493 = vst.msk [vmem:[#allocation2 + $0x4] sm:$0xf] %vm1492_vm9, %v1490_v2  ;;  %vm1554_vm9 = vcmask 650768  }
 0xf35   : > { %v1495_v0 = vpop.permute.xlu0 %1494  ;;  %v4253_v55 = vpop.permute.xlu1 %1670 }
 0xf36   : > { %1498 = vst.msk [vmem:[#allocation2 + $0x4] sm:$0xf] %vm1497_vm10, %v1495_v0  ;;  %vm1559_vm10 = vcmask 765568  }
 0xf37   : > { %1503 = vst.msk [vmem:[#allocation2 + $0x4] sm:$0xf] %vm1502_vm11, %v1500_v30  ;;  %vm1564_vm11 = vcmask 880368  }
 0xf39   : > { %v1505_v44 = vpop.permute.xlu0 %1504 }
 0xf3a   : > { %1508 = vst.msk [vmem:[#allocation2 + $0x4] sm:$0xf] %vm1507_vm12, %v1505_v44  ;;  %v1747_v1 = vpop.permute.xlu1 %1746  ;;  %vm1569_vm12 = vcmask 995168  }
 0xf3b   : > { %1514 = vst.msk [vmem:[#allocation2 + $0x4] sm:$0xf] %vm1513_vm13, %v1511_v60  ;;  %vm1577_vm13 = vcmask 1044432  }
 0xf3c   : > { %vm1579_vm2 = vmor %vm1578_vm14, %vm1577_vm13 }
 0xf3d   : > { %v1517_v62 = vpop.permute.xlu0 %1516 }
 0xf3e   : > { %1520 = vst.msk [vmem:[#allocation2 + $0x4] sm:$0xf] %vm1519_vm3, %v1517_v62  ;;  %vm2143_vm3 = vcmask 818176  }
 0xf3f   : > { %1530 = vst.msk [vmem:[#allocation2 + $0x4] sm:$0xff] %vm1529_vm4, %v1525_v21  ;;  %vm2260_vm4 = vcmask 809984  }
 0xf41   : > { %v1532_v24 = vpop.permute.xlu0 %1531 }
 0xf42   : > { %1535 = vst.msk [vmem:[#allocation2 + $0x8] sm:$0xf] %vm1534_vm5, %v1532_v24  ;;  %vm2611_vm5 = vcmask 580608  }
 0xf43   : > { %1540 = vst.msk [vmem:[#allocation2 + $0x8] sm:$0xf] %vm1539_vm6, %v1537_v56  ;;  %vm2728_vm6 = vcmask 572416  }
 0xf45   : > { %v1542_v42 = vpop.permute.xlu0 %1541 }
 0xf46   : > { %v4255_v26 = vld [vmem:[#allocation2] sm:$0xff]  ;;  %1545 = vst.msk [vmem:[#allocation2 + $0x8] sm:$0xf] %vm1544_vm7, %v1542_v42 }
 0xf47   : > { %1550 = vst.msk [vmem:[#allocation2 + $0x8] sm:$0xf] %vm1549_vm8, %v1547_v18  ;;  %v1758_v17 = vrot.slane %v4255_v26, %v5272_v9  ;;  %v1754_v28 = vrot.slane %v4255_v26, %v5273_v58  ;;  %v1639_v35 = vrot.slane %v4255_v26, %v5276_v11  ;;  %v1643_v54 = vrot.slane %v4255_v26, %v5277_v7 }
 0xf48   : > { %v1680_v48 = vrot.slane %v4255_v26, %v5282_v47 }
 0xf49   : > { %v1552_v14 = vpop.permute.xlu0 %1551  ;;  %v4262_v25 = vrot.slane %v1758_v17, %v5273_v58  ;;  %v4265_v63 = vrot.slane %v1754_v28, %v5273_v58  ;;  %v4298_v36 = vrot.slane %v1639_v35, %v5276_v11  ;;  %v4301_v6 = vrot.slane %v1643_v54, %v5276_v11 }
 0xf4a   : > { %1555 = vst.msk [vmem:[#allocation2 + $0x8] sm:$0xf] %vm1554_vm9, %v1552_v14  ;;  %v4350_v21 = vrot.slane %v1680_v48, %v5281_v19  ;;  %v5286_v28 = vmov 8   ;;  %v5287_v14 = vld [vmem:[#allocation8_spill] sm:$0xff]  ;;  %v5289_v54 = vmov 9  }
 0xf4b   : > { %1560 = vst.msk [vmem:[#allocation2 + $0x8] sm:$0xf] %vm1559_vm10, %v1557_v27  ;;  %v1788_v12 = vmul.f32 %v4262_v25, %v1747_v1  ;;  %v1787_v13 = vmul.f32 %v4265_v63, %v1747_v1  ;;  %v1676_v27 = vrot.slane %v4255_v26, %v5281_v19 }
 0xf4d   : > { %v1562_v43 = vpop.permute.xlu0 %1561  ;;  %1797 = vrot.lane.b32.xlu0 %v1788_v12, %s3100_s22  ;;  %1795 = vrot.lane.b32.xlu1 %v1787_v13, %s3100_s22 }
 0xf4e   : > { %1565 = vst.msk [vmem:[#allocation2 + $0x8] sm:$0xf] %vm1564_vm11, %v1562_v43  ;;  %v5288_v43 = vld [vmem:[#allocation10_spill] sm:$0xff] }
 0xf4f   : > { %1570 = vst.msk [vmem:[#allocation2 + $0x8] sm:$0xf] %vm1569_vm12, %v1567_v45  ;;  %v4342_v45 = vrot.slane %v1676_v27, %v5281_v19 }
 0xf51   : > { %v1572_v52 = vpop.permute.xlu0 %1571  ;;  %5283 = vst [vmem:[#allocation12_spill] sm:$0xff] %v4342_v45 }
 0xf52   : > { %v1573_v41 = vrot.slane %v1572_v52, 4 }
 0xf54   : > { %v1575_v22 = vsel %vm1574_vm15, %v1573_v41, %v1572_v52  ;;  %v1717_v52 = vrot.slane %v4255_v26, %v5288_v43 }
 0xf55   : > { %1580 = vst.msk [vmem:[#allocation2 + $0x8] sm:$0xff] %vm1579_vm2, %v1575_v22 }
 0xf5c   : > { %v4271_v59 = vld [vmem:[#allocation2 + $0x8] sm:$0xff] }
 0xf5d   : > { %v1766_v31 = vrot.slane %v4271_v59, %v5272_v9  ;;  %v1762_v53 = vrot.slane %v4271_v59, %v5273_v58  ;;  %v1831_v50 = vrot.slane %v4271_v59, %v5277_v7  ;;  %v1827_v8 = vrot.slane %v4271_v59, %v5276_v11 }
 0xf5e   : > { %v4323_v40 = vpop.permute.xlu0 %1594  ;;  %v1892_v23 = vrot.slane %v4271_v59, %v5281_v19  ;;  %v1896_v24 = vrot.slane %v4271_v59, %v5282_v47  ;;  %v1957_v12 = vrot.slane %v4271_v59, %v5287_v14 }
 0xf5f   : > { %v4278_v16 = vrot.slane %v1766_v31, %v5273_v58  ;;  %v4281_v51 = vrot.slane %v1762_v53, %v5273_v58  ;;  %v4312_v20 = vrot.slane %v1831_v50, %v5276_v11  ;;  %v4315_v2 = vrot.slane %v1827_v8, %v5276_v11  ;;  %5279 = vst [vmem:[#allocation14_spill] sm:$0xff] %v4323_v40 }
 0xf60   : > { %v4345_v0 = vrot.slane %v1892_v23, %v5281_v19  ;;  %v4360_v9 = vrot.slane %v1896_v24, %v5281_v19  ;;  %v4377_v22 = vrot.slane %v1957_v12, %v5287_v14 }
 0xf61   : > { %v1790_v10 = vmul.f32 %v4278_v16, %v1747_v1  ;;  %v1789_v5 = vmul.f32 %v4281_v51, %v1747_v1  ;;  %v1713_v1 = vrot.slane %v4255_v26, %v5287_v14  ;;  %v1961_v26 = vrot.slane %v4271_v59, %v5288_v43 }
 0xf62   : > { %5284 = vst [vmem:[#allocation19_spill] sm:$0xff] %v4345_v0  ;;  %5285 = vst [vmem:[#allocation18_spill] sm:$0xff] %v4360_v9 }
 0xf63   : > { %1801 = vrot.lane.b32.xlu0 %v1790_v10, %s3100_s22  ;;  %1799 = vrot.lane.b32.xlu1 %v1789_v5, %s3100_s22  ;;  %v4325_v56 = vpop.permute.xlu0 %1707  ;;  %v4374_v41 = vrot.slane %v1713_v1, %v5287_v14  ;;  %v4382_v5 = vrot.slane %v1717_v52, %v5287_v14  ;;  %v4392_v35 = vrot.slane %v1961_v26, %v5287_v14  ;;  %v5292_v1 = vmov 12  }
 0xf64   : > { %v5293_v26 = vmov 13  }
 0xf67   : > { %1813 = vperm.xlu1 %3044, %v4228_v46  }
 0xf6b   : > { %3063 = vset.pattern.permute.xlu1 %v5274_v32 }
 0xfbf   : > { %v4289_v39 = vpop.permute.xlu1 %1795  ;;  %v4327_v29 = vpop.permute.xlu0 %1797 }
 0xfc0   : > { %5275 = vst [vmem:[#allocation15_spill] sm:$0xff] %v4289_v39 }
 0xfd5   : > { %v4295_v3 = vpop.permute.xlu1 %1799  ;;  %v4329_v33 = vpop.permute.xlu0 %1801 }
 0xfe2   : > { %v1814_v4 = vpop.permute.xlu1 %1813 }
 0xfe3   : > { %v1853_v49 = vmul.f32 %v1814_v4, %v4301_v6  ;;  %v1852_v57 = vmul.f32 %v1814_v4, %v4298_v36  ;;  %v1855_v30 = vmul.f32 %v4312_v20, %v1814_v4  ;;  %v1854_v60 = vmul.f32 %v4315_v2, %v1814_v4 }
 0xfe5   : > { %1862 = vrot.lane.b32.xlu1 %v1853_v49, %s3100_s22  ;;  %1860 = vrot.lane.b32.xlu0 %v1852_v57, %s3100_s22 }
 0xfe9   : > { %1866 = vrot.lane.b32.xlu1 %v1855_v30, %s3100_s22  ;;  %1864 = vrot.lane.b32.xlu0 %v1854_v60, %s3100_s22  ;;  %v5290_v30 = vmov 10  }
 0xfed   : > { %1878 = vperm.xlu0 %3045, %v4228_v46  }
 0xff1   : > { %3046 = vset.pattern.permute.xlu0 %v5278_v34 }
0x1057   : > { %v4331_v18 = vpop.permute.xlu0 %1860 }
0x1058   : > { %5280 = vst [vmem:[#allocation13_spill] sm:$0xff] %v4331_v18 }
0x105b   : > { %v4337_v38 = vpop.permute.xlu0 %1864 }
0x1068   : > { %v1879_v44 = vpop.permute.xlu0 %1878 }
0x1069   : > { %v1919_v37 = vmul.f32 %v4345_v0, %v1879_v44  ;;  %v1917_v62 = vmul.f32 %v1879_v44, %v4342_v45  ;;  %v1918_v42 = vmul.f32 %v1879_v44, %v4350_v21  ;;  %v1920_v17 = vmul.f32 %v4360_v9, %v1879_v44 }
0x106a   : > { %v5291_v44 = vmov 11  }
0x106b   : > { %1929 = vrot.lane.b32.xlu0 %v1919_v37, %s3100_s22  ;;  %1925 = vrot.lane.b32.xlu1 %v1917_v62, %s3100_s22 }
0x106f   : > { %1943 = vperm.xlu0 %3046, %v4228_v46   ;;  %1927 = vrot.lane.b32.xlu1 %v1918_v42, %s3100_s22 }
0x1073   : > { %1931 = vrot.lane.b32.xlu1 %v1920_v17, %s3100_s22  ;;  %3047 = vset.pattern.permute.xlu0 %v5286_v28 }
0x10dd   : > { %v4369_v13 = vpop.permute.xlu0 %1929 }
0x10ea   : > { %v1944_v31 = vpop.permute.xlu0 %1943 }
0x10eb   : > { %v1984_v53 = vmul.f32 %v4377_v22, %v1944_v31  ;;  %v1982_v10 = vmul.f32 %v1944_v31, %v4374_v41  ;;  %v1983_v32 = vmul.f32 %v1944_v31, %v4382_v5  ;;  %v1985_v7 = vmul.f32 %v4392_v35, %v1944_v31 }
0x10ed   : > { %1994 = vrot.lane.b32.xlu0 %v1984_v53, %s3100_s22  ;;  %1990 = vrot.lane.b32.xlu1 %v1982_v10, %s3100_s22 }
0x10f1   : > { %2008 = vperm.xlu0 %3047, %v4228_v46   ;;  %1992 = vrot.lane.b32.xlu1 %v1983_v32, %s3100_s22 }
0x10f5   : > { %1996 = vrot.lane.b32.xlu1 %v1985_v7, %s3100_s22  ;;  %3048 = vset.pattern.permute.xlu0 %v5289_v54  ;;  %s3157_s22 = smov 100  }
0x115f   : > { %v4397_v50 = vpop.permute.xlu0 %1994 }
0x116c   : > { %v2009_v8 = vpop.permute.xlu0 %2008 }
0x116d   : > { %v2013_v59 = vmul.f32 %v2009_v8, %v4281_v51  ;;  %v2011_v4 = vmul.f32 %v2009_v8, %v4265_v63  ;;  %v2012_v49 = vmul.f32 %v2009_v8, %v4262_v25  ;;  %v2014_v57 = vmul.f32 %v2009_v8, %v4278_v16 }
0x116f   : > { %2023 = vrot.lane.b32.xlu0 %v2013_v59, %s3101_s23  ;;  %2019 = vrot.lane.b32.xlu1 %v2011_v4, %s3101_s23 }
0x1173   : > { %2037 = vperm.xlu0 %3048, %v4228_v46   ;;  %2021 = vrot.lane.b32.xlu1 %v2012_v49, %s3101_s23  ;;  %v5294_v49 = vmov 14  }
0x1177   : > { %2025 = vrot.lane.b32.xlu1 %v2014_v57, %s3101_s23  ;;  %3049 = vset.pattern.permute.xlu0 %v5290_v30 }
0x11e1   : > { %v4409_v60 = vpop.permute.xlu0 %2023 }
0x11ee   : > { %v2038_v34 = vpop.permute.xlu0 %2037 }
0x11ef   : > { %v2042_v27 = vmul.f32 %v2038_v34, %v4315_v2  ;;  %v2040_v23 = vmul.f32 %v2038_v34, %v4298_v36  ;;  %v2041_v47 = vmul.f32 %v2038_v34, %v4301_v6  ;;  %v2043_v48 = vmul.f32 %v2038_v34, %v4312_v20 }
0x11f1   : > { %2052 = vrot.lane.b32.xlu0 %v2042_v27, %s3101_s23  ;;  %2048 = vrot.lane.b32.xlu1 %v2040_v23, %s3101_s23 }
0x11f5   : > { %2066 = vperm.xlu0 %3049, %v4228_v46   ;;  %2050 = vrot.lane.b32.xlu1 %v2041_v47, %s3101_s23 }
0x11f9   : > { %2054 = vrot.lane.b32.xlu1 %v2043_v48, %s3101_s23  ;;  %3050 = vset.pattern.permute.xlu0 %v5291_v44  ;;  %v5295_v48 = vmov 15   ;;  %v4469_v44 = vpop.permute.xlu1 %1862 }
0x1263   : > { %v4421_v37 = vpop.permute.xlu0 %2052 }
0x1270   : > { %v2067_v62 = vpop.permute.xlu0 %2066 }
0x1271   : > { %v2071_v24 = vmul.f32 %v2067_v62, %v4345_v0  ;;  %v2069_v42 = vmul.f32 %v2067_v62, %v4342_v45  ;;  %v2070_v17 = vmul.f32 %v2067_v62, %v4350_v21  ;;  %v2072_v28 = vmul.f32 %v2067_v62, %v4360_v9  ;;  %v4471_v62 = vpop.permute.xlu1 %1866 }
0x1273   : > { %2081 = vrot.lane.b32.xlu0 %v2071_v24, %s3101_s23  ;;  %2077 = vrot.lane.b32.xlu1 %v2069_v42, %s3101_s23 }
0x1275   : > { %v4473_v24 = vpop.permute.xlu1 %1925 }
0x1276   : > { %5296 = vst [vmem:[#allocation23_spill] sm:$0xff] %v4473_v24 }
0x1277   : > { %2095 = vperm.xlu0 %3050, %v4228_v46   ;;  %2079 = vrot.lane.b32.xlu1 %v2070_v17, %s3101_s23 }
0x1279   : > { %v4475_v42 = vpop.permute.xlu1 %1927 }
0x127b   : > { %2083 = vrot.lane.b32.xlu1 %v2072_v28, %s3101_s23  ;;  %3051 = vset.pattern.permute.xlu0 %v5292_v1 }
0x127d   : > { %v4479_v1 = vpop.permute.xlu1 %1931 }
0x12e5   : > { %v4433_v12 = vpop.permute.xlu0 %2081 }
0x12f2   : > { %v2096_v43 = vpop.permute.xlu0 %2095 }
0x12f3   : > { %v2100_v52 = vmul.f32 %v2096_v43, %v4377_v22  ;;  %v2098_v31 = vmul.f32 %v2096_v43, %v4374_v41  ;;  %v2099_v53 = vmul.f32 %v2096_v43, %v4382_v5  ;;  %v2101_v10 = vmul.f32 %v2096_v43, %v4392_v35 }
0x12f5   : > { %2110 = vrot.lane.b32.xlu0 %v2100_v52, %s3101_s23  ;;  %2106 = vrot.lane.b32.xlu1 %v2098_v31, %s3101_s23  ;;  %v4485_v31 = vpop.permute.xlu1 %1990 }
0x12f6   : > { %5297 = vst [vmem:[#allocation22_spill] sm:$0xff] %v4485_v31  ;;  %v1664_v31 = vmul.f32 %v4301_v6, %v4251_v61 }
0x12f9   : > { %2124 = vperm.xlu0 %3051, %v4228_v46   ;;  %2108 = vrot.lane.b32.xlu1 %v2099_v53, %s3101_s23 }
0x12fd   : > { %2112 = vrot.lane.b32.xlu1 %v2101_v10, %s3101_s23  ;;  %3052 = vset.pattern.permute.xlu0 %v5293_v26  ;;  %v4491_v26 = vpop.permute.xlu1 %1992  ;;  %s3158_s23 = smov 99  }
0x1367   : > { %v4445_v32 = vpop.permute.xlu0 %2110 }
0x1374   : > { %v2125_v7 = vpop.permute.xlu0 %2124 }
0x1375   : > { %v2129_v54 = vmul.f32 %v2125_v7, %v4281_v51  ;;  %v2127_v8 = vmul.f32 %v2125_v7, %v4265_v63  ;;  %v2128_v59 = vmul.f32 %v2125_v7, %v4262_v25  ;;  %v2130_v4 = vmul.f32 %v2125_v7, %v4278_v16 }
0x1376   : > { %v5298_v7 = vmov 16  }
0x1377   : > { %2139 = vrot.lane.b32.xlu0 %v2129_v54, %s3157_s22  ;;  %2135 = vrot.lane.b32.xlu1 %v2127_v8, %s3157_s22  ;;  %v1997_v54 = vpop.permute.xlu1 %1996 }
0x137b   : > { %2154 = vperm.xlu0 %3052, %v4228_v46   ;;  %2137 = vrot.lane.b32.xlu1 %v2128_v59, %s3157_s22  ;;  %v4495_v8 = vpop.permute.xlu1 %2019 }
0x137c   : > { %5299 = vst [vmem:[#allocation17_spill] sm:$0xff] %v4495_v8 }
0x137f   : > { %2141 = vrot.lane.b32.xlu1 %v2130_v4, %s3157_s22  ;;  %3053 = vset.pattern.permute.xlu0 %v5294_v49  ;;  %v4497_v59 = vpop.permute.xlu1 %2021 }
0x1383   : > { %v2026_v4 = vpop.permute.xlu1 %2025 }
0x1387   : > { %v4499_v49 = vpop.permute.xlu1 %2048 }
0x1388   : > { %5300 = vst [vmem:[#allocation16_spill] sm:$0xff] %v4499_v49 }
0x13e9   : > { %v4457_v57 = vpop.permute.xlu0 %2139 }
0x13f6   : > { %v2155_v30 = vpop.permute.xlu0 %2154 }
0x13f7   : > { %v2159_v34 = vmul.f32 %v2155_v30, %v4315_v2  ;;  %v2157_v27 = vmul.f32 %v2155_v30, %v4298_v36  ;;  %v2158_v23 = vmul.f32 %v2155_v30, %v4301_v6  ;;  %v2160_v47 = vmul.f32 %v2155_v30, %v4312_v20  ;;  %v4501_v30 = vpop.permute.xlu1 %2050 }
0x13f9   : > { %2169 = vrot.lane.b32.xlu0 %v2159_v34, %s3157_s22  ;;  %2165 = vrot.lane.b32.xlu1 %v2157_v27, %s3157_s22 }
0x13fb   : > { %v2055_v34 = vpop.permute.xlu1 %2054 }
0x13fd   : > { %2183 = vperm.xlu0 %3053, %v4228_v46   ;;  %2167 = vrot.lane.b32.xlu1 %v2158_v23, %s3157_s22 }
0x13ff   : > { %v4503_v27 = vpop.permute.xlu1 %2077 }
0x1400   : > { %5301 = vst [vmem:[#allocation27_spill] sm:$0xff] %v4503_v27 }
0x1401   : > { %2171 = vrot.lane.b32.xlu1 %v2160_v47, %s3157_s22  ;;  %3054 = vset.pattern.permute.xlu0 %v5295_v48 }
0x1403   : > { %v4505_v23 = vpop.permute.xlu1 %2079 }
0x1407   : > { %v4507_v47 = vpop.permute.xlu1 %2083 }
0x140b   : > { %v4509_v48 = vpop.permute.xlu1 %2106 }
0x140c   : > { %5302 = vst [vmem:[#allocation26_spill] sm:$0xff] %v4509_v48 }
0x146b   : > { %v4477_v17 = vpop.permute.xlu0 %2169 }
0x1478   : > { %v2184_v28 = vpop.permute.xlu0 %2183 }
0x1479   : > { %v2186_v43 = vmul.f32 %v2184_v28, %v4342_v45  ;;  %v2188_v52 = vmul.f32 %v2184_v28, %v4345_v0  ;;  %v2187_v53 = vmul.f32 %v2184_v28, %v4350_v21  ;;  %v2189_v10 = vmul.f32 %v2184_v28, %v4360_v9  ;;  %v4511_v28 = vpop.permute.xlu1 %2108 }
0x147b   : > { %2198 = vrot.lane.b32.xlu0 %v2188_v52, %s3157_s22  ;;  %2194 = vrot.lane.b32.xlu1 %v2186_v43, %s3157_s22  ;;  %v1591_v43 = vld [vmem:[#allocation2 + $0x8] sm:$0xf] }
0x147c   : > { %v1610_v52 = vrot.slane %v1591_v43, %v5273_v58  ;;  %v1647_v27 = vrot.slane %v1591_v43, %v5276_v11  ;;  %v1684_v18 = vrot.slane %v1591_v43, %v5281_v19  ;;  %v1721_v0 = vrot.slane %v1591_v43, %v5287_v14 }
0x147e   : > { %v1662_v24 = vrot.slane %v1647_v27, %v5276_v11  ;;  %v1738_v11 = vmul.f32 %v4382_v5, %v4325_v56 }
0x147f   : > { %2212 = vperm.xlu0 %3054, %v4228_v46   ;;  %2196 = vrot.lane.b32.xlu1 %v2187_v53, %s3157_s22  ;;  %v4514_v53 = vpop.permute.xlu1 %2112 }
0x1480   : > { %v1665_v9 = vmul.f32 %v1662_v24, %v4251_v61 }
0x1483   : > { %2200 = vrot.lane.b32.xlu1 %v2189_v10, %s3157_s22  ;;  %3055 = vset.pattern.permute.xlu0 %v5298_v7  ;;  %v1625_v10 = vrot.slane %v1610_v52, %v5273_v58  ;;  %v1627_v7 = vmul.f32 %v4262_v25, %v4323_v40  ;;  %v4519_v49 = vpop.permute.xlu1 %2135 }
0x1484   : > { %5303 = vst [vmem:[#allocation31_spill] sm:$0xff] %v4519_v49  ;;  %v1701_v49 = vmul.f32 %v4350_v21, %v4253_v55 }
0x1485   : > { %v1628_v8 = vmul.f32 %v1625_v10, %v4323_v40  ;;  %v1630_v48 = vadd.f32 %v1627_v7, %v4249_v15  ;;  %v1699_v10 = vrot.slane %v1684_v18, %v5281_v19  ;;  %v1869_v18 = vsel %vm339_vm0, %v4469_v44, %v4337_v38 }
0x1487   : > { %v4528_v39 = vpop.permute.xlu1 %2137  ;;  %v1631_v58 = vadd.f32 %v1628_v8, %v4249_v15  ;;  %v1667_v52 = vadd.f32 %v1664_v31, %v1630_v48  ;;  %v1702_v45 = vmul.f32 %v1699_v10, %v4253_v55  ;;  %v1804_v31 = vsel %vm339_vm0, %v4327_v29, %v4295_v3 }
0x1488   : > { %v1736_v48 = vrot.slane %v1721_v0, %v5287_v14  ;;  %v1999_v14 = vsel %vm339_vm0, %v4491_v26, %v4397_v50 }
0x1489   : > { %v1668_v7 = vadd.f32 %v1665_v9, %v1631_v58  ;;  %v1704_v40 = vadd.f32 %v1701_v49, %v1667_v52  ;;  %v1805_v49 = vsel %vm339_vm0, %v4295_v3, %v4329_v33  ;;  %v1935_v3 = vsel %vm339_vm0, %v4369_v13, %v4479_v1 }
0x148a   : > { %v1739_v19 = vmul.f32 %v1736_v48, %v4325_v56  ;;  %v2028_v33 = vsel %vm476_vm1, %v4497_v59, %v4409_v60  ;;  %v2029_v48 = vsel %vm476_vm1, %v4409_v60, %v2026_v4  ;;  %v2087_v60 = vsel %vm476_vm1, %v4433_v12, %v4507_v47 }
0x148b   : > { %v2142_v27 = vpop.permute.xlu1 %2141  ;;  %v1705_v8 = vadd.f32 %v1702_v45, %v1668_v7  ;;  %v1741_v24 = vadd.f32 %v1738_v11, %v1704_v40  ;;  %v1934_v45 = vsel %vm339_vm0, %v4475_v42, %v4369_v13  ;;  %v1870_v40 = vsel %vm339_vm0, %v4337_v38, %v4471_v62 }
0x148c   : > { %v2000_v38 = vsel %vm339_vm0, %v4397_v50, %v1997_v54  ;;  %v2057_v62 = vsel %vm476_vm1, %v4501_v30, %v4421_v37  ;;  %v2086_v13 = vsel %vm476_vm1, %v4505_v23, %v4433_v12  ;;  %v2058_v50 = vsel %vm476_vm1, %v4421_v37, %v2055_v34 }
0x148d   : > { %v1810_v9 = vadd.f32 %v1804_v31, %v1741_v24  ;;  %v1742_v43 = vadd.f32 %v1739_v19, %v1705_v8  ;;  %v2115_v54 = vsel %vm476_vm1, %v4511_v28, %v4445_v32  ;;  %v2145_v4 = vsel %vm2143_vm3, %v4528_v39, %v4457_v57 }
0x148e   : > { %v2116_v37 = vsel %vm476_vm1, %v4445_v32, %v4514_v53  ;;  %v2146_v12 = vsel %vm2143_vm3, %v4457_v57, %v2142_v27 }
0x148f   : > { %v4543_v61 = vpop.permute.xlu1 %2165  ;;  %v1875_v0 = vadd.f32 %v1869_v18, %v1810_v9  ;;  %v1811_v58 = vadd.f32 %v1805_v49, %v1742_v43 }
0x1491   : > { %v1940_v52 = vadd.f32 %v1934_v45, %v1875_v0  ;;  %v1876_v7 = vadd.f32 %v1870_v40, %v1811_v58 }
0x1493   : > { %v4561_v10 = vpop.permute.xlu1 %2167  ;;  %v2005_v11 = vadd.f32 %v1999_v14, %v1940_v52  ;;  %v1941_v31 = vadd.f32 %v1935_v3, %v1876_v7 }
0x1494   : > { %v2174_v34 = vsel %vm2143_vm3, %v4561_v10, %v4477_v17 }
0x1495   : > { %v2034_v8 = vadd.f32 %v2028_v33, %v2005_v11  ;;  %v2006_v1 = vadd.f32 %v2000_v38, %v1941_v31 }
0x1497   : > { %v2063_v24 = vadd.f32 %v2057_v62, %v2034_v8  ;;  %v2172_v18 = vpop.permute.xlu1 %2171  ;;  %v2035_v19 = vadd.f32 %v2029_v48, %v2006_v1  ;;  %v5304_v48 = vmov 17  }
0x1498   : > { %v2175_v3 = vsel %vm2143_vm3, %v4477_v17, %v2172_v18 }
0x1499   : > { %v2092_v9 = vadd.f32 %v2086_v13, %v2063_v24  ;;  %v2064_v49 = vadd.f32 %v2058_v50, %v2035_v19 }
0x149b   : > { %v2121_v45 = vadd.f32 %v2115_v54, %v2092_v9  ;;  %v2093_v0 = vadd.f32 %v2087_v60, %v2064_v49 }
0x149d   : > { %v2151_v40 = vadd.f32 %v2145_v4, %v2121_v45  ;;  %v2122_v47 = vadd.f32 %v2116_v37, %v2093_v0 }
0x149f   : > { %v2180_v14 = vadd.f32 %v2174_v34, %v2151_v40  ;;  %v2152_v53 = vadd.f32 %v2146_v12, %v2122_v47  ;;  %v5305_v34 = vmov 18  }
0x14a1   : > { %v2181_v7 = vadd.f32 %v2175_v3, %v2152_v53 }
0x14ed   : > { %v4590_v43 = vpop.permute.xlu1 %2194  ;;  %v2199_v58 = vpop.permute.xlu0 %2198 }
0x14f1   : > { %v4600_v52 = vpop.permute.xlu1 %2196 }
0x14f2   : > { %v2203_v32 = vsel %vm2143_vm3, %v4600_v52, %v2199_v58 }
0x14f3   : > { %v2209_v33 = vadd.f32 %v2203_v32, %v2180_v14 }
0x14f5   : > { %v2201_v11 = vpop.permute.xlu1 %2200 }
0x14f6   : > { %v2204_v38 = vsel %vm2143_vm3, %v2199_v58, %v2201_v11 }
0x14f7   : > { %v2210_v62 = vadd.f32 %v2204_v38, %v2181_v7 }
0x14fa   : > { %v2213_v31 = vpop.permute.xlu0 %2212 }
0x14fb   : > { %v2215_v57 = vmul.f32 %v2213_v31, %v4374_v41  ;;  %v2217_v27 = vmul.f32 %v2213_v31, %v4377_v22  ;;  %v2216_v17 = vmul.f32 %v2213_v31, %v4382_v5  ;;  %v2218_v8 = vmul.f32 %v2213_v31, %v4392_v35 }
0x14fd   : > { %2227 = vrot.lane.b32.xlu0 %v2217_v27, %s3157_s22  ;;  %2223 = vrot.lane.b32.xlu1 %v2215_v57, %s3157_s22 }
0x1501   : > { %2241 = vperm.xlu0 %3055, %v4228_v46   ;;  %2225 = vrot.lane.b32.xlu1 %v2216_v17, %s3157_s22 }
0x1505   : > { %2229 = vrot.lane.b32.xlu1 %v2218_v8, %s3157_s22  ;;  %3056 = vset.pattern.permute.xlu0 %v5304_v48 }
0x156f   : > { %v4617_v13 = vpop.permute.xlu1 %2223  ;;  %v2228_v1 = vpop.permute.xlu0 %2227 }
0x1573   : > { %v4619_v24 = vpop.permute.xlu1 %2225 }
0x1574   : > { %v2232_v18 = vsel %vm2143_vm3, %v4619_v24, %v2228_v1 }
0x1575   : > { %v2238_v50 = vadd.f32 %v2232_v18, %v2209_v33 }
0x1577   : > { %v2230_v54 = vpop.permute.xlu1 %2229 }
0x1578   : > { %v2233_v19 = vsel %vm2143_vm3, %v2228_v1, %v2230_v54  ;;  %v5307_v54 = vld [vmem:[#allocation12_spill] sm:$0xff] }
0x1579   : > { %v2239_v9 = vadd.f32 %v2233_v19, %v2210_v62  ;;  %v5306_v62 = vmov 19  }
0x157c   : > { %v2242_v60 = vpop.permute.xlu0 %2241 }
0x157d   : > { %v2244_v4 = vmul.f32 %v2242_v60, %v4265_v63  ;;  %v2246_v49 = vmul.f32 %v2242_v60, %v4281_v51  ;;  %v2245_v45 = vmul.f32 %v2242_v60, %v4262_v25  ;;  %v2247_v37 = vmul.f32 %v2242_v60, %v4278_v16 }
0x157f   : > { %2256 = vrot.lane.b32.xlu0 %v2246_v49, %s3158_s23  ;;  %2252 = vrot.lane.b32.xlu1 %v2244_v4, %s3158_s23  ;;  %v5309_v49 = vld [vmem:[#allocation18_spill] sm:$0xff] }
0x1583   : > { %2271 = vperm.xlu0 %3056, %v4228_v46   ;;  %2254 = vrot.lane.b32.xlu1 %v2245_v45, %s3158_s23 }
0x1587   : > { %2258 = vrot.lane.b32.xlu1 %v2247_v37, %s3158_s23  ;;  %3057 = vset.pattern.permute.xlu0 %v5305_v34  ;;  %v5310_v37 = vmov 20  }
0x15f1   : > { %v4634_v0 = vpop.permute.xlu1 %2252  ;;  %v2257_v40 = vpop.permute.xlu0 %2256 }
0x15f5   : > { %v4636_v12 = vpop.permute.xlu1 %2254 }
0x15f6   : > { %v2262_v47 = vsel %vm2260_vm4, %v4636_v12, %v2257_v40 }
0x15f7   : > { %v2268_v14 = vadd.f32 %v2262_v47, %v2238_v50 }
0x15f9   : > { %v2259_v58 = vpop.permute.xlu1 %2258 }
0x15fa   : > { %v2263_v3 = vsel %vm2260_vm4, %v2257_v40, %v2259_v58 }
0x15fb   : > { %v2269_v32 = vadd.f32 %v2263_v3, %v2239_v9  ;;  %v5308_v9 = vld [vmem:[#allocation19_spill] sm:$0xff] }
0x15fe   : > { %v2272_v53 = vpop.permute.xlu0 %2271 }
0x15ff   : > { %v2274_v33 = vmul.f32 %v2272_v53, %v4298_v36  ;;  %v2276_v7 = vmul.f32 %v2272_v53, %v4315_v2  ;;  %v2275_v11 = vmul.f32 %v2272_v53, %v4301_v6  ;;  %v2277_v38 = vmul.f32 %v2272_v53, %v4312_v20 }
0x1601   : > { %2286 = vrot.lane.b32.xlu0 %v2276_v7, %s3158_s23  ;;  %2282 = vrot.lane.b32.xlu1 %v2274_v33, %s3158_s23 }
0x1605   : > { %2300 = vperm.xlu0 %3057, %v4228_v46   ;;  %2284 = vrot.lane.b32.xlu1 %v2275_v11, %s3158_s23 }
0x1609   : > { %2288 = vrot.lane.b32.xlu1 %v2277_v38, %s3158_s23  ;;  %3058 = vset.pattern.permute.xlu0 %v5306_v62 }
0x1673   : > { %v4651_v31 = vpop.permute.xlu1 %2282  ;;  %v2287_v57 = vpop.permute.xlu0 %2286 }
0x1677   : > { %v4653_v27 = vpop.permute.xlu1 %2284 }
0x1678   : > { %v2291_v17 = vsel %vm2260_vm4, %v4653_v27, %v2287_v57 }
0x1679   : > { %v2297_v8 = vadd.f32 %v2291_v17, %v2268_v14  ;;  %v5312_v17 = vld [vmem:[#allocation14_spill] sm:$0xff] }
0x167b   : > { %v2289_v48 = vpop.permute.xlu1 %2288 }
0x167c   : > { %v2292_v1 = vsel %vm2260_vm4, %v2287_v57, %v2289_v48  ;;  %v5311_v57 = vmov 21  }
0x167d   : > { %v2298_v18 = vadd.f32 %v2292_v1, %v2269_v32  ;;  %v5313_v1 = vld [vmem:[#allocation11_spill] sm:$0xff] }
0x1680   : > { %v2301_v50 = vpop.permute.xlu0 %2300 }
0x1681   : > { %v2303_v19 = vmul.f32 %v2301_v50, %v5307_v54  ;;  %v2305_v60 = vmul.f32 %v2301_v50, %v5308_v9  ;;  %v2304_v4 = vmul.f32 %v2301_v50, %v4350_v21  ;;  %v2306_v45 = vmul.f32 %v2301_v50, %v5309_v49 }
0x1683   : > { %2315 = vrot.lane.b32.xlu0 %v2305_v60, %s3158_s23  ;;  %2311 = vrot.lane.b32.xlu1 %v2303_v19, %s3158_s23  ;;  %v1737_v19 = vmul.f32 %v4374_v41, %v4325_v56 }
0x1687   : > { %2329 = vperm.xlu0 %3058, %v4228_v46   ;;  %2313 = vrot.lane.b32.xlu1 %v2304_v4, %s3158_s23  ;;  %v5314_v4 = vld [vmem:[#allocation15_spill] sm:$0xff] }
0x168b   : > { %2317 = vrot.lane.b32.xlu1 %v2306_v45, %s3158_s23  ;;  %3059 = vset.pattern.permute.xlu0 %v5310_v37  ;;  %v1803_v45 = vsel %vm339_vm0, %v5314_v4, %v4327_v29 }
0x16f5   : > { %v2312_v34 = vpop.permute.xlu1 %2311  ;;  %v2316_v40 = vpop.permute.xlu0 %2315 }
0x16f9   : > { %v2314_v47 = vpop.permute.xlu1 %2313 }
0x16fa   : > { %v2320_v14 = vsel %vm2260_vm4, %v2314_v47, %v2316_v40 }
0x16fb   : > { %v2326_v58 = vadd.f32 %v2320_v14, %v2297_v8  ;;  %v1626_v8 = vmul.f32 %v4265_v63, %v5312_v17  ;;  %v5320_v17 = vld [vmem:[#allocation27_spill] sm:$0xff] }
0x16fd   : > { %v2318_v3 = vpop.permute.xlu1 %2317  ;;  %v1629_v48 = vadd.f32 %v1626_v8, %v4249_v15 }
0x16fe   : > { %v2321_v32 = vsel %vm2260_vm4, %v2316_v40, %v2318_v3  ;;  %v5315_v40 = vld [vmem:[#allocation13_spill] sm:$0xff]  ;;  %v5316_v3 = vld [vmem:[#allocation23_spill] sm:$0xff] }
0x16ff   : > { %v2327_v53 = vadd.f32 %v2321_v32, %v2298_v18  ;;  %v1663_v18 = vmul.f32 %v4298_v36, %v5313_v1  ;;  %v1868_v15 = vsel %vm339_vm0, %v5315_v40, %v4469_v44  ;;  %v1933_v32 = vsel %vm339_vm0, %v5316_v3, %v4475_v42 }
0x1700   : > { %v2085_v42 = vsel %vm476_vm1, %v5320_v17, %v4505_v23  ;;  %v2202_v23 = vsel %vm2143_vm3, %v4590_v43, %v4600_v52 }
0x1701   : > { %v1666_v50 = vadd.f32 %v1663_v18, %v1629_v48  ;;  %v5321_v48 = vld [vmem:[#allocation26_spill] sm:$0xff]  ;;  %v5322_v18 = vld [vmem:[#allocation31_spill] sm:$0xff] }
0x1702   : > { %v2330_v33 = vpop.permute.xlu0 %2329 }
0x1703   : > { %v2332_v7 = vmul.f32 %v2330_v33, %v4374_v41  ;;  %v2334_v11 = vmul.f32 %v2330_v33, %v4377_v22  ;;  %v2333_v38 = vmul.f32 %v2330_v33, %v4382_v5  ;;  %v2335_v62 = vmul.f32 %v2330_v33, %v4392_v35 }
0x1705   : > { %2344 = vrot.lane.b32.xlu0 %v2334_v11, %s3158_s23  ;;  %2340 = vrot.lane.b32.xlu1 %v2332_v7, %s3158_s23  ;;  %v5318_v11 = vld [vmem:[#allocation17_spill] sm:$0xff] }
0x1706   : > { %v2027_v29 = vsel %vm476_vm1, %v5318_v11, %v4497_v59  ;;  %v2144_v59 = vsel %vm2143_vm3, %v5322_v18, %v4528_v39  ;;  %v2261_v39 = vsel %vm2260_vm4, %v4634_v0, %v4636_v12  ;;  %v5324_v18 = vmov 23  }
0x1709   : > { %2358 = vperm.xlu0 %3059, %v4228_v46   ;;  %2342 = vrot.lane.b32.xlu1 %v2333_v38, %s3158_s23  ;;  %v1700_v46 = vmul.f32 %v5307_v54, %v4253_v55  ;;  %v5317_v55 = vld [vmem:[#allocation22_spill] sm:$0xff] }
0x170a   : > { %v1998_v56 = vsel %vm339_vm0, %v5317_v55, %v4491_v26  ;;  %v2114_v26 = vsel %vm476_vm1, %v5321_v48, %v4511_v28  ;;  %v2231_v28 = vsel %vm2143_vm3, %v4617_v13, %v4619_v24  ;;  %vm2377_vm0 = vcmask 801792  }
0x170b   : > { %v1703_v60 = vadd.f32 %v1700_v46, %v1666_v50 }
0x170d   : > { %2346 = vrot.lane.b32.xlu1 %v2335_v62, %s3158_s23  ;;  %3060 = vset.pattern.permute.xlu0 %v5311_v57  ;;  %v1740_v37 = vadd.f32 %v1737_v19, %v1703_v60  ;;  %v5319_v62 = vld [vmem:[#allocation16_spill] sm:$0xff] }
0x170e   : > { %v2056_v44 = vsel %vm476_vm1, %v5319_v62, %v4501_v30  ;;  %v2173_v30 = vsel %vm2143_vm3, %v4543_v61, %v4561_v10  ;;  %v2290_v61 = vsel %vm2260_vm4, %v4651_v31, %v4653_v27  ;;  %vm2494_vm1 = vcmask 588800  }
0x170f   : > { %v1809_v14 = vadd.f32 %v1803_v45, %v1740_v37  ;;  %v2319_v37 = vsel %vm2260_vm4, %v2312_v34, %v2314_v47  ;;  %v4743_v47 = vld [vmem:[%s4962_s1 + $0x8] sm:$0xf] }
0x1711   : > { %v1874_v33 = vadd.f32 %v1868_v15, %v1809_v14 }
0x1713   : > { %v1939_v7 = vadd.f32 %v1933_v32, %v1874_v33 }
0x1715   : > { %v2004_v38 = vadd.f32 %v1998_v56, %v1939_v7 }
0x1717   : > { %v2033_v57 = vadd.f32 %v2027_v29, %v2004_v38 }
0x1719   : > { %v2062_v8 = vadd.f32 %v2056_v44, %v2033_v57 }
0x171b   : > { %v2091_v1 = vadd.f32 %v2085_v42, %v2062_v8 }
0x171d   : > { %v2120_v50 = vadd.f32 %v2114_v26, %v2091_v1 }
0x171f   : > { %v2150_v46 = vadd.f32 %v2144_v59, %v2120_v50 }
0x1721   : > { %v2179_v19 = vadd.f32 %v2173_v30, %v2150_v46 }
0x1723   : > { %v2208_v60 = vadd.f32 %v2202_v23, %v2179_v19 }
0x1725   : > { %v2237_v4 = vadd.f32 %v2231_v28, %v2208_v60 }
0x1727   : > { %v2267_v10 = vadd.f32 %v2261_v39, %v2237_v4 }
0x1729   : > { %v2296_v43 = vadd.f32 %v2290_v61, %v2267_v10 }
0x172b   : > { %v2325_v52 = vadd.f32 %v2319_v37, %v2296_v43 }
0x1777   : > { %v2341_v45 = vpop.permute.xlu1 %2340  ;;  %v2345_v40 = vpop.permute.xlu0 %2344 }
0x177b   : > { %v2343_v15 = vpop.permute.xlu1 %2342 }
0x177c   : > { %v2348_v13 = vsel %vm2260_vm4, %v2341_v45, %v2343_v15  ;;  %v2349_v24 = vsel %vm2260_vm4, %v2343_v15, %v2345_v40  ;;  %v5327_v15 = vmov 31  }
0x177d   : > { %v2354_v14 = vadd.f32 %v2348_v13, %v2325_v52  ;;  %v2355_v3 = vadd.f32 %v2349_v24, %v2326_v58  ;;  %v5325_v52 = vmov 25   ;;  %v5328_v13 = vmov 34  }
0x177e   : > { %v5329_v24 = vmov 35  }
0x177f   : > { %v2347_v0 = vpop.permute.xlu1 %2346 }
0x1780   : > { %v2350_v12 = vsel %vm2260_vm4, %v2345_v40, %v2347_v0  ;;  %v5326_v40 = vmov 28  }
0x1781   : > { %v2356_v32 = vadd.f32 %v2350_v12, %v2327_v53  ;;  %v5323_v53 = vmov 22  }
0x1784   : > { %v2359_v33 = vpop.permute.xlu0 %2358 }
0x1785   : > { %v2361_v31 = vmul.f32 %v2359_v33, %v4265_v63  ;;  %v2363_v27 = vmul.f32 %v2359_v33, %v4281_v51  ;;  %v2362_v34 = vmul.f32 %v2359_v33, %v4262_v25  ;;  %v2364_v58 = vmul.f32 %v2359_v33, %v4278_v16 }
0x1787   : > { %2373 = vrot.lane.b32.xlu0 %v2363_v27, %s3151_s14  ;;  %2369 = vrot.lane.b32.xlu1 %v2361_v31, %s3151_s14 }
0x178b   : > { %2388 = vperm.xlu0 %3060, %v4743_v47   ;;  %2371 = vrot.lane.b32.xlu1 %v2362_v34, %s3151_s14 }
0x178f   : > { %2375 = vrot.lane.b32.xlu1 %v2364_v58, %s3151_s14  ;;  %3061 = vset.pattern.permute.xlu0 %v5323_v53 }
0x17f9   : > { %v2370_v55 = vpop.permute.xlu1 %2369  ;;  %v2374_v56 = vpop.permute.xlu0 %2373 }
0x17fd   : > { %v2372_v7 = vpop.permute.xlu1 %2371 }
0x17fe   : > { %v2378_v11 = vsel %vm2377_vm0, %v2370_v55, %v2372_v7  ;;  %v2379_v29 = vsel %vm2377_vm0, %v2372_v7, %v2374_v56  ;;  %v5330_v7 = vmov 26  }
0x17ff   : > { %v2384_v38 = vadd.f32 %v2378_v11, %v2354_v14  ;;  %v2385_v62 = vadd.f32 %v2379_v29, %v2355_v3  ;;  %v5331_v11 = vmov 27   ;;  %v5332_v29 = vmov 29  }
0x1801   : > { %v2376_v44 = vpop.permute.xlu1 %2375 }
0x1802   : > { %v2380_v57 = vsel %vm2377_vm0, %v2374_v56, %v2376_v44  ;;  %v5335_v44 = vmov 33  }
0x1803   : > { %v2386_v17 = vadd.f32 %v2380_v57, %v2356_v32 }
0x1806   : > { %v2389_v42 = vpop.permute.xlu0 %2388 }
0x1807   : > { %v2391_v8 = vmul.f32 %v2389_v42, %v4298_v36  ;;  %v2393_v48 = vmul.f32 %v2389_v42, %v4315_v2  ;;  %v2392_v26 = vmul.f32 %v2389_v42, %v4301_v6  ;;  %v2394_v1 = vmul.f32 %v2389_v42, %v4312_v20 }
0x1809   : > { %2403 = vrot.lane.b32.xlu0 %v2393_v48, %s3151_s14  ;;  %2399 = vrot.lane.b32.xlu1 %v2391_v8, %s3151_s14 }
0x180d   : > { %2417 = vperm.xlu0 %3061, %v4743_v47   ;;  %2401 = vrot.lane.b32.xlu1 %v2392_v26, %s3151_s14 }
0x1811   : > { %2405 = vrot.lane.b32.xlu1 %v2394_v1, %s3151_s14  ;;  %3062 = vset.pattern.permute.xlu0 %v5324_v18 }
0x187b   : > { %v2400_v59 = vpop.permute.xlu1 %2399  ;;  %v2404_v50 = vpop.permute.xlu0 %2403 }
0x187f   : > { %v2402_v30 = vpop.permute.xlu1 %2401 }
0x1880   : > { %v2407_v46 = vsel %vm2377_vm0, %v2400_v59, %v2402_v30  ;;  %v2408_v23 = vsel %vm2377_vm0, %v2402_v30, %v2404_v50 }
0x1881   : > { %v2413_v19 = vadd.f32 %v2407_v46, %v2384_v38  ;;  %v2414_v28 = vadd.f32 %v2408_v23, %v2385_v62  ;;  %v5333_v38 = vmov 30   ;;  %v5334_v62 = vmov 32  }
0x1883   : > { %v2406_v60 = vpop.permute.xlu1 %2405 }
0x1884   : > { %v2409_v39 = vsel %vm2377_vm0, %v2404_v50, %v2406_v60 }
0x1885   : > { %v2415_v4 = vadd.f32 %v2409_v39, %v2386_v17 }
0x1888   : > { %v2418_v61 = vpop.permute.xlu0 %2417 }
0x1889   : > { %v2420_v10 = vmul.f32 %v2418_v61, %v5307_v54  ;;  %v2422_v45 = vmul.f32 %v2418_v61, %v5308_v9  ;;  %v2421_v37 = vmul.f32 %v2418_v61, %v4350_v21  ;;  %v2423_v43 = vmul.f32 %v2418_v61, %v5309_v49 }
0x188b   : > { %2432 = vrot.lane.b32.xlu0 %v2422_v45, %s3151_s14  ;;  %2428 = vrot.lane.b32.xlu1 %v2420_v10, %s3151_s14 }
0x188f   : > { %2446 = vperm.xlu0 %3062, %v4743_v47   ;;  %2430 = vrot.lane.b32.xlu1 %v2421_v37, %s3151_s14 }
0x1893   : > { %3064 = vset.pattern.permute.xlu0 %v5325_v52  ;;  %2434 = vrot.lane.b32.xlu1 %v2423_v43, %s3151_s14 }
0x1894   : > { %2505 = vperm.xlu0 %3064, %v4743_v47  }
0x1898   : > { %3067 = vset.pattern.permute.xlu0 %v5326_v40 }
0x1899   : > { %2592 = vperm.xlu0 %3067, %v4743_v47  }
0x189d   : > { %3070 = vset.pattern.permute.xlu0 %v5327_v15 }
0x189e   : > { %2680 = vperm.xlu0 %3070, %v4743_v47  }
0x18a2   : > { %3073 = vset.pattern.permute.xlu0 %v5328_v13 }
0x18a3   : > { %2768 = vperm.xlu0 %3073, %v4743_v47  }
0x18a7   : > { %3075 = vset.pattern.permute.xlu0 %v5329_v24 }
0x18fd   : > { %v2429_v14 = vpop.permute.xlu1 %2428  ;;  %v2433_v3 = vpop.permute.xlu0 %2432 }
0x1901   : > { %v2431_v0 = vpop.permute.xlu1 %2430 }
0x1902   : > { %v2436_v12 = vsel %vm2377_vm0, %v2429_v14, %v2431_v0  ;;  %v2437_v32 = vsel %vm2377_vm0, %v2431_v0, %v2433_v3 }
0x1903   : > { %v4786_v33 = vadd.f32 %v2436_v12, %v2413_v19  ;;  %v4788_v31 = vadd.f32 %v2437_v32, %v2414_v28 }
0x1905   : > { %v2435_v27 = vpop.permute.xlu1 %2434 }
0x1906   : > { %v2438_v34 = vsel %vm2377_vm0, %v2433_v3, %v2435_v27 }
0x1907   : > { %v4791_v58 = vadd.f32 %v2438_v34, %v2415_v4 }
0x190a   : > { %v2447_v53 = vpop.permute.xlu0 %2446 }
0x190b   : > { %v2449_v55 = vmul.f32 %v2447_v53, %v4374_v41  ;;  %v2451_v56 = vmul.f32 %v2447_v53, %v4377_v22  ;;  %v2450_v57 = vmul.f32 %v2447_v53, %v4382_v5  ;;  %v2452_v17 = vmul.f32 %v2447_v53, %v4392_v35 }
0x190d   : > { %2461 = vrot.lane.b32.xlu0 %v2451_v56, %s3151_s14  ;;  %2457 = vrot.lane.b32.xlu1 %v2449_v55, %s3151_s14 }
0x190f   : > { %v2506_v59 = vpop.permute.xlu0 %2505 }
0x1910   : > { %v2509_v50 = vmul.f32 %v2506_v59, %v4301_v6  ;;  %v2508_v30 = vmul.f32 %v2506_v59, %v4298_v36  ;;  %v2511_v23 = vmul.f32 %v2506_v59, %v4312_v20  ;;  %v2510_v19 = vmul.f32 %v2506_v59, %v4315_v2 }
0x1911   : > { %2475 = vperm.xlu1 %3063, %v4743_v47  }
0x1914   : > { %v2593_v45 = vpop.permute.xlu0 %2592 }
0x1915   : > { %3065 = vset.pattern.permute.xlu1 %v5330_v7  ;;  %v2596_v14 = vmul.f32 %v2593_v45, %v4262_v25  ;;  %v2595_v3 = vmul.f32 %v2593_v45, %v4265_v63  ;;  %v2598_v32 = vmul.f32 %v2593_v45, %v4278_v16  ;;  %v2597_v27 = vmul.f32 %v2593_v45, %v4281_v51 }
0x1916   : > { %2534 = vperm.xlu1 %3065, %v4743_v47  }
0x1919   : > { %v2681_v40 = vpop.permute.xlu0 %2680 }
0x191a   : > { %3066 = vset.pattern.permute.xlu1 %v5331_v11 }
0x191b   : > { %2563 = vperm.xlu1 %3066, %v4743_v47  }
0x191e   : > { %v2769_v0 = vpop.permute.xlu0 %2768 }
0x191f   : > { %3068 = vset.pattern.permute.xlu1 %v5332_v29 }
0x1920   : > { %2622 = vperm.xlu1 %3068, %v4743_v47  }
0x1924   : > { %3069 = vset.pattern.permute.xlu1 %v5333_v38 }
0x1925   : > { %2651 = vperm.xlu1 %3069, %v4743_v47  }
0x1929   : > { %3071 = vset.pattern.permute.xlu1 %v5334_v62 }
0x192a   : > { %2709 = vperm.xlu1 %3071, %v4743_v47  }
0x192e   : > { %3072 = vset.pattern.permute.xlu1 %v5335_v44 }
0x192f   : > { %2739 = vperm.xlu1 %3072, %v4743_v47  }
0x1933   : > { %3074 = vset.pattern.permute.xlu1 %v5329_v24 }
0x1934   : > { %2797 = vperm.xlu1 %3074, %v4743_v47  }
0x1938   : > { %2459 = vrot.lane.b32.xlu1 %v2450_v57, %s3151_s14 }
0x193c   : > { %2463 = vrot.lane.b32.xlu1 %v2452_v17, %s3151_s14 }
0x197f   : > { %v2458_v42 = vpop.permute.xlu1 %2457  ;;  %v4856_v34 = vpop.permute.xlu0 %2461 }
0x198c   : > { %v2476_v8 = vpop.permute.xlu1 %2475 }
0x198d   : > { %v2478_v48 = vmul.f32 %v2476_v8, %v4265_v63  ;;  %v2479_v26 = vmul.f32 %v2476_v8, %v4262_v25  ;;  %v2480_v47 = vmul.f32 %v2476_v8, %v4281_v51  ;;  %v2481_v1 = vmul.f32 %v2476_v8, %v4278_v16 }
0x198e   : > { %v2683_v8 = vmul.f32 %v2681_v40, %v4374_v41 }
0x198f   : > { %2488 = vrot.lane.b32.xlu1 %v2479_v26, %s3137_s18  ;;  %2486 = vrot.lane.b32.xlu0 %v2478_v48, %s3137_s18  ;;  %v2686_v48 = vmul.f32 %v2681_v40, %v4392_v35  ;;  %v2685_v26 = vmul.f32 %v2681_v40, %v4377_v22 }
0x1991   : > { %v2535_v18 = vpop.permute.xlu1 %2534 }
0x1992   : > { %v2538_v60 = vmul.f32 %v2535_v18, %v4350_v21  ;;  %v2537_v39 = vmul.f32 %v2535_v18, %v5307_v54  ;;  %v2540_v61 = vmul.f32 %v2535_v18, %v5309_v49  ;;  %v2539_v10 = vmul.f32 %v2535_v18, %v5308_v9 }
0x1993   : > { %2492 = vrot.lane.b32.xlu1 %v2481_v1, %s3137_s18  ;;  %2490 = vrot.lane.b32.xlu0 %v2480_v47, %s3137_s18 }
0x1996   : > { %v2564_v46 = vpop.permute.xlu1 %2563 }
0x1997   : > { %2518 = vrot.lane.b32.xlu1 %v2509_v50, %s3137_s18  ;;  %2516 = vrot.lane.b32.xlu0 %v2508_v30, %s3137_s18  ;;  %v2567_v37 = vmul.f32 %v2564_v46, %v4382_v5  ;;  %v2566_v52 = vmul.f32 %v2564_v46, %v4374_v41  ;;  %v2569_v15 = vmul.f32 %v2564_v46, %v4392_v35 }
0x1998   : > { %v2568_v13 = vmul.f32 %v2564_v46, %v4377_v22 }
0x199b   : > { %2522 = vrot.lane.b32.xlu1 %v2511_v23, %s3137_s18  ;;  %v2623_v28 = vpop.permute.xlu1 %2622  ;;  %2520 = vrot.lane.b32.xlu0 %v2510_v19, %s3137_s18 }
0x199c   : > { %v2626_v7 = vmul.f32 %v2623_v28, %v4301_v6  ;;  %v2625_v38 = vmul.f32 %v2623_v28, %v4298_v36  ;;  %v2628_v62 = vmul.f32 %v2623_v28, %v4312_v20  ;;  %v2627_v44 = vmul.f32 %v2623_v28, %v4315_v2 }
0x199f   : > { %2547 = vrot.lane.b32.xlu1 %v2538_v60, %s3137_s18  ;;  %2545 = vrot.lane.b32.xlu0 %v2537_v39, %s3137_s18 }
0x19a0   : > { %v2652_v4 = vpop.permute.xlu1 %2651 }
0x19a1   : > { %v2654_v57 = vmul.f32 %v2652_v4, %v5307_v54  ;;  %v2656_v17 = vmul.f32 %v2652_v4, %v5308_v9 }
0x19a3   : > { %2551 = vrot.lane.b32.xlu1 %v2540_v61, %s3137_s18  ;;  %2549 = vrot.lane.b32.xlu0 %v2539_v10, %s3137_s18 }
0x19a5   : > { %v2710_v43 = vpop.permute.xlu1 %2709 }
0x19a6   : > { %v2713_v47 = vmul.f32 %v2710_v43, %v4262_v25  ;;  %v2712_v1 = vmul.f32 %v2710_v43, %v4265_v63  ;;  %v2715_v18 = vmul.f32 %v2710_v43, %v4278_v16  ;;  %v2714_v59 = vmul.f32 %v2710_v43, %v4281_v51 }
0x19a7   : > { %2576 = vrot.lane.b32.xlu1 %v2567_v37, %s3137_s18  ;;  %2574 = vrot.lane.b32.xlu0 %v2566_v52, %s3137_s18  ;;  %v2772_v63 = vmul.f32 %v2769_v0, %v4350_v21  ;;  %v2771_v16 = vmul.f32 %v2769_v0, %v5307_v54  ;;  %v2774_v51 = vmul.f32 %v2769_v0, %v5309_v49 }
0x19aa   : > { %v2740_v24 = vpop.permute.xlu1 %2739 }
0x19ab   : > { %2580 = vrot.lane.b32.xlu1 %v2569_v15, %s3137_s18  ;;  %2578 = vrot.lane.b32.xlu0 %v2568_v13, %s3137_s18  ;;  %s3160_s18 = smov 70   ;;  %v2743_v50 = vmul.f32 %v2740_v24, %v4301_v6  ;;  %v2742_v30 = vmul.f32 %v2740_v24, %v4298_v36  ;;  %v2745_v46 = vmul.f32 %v2740_v24, %v4312_v20 }
0x19ac   : > { %v2744_v25 = vmul.f32 %v2740_v24, %v4315_v2  ;;  %v2773_v6 = vmul.f32 %v2769_v0, %v5308_v9 }
0x19af   : > { %2605 = vrot.lane.b32.xlu1 %v2596_v14, %s3159_s24  ;;  %v4851_v12 = vpop.permute.xlu1 %2797  ;;  %2603 = vrot.lane.b32.xlu0 %v2595_v3, %s3159_s24 }
0x19b0   : > { %v2801_v36 = vmul.f32 %v4851_v12, %v4382_v5  ;;  %v2800_v20 = vmul.f32 %v4851_v12, %v4374_v41  ;;  %v2803_v2 = vmul.f32 %v4851_v12, %v4392_v35 }
0x19b3   : > { %2609 = vrot.lane.b32.xlu1 %v2598_v32, %s3159_s24  ;;  %v2460_v53 = vpop.permute.xlu1 %2459  ;;  %2607 = vrot.lane.b32.xlu0 %v2597_v27, %s3159_s24 }
0x19b4   : > { %v2465_v55 = vsel %vm2377_vm0, %v2458_v42, %v2460_v53  ;;  %v2466_v56 = vsel %vm2377_vm0, %v2460_v53, %v4856_v34  ;;  %v2684_v42 = vmul.f32 %v2681_v40, %v4382_v5 }
0x19b5   : > { %v4865_v11 = vadd.f32 %v2465_v55, %v4786_v33  ;;  %v4868_v29 = vadd.f32 %v2466_v56, %v4788_v31  ;;  %v2655_v33 = vmul.f32 %v2652_v4, %v4350_v21  ;;  %v2657_v31 = vmul.f32 %v2652_v4, %v5309_v49 }
0x19b6   : > { %v2802_v21 = vmul.f32 %v4851_v12, %v4377_v22 }
0x19b7   : > { %2635 = vrot.lane.b32.xlu1 %v2626_v7, %s3159_s24  ;;  %2633 = vrot.lane.b32.xlu0 %v2625_v38, %s3159_s24  ;;  %v2464_v54 = vpop.permute.xlu1 %2463 }
0x19b8   : > { %v2467_v5 = vsel %vm2377_vm0, %v4856_v34, %v2464_v54 }
0x19b9   : > { %v2473_v19 = vadd.f32 %v2467_v5, %v4791_v58 }
0x19bb   : > { %2639 = vrot.lane.b32.xlu1 %v2628_v62, %s3159_s24  ;;  %2637 = vrot.lane.b32.xlu0 %v2627_v44, %s3159_s24 }
0x19bf   : > { %2664 = vrot.lane.b32.xlu1 %v2655_v33, %s3159_s24  ;;  %2662 = vrot.lane.b32.xlu0 %v2654_v57, %s3159_s24 }
0x19c3   : > { %2668 = vrot.lane.b32.xlu1 %v2657_v31, %s3159_s24  ;;  %2666 = vrot.lane.b32.xlu0 %v2656_v17, %s3159_s24 }
0x19c7   : > { %2693 = vrot.lane.b32.xlu1 %v2684_v42, %s3159_s24  ;;  %2691 = vrot.lane.b32.xlu0 %v2683_v8, %s3159_s24 }
0x19cb   : > { %2697 = vrot.lane.b32.xlu1 %v2686_v48, %s3159_s24  ;;  %2695 = vrot.lane.b32.xlu0 %v2685_v26, %s3159_s24 }
0x19cf   : > { %2722 = vrot.lane.b32.xlu1 %v2713_v47, %s3160_s18  ;;  %2720 = vrot.lane.b32.xlu0 %v2712_v1, %s3160_s18 }
0x19d3   : > { %2726 = vrot.lane.b32.xlu1 %v2715_v18, %s3160_s18  ;;  %2724 = vrot.lane.b32.xlu0 %v2714_v59, %s3160_s18 }
0x19d7   : > { %2752 = vrot.lane.b32.xlu1 %v2743_v50, %s3160_s18  ;;  %2750 = vrot.lane.b32.xlu0 %v2742_v30, %s3160_s18 }
0x19db   : > { %2756 = vrot.lane.b32.xlu1 %v2745_v46, %s3160_s18  ;;  %2754 = vrot.lane.b32.xlu0 %v2744_v25, %s3160_s18 }
0x19df   : > { %2781 = vrot.lane.b32.xlu1 %v2772_v63, %s3160_s18  ;;  %2779 = vrot.lane.b32.xlu0 %v2771_v16, %s3160_s18 }
0x19e3   : > { %2785 = vrot.lane.b32.xlu1 %v2774_v51, %s3160_s18  ;;  %2783 = vrot.lane.b32.xlu0 %v2773_v6, %s3160_s18 }
0x19e7   : > { %2810 = vrot.lane.b32.xlu1 %v2801_v36, %s3160_s18  ;;  %2808 = vrot.lane.b32.xlu0 %v2800_v20, %s3160_s18 }
0x19eb   : > { %2814 = vrot.lane.b32.xlu1 %v2803_v2, %s3160_s18  ;;  %2812 = vrot.lane.b32.xlu0 %v2802_v21, %s3160_s18 }
0x1a01   : > { %v2487_v9 = vpop.permute.xlu0 %2486  ;;  %v2489_v49 = vpop.permute.xlu1 %2488 }
0x1a02   : > { %v2495_v23 = vsel %vm2494_vm1, %v2487_v9, %v2489_v49 }
0x1a03   : > { %v2501_v41 = vadd.f32 %v2495_v23, %v4865_v11 }
0x1a05   : > { %v2491_v28 = vpop.permute.xlu0 %2490  ;;  %v2493_v35 = vpop.permute.xlu1 %2492 }
0x1a06   : > { %v2496_v60 = vsel %vm2494_vm1, %v2489_v49, %v2491_v28  ;;  %v2497_v22 = vsel %vm2494_vm1, %v2491_v28, %v2493_v35 }
0x1a07   : > { %v2502_v39 = vadd.f32 %v2496_v60, %v4868_v29  ;;  %v2503_v4 = vadd.f32 %v2497_v22, %v2473_v19 }
0x1a09   : > { %v2519_v61 = vpop.permute.xlu1 %2518  ;;  %v2517_v10 = vpop.permute.xlu0 %2516 }
0x1a0a   : > { %v2524_v45 = vsel %vm2494_vm1, %v2517_v10, %v2519_v61 }
0x1a0b   : > { %v2530_v37 = vadd.f32 %v2524_v45, %v2501_v41 }
0x1a0d   : > { %v2523_v43 = vpop.permute.xlu1 %2522  ;;  %v2521_v52 = vpop.permute.xlu0 %2520 }
0x1a0e   : > { %v2525_v40 = vsel %vm2494_vm1, %v2519_v61, %v2521_v52  ;;  %v2526_v1 = vsel %vm2494_vm1, %v2521_v52, %v2523_v43 }
0x1a0f   : > { %v2531_v15 = vadd.f32 %v2525_v40, %v2502_v39  ;;  %v2532_v25 = vadd.f32 %v2526_v1, %v2503_v4 }
0x1a11   : > { %v2548_v58 = vpop.permute.xlu1 %2547  ;;  %v2546_v13 = vpop.permute.xlu0 %2545 }
0x1a12   : > { %v2553_v50 = vsel %vm2494_vm1, %v2546_v13, %v2548_v58 }
0x1a13   : > { %v2559_v36 = vadd.f32 %v2553_v50, %v2530_v37 }
0x1a15   : > { %v2552_v24 = vpop.permute.xlu1 %2551  ;;  %v2550_v14 = vpop.permute.xlu0 %2549 }
0x1a16   : > { %v2554_v30 = vsel %vm2494_vm1, %v2548_v58, %v2550_v14  ;;  %v2555_v46 = vsel %vm2494_vm1, %v2550_v14, %v2552_v24 }
0x1a17   : > { %v2560_v20 = vadd.f32 %v2554_v30, %v2531_v15  ;;  %v2561_v2 = vadd.f32 %v2555_v46, %v2532_v25 }
0x1a19   : > { %v2577_v3 = vpop.permute.xlu1 %2576  ;;  %v2575_v0 = vpop.permute.xlu0 %2574 }
0x1a1a   : > { %v2582_v63 = vsel %vm2494_vm1, %v2575_v0, %v2577_v3 }
0x1a1b   : > { %v2588_v5 = vadd.f32 %v2582_v63, %v2559_v36 }
0x1a1d   : > { %v2581_v12 = vpop.permute.xlu1 %2580  ;;  %v2579_v32 = vpop.permute.xlu0 %2578 }
0x1a1e   : > { %v2583_v16 = vsel %vm2494_vm1, %v2577_v3, %v2579_v32  ;;  %v2584_v51 = vsel %vm2494_vm1, %v2579_v32, %v2581_v12 }
0x1a1f   : > { %v2589_v23 = vadd.f32 %v2583_v16, %v2560_v20  ;;  %v2590_v41 = vadd.f32 %v2584_v51, %v2561_v2 }
0x1a21   : > { %v2606_v27 = vpop.permute.xlu1 %2605  ;;  %v2604_v34 = vpop.permute.xlu0 %2603 }
0x1a22   : > { %v2612_v54 = vsel %vm2611_vm5, %v2604_v34, %v2606_v27 }
0x1a23   : > { %v2618_v22 = vadd.f32 %v2612_v54, %v2588_v5 }
0x1a25   : > { %v2610_v53 = vpop.permute.xlu1 %2609  ;;  %v2608_v55 = vpop.permute.xlu0 %2607 }
0x1a26   : > { %v2613_v9 = vsel %vm2611_vm5, %v2606_v27, %v2608_v55  ;;  %v2614_v49 = vsel %vm2611_vm5, %v2608_v55, %v2610_v53 }
0x1a27   : > { %v2619_v39 = vadd.f32 %v2613_v9, %v2589_v23  ;;  %v2620_v4 = vadd.f32 %v2614_v49, %v2590_v41 }
0x1a29   : > { %v2636_v56 = vpop.permute.xlu1 %2635  ;;  %v2634_v7 = vpop.permute.xlu0 %2633 }
0x1a2a   : > { %v2641_v19 = vsel %vm2611_vm5, %v2634_v7, %v2636_v56 }
0x1a2b   : > { %v2647_v43 = vadd.f32 %v2641_v19, %v2618_v22 }
0x1a2d   : > { %v2640_v11 = vpop.permute.xlu1 %2639  ;;  %v2638_v29 = vpop.permute.xlu0 %2637 }
0x1a2e   : > { %v2642_v28 = vsel %vm2611_vm5, %v2636_v56, %v2638_v29  ;;  %v2643_v35 = vsel %vm2611_vm5, %v2638_v29, %v2640_v11 }
0x1a2f   : > { %v2648_v52 = vadd.f32 %v2642_v28, %v2619_v39  ;;  %v2649_v40 = vadd.f32 %v2643_v35, %v2620_v4 }
0x1a31   : > { %v2665_v38 = vpop.permute.xlu1 %2664  ;;  %v2663_v62 = vpop.permute.xlu0 %2662 }
0x1a32   : > { %v2670_v10 = vsel %vm2611_vm5, %v2663_v62, %v2665_v38 }
0x1a33   : > { %v2676_v14 = vadd.f32 %v2670_v10, %v2647_v43 }
0x1a35   : > { %v2669_v44 = vpop.permute.xlu1 %2668  ;;  %v2667_v33 = vpop.permute.xlu0 %2666 }
0x1a36   : > { %v2671_v45 = vsel %vm2611_vm5, %v2665_v38, %v2667_v33  ;;  %v2672_v37 = vsel %vm2611_vm5, %v2667_v33, %v2669_v44 }
0x1a37   : > { %v2677_v3 = vadd.f32 %v2671_v45, %v2648_v52  ;;  %v2678_v0 = vadd.f32 %v2672_v37, %v2649_v40 }
0x1a39   : > { %v2694_v57 = vpop.permute.xlu1 %2693  ;;  %v2692_v31 = vpop.permute.xlu0 %2691 }
0x1a3a   : > { %v2699_v15 = vsel %vm2611_vm5, %v2692_v31, %v2694_v57 }
0x1a3b   : > { %v2705_v53 = vadd.f32 %v2699_v15, %v2676_v14 }
0x1a3d   : > { %v2698_v17 = vpop.permute.xlu1 %2697  ;;  %v2696_v42 = vpop.permute.xlu0 %2695 }
0x1a3e   : > { %v2700_v58 = vsel %vm2611_vm5, %v2694_v57, %v2696_v42  ;;  %v2701_v13 = vsel %vm2611_vm5, %v2696_v42, %v2698_v17 }
0x1a3f   : > { %v2706_v55 = vadd.f32 %v2700_v58, %v2677_v3  ;;  %v2707_v56 = vadd.f32 %v2701_v13, %v2678_v0 }
0x1a41   : > { %v2723_v8 = vpop.permute.xlu1 %2722  ;;  %v2721_v48 = vpop.permute.xlu0 %2720 }
0x1a42   : > { %v2729_v32 = vsel %vm2728_vm6, %v2721_v48, %v2723_v8 }
0x1a43   : > { %v2735_v62 = vadd.f32 %v2729_v32, %v2705_v53 }
0x1a45   : > { %v2727_v26 = vpop.permute.xlu1 %2726  ;;  %v2725_v47 = vpop.permute.xlu0 %2724 }
0x1a46   : > { %v2730_v27 = vsel %vm2728_vm6, %v2723_v8, %v2725_v47  ;;  %v2731_v34 = vsel %vm2728_vm6, %v2725_v47, %v2727_v26 }
0x1a47   : > { %v2736_v44 = vadd.f32 %v2730_v27, %v2706_v55  ;;  %v2737_v33 = vadd.f32 %v2731_v34, %v2707_v56 }
0x1a49   : > { %v2753_v18 = vpop.permute.xlu1 %2752  ;;  %v2751_v59 = vpop.permute.xlu0 %2750 }
0x1a4a   : > { %v2758_v7 = vsel %vm2728_vm6, %v2751_v59, %v2753_v18 }
0x1a4b   : > { %v2764_v8 = vadd.f32 %v2758_v7, %v2735_v62 }
0x1a4d   : > { %v2757_v6 = vpop.permute.xlu1 %2756  ;;  %v2755_v21 = vpop.permute.xlu0 %2754 }
0x1a4e   : > { %v2759_v11 = vsel %vm2728_vm6, %v2753_v18, %v2755_v21  ;;  %v2760_v29 = vsel %vm2728_vm6, %v2755_v21, %v2757_v6 }
0x1a4f   : > { %v2765_v48 = vadd.f32 %v2759_v11, %v2736_v44  ;;  %v2766_v26 = vadd.f32 %v2760_v29, %v2737_v33 }
0x1a51   : > { %v2782_v60 = vpop.permute.xlu1 %2781  ;;  %v2780_v61 = vpop.permute.xlu0 %2779 }
0x1a52   : > { %v2787_v31 = vsel %vm2728_vm6, %v2780_v61, %v2782_v60 }
0x1a53   : > { %v2793_v18 = vadd.f32 %v2787_v31, %v2764_v8 }
0x1a55   : > { %v2786_v24 = vpop.permute.xlu1 %2785  ;;  %v2784_v12 = vpop.permute.xlu0 %2783 }
0x1a56   : > { %v2788_v17 = vsel %vm2728_vm6, %v2782_v60, %v2784_v12  ;;  %v2789_v42 = vsel %vm2728_vm6, %v2784_v12, %v2786_v24 }
0x1a57   : > { %v2794_v59 = vadd.f32 %v2788_v17, %v2765_v48  ;;  %v2795_v50 = vadd.f32 %v2789_v42, %v2766_v26 }
0x1a59   : > { %v2811_v38 = vpop.permute.xlu1 %2810  ;;  %v2809_v57 = vpop.permute.xlu0 %2808 }
0x1a5a   : > { %v2816_v47 = vsel %vm2728_vm6, %v2809_v57, %v2811_v38 }
0x1a5b   : > { %v2822_v63 = vadd.f32 %v2816_v47, %v2793_v18 }
0x1a5d   : > { %v2815_v1 = vpop.permute.xlu1 %2814  ;;  %v2813_v30 = vpop.permute.xlu0 %2812 }
0x1a5e   : > { %v2817_v46 = vsel %vm2728_vm6, %v2811_v38, %v2813_v30  ;;  %v2818_v25 = vsel %vm2728_vm6, %v2813_v30, %v2815_v1 }
0x1a5f   : > { %v2823_v16 = vadd.f32 %v2817_v46, %v2794_v59  ;;  %v2824_v51 = vadd.f32 %v2818_v25, %v2795_v50 }
0x1a61   : > { %v2827_v6 = vcombine.low %v2822_v63, %v2823_v16  ;;  %2830 = vst [vmem:[%s170_s29 + $0x8] sm:$0xf] %v2824_v51 }
0x1a63   : > { %2829 = vst [vmem:[%s170_s29] sm:$0xff] %v2827_v6 }
0x1a64 PF: > { %s13_s12 = sadd.s32 1, %s3085_s12  }
0x1a65   : > { %p10_p4 = scmp.ge.s32.totalorder %s13_s12, 4  }
0x1a67   :  { %12 = sbr.rel (!%p10_p4) target bundleno = 1 (0x1), region = 66 }

</bundles_post_ra>
